<compile_context>
chip_gen: v6e
topology: v6e:2x2x1
jax: 0.10.0
libtpu: 0.0.40
codegen_flags: <defaults>
</compile_context>

<pallas_src>
import math
import numpy as np

import jax
import jax.numpy as jnp
from jax import lax
from jax.experimental import pallas as pl
from jax.experimental.pallas import tpu as pltpu


def _round_up(x, m):
    return ((x + m - 1) // m) * m


def _default_split_recurrent(hidden_size):
    """Split the recurrent matmul per direction on narrow-MXU chips (v5e) or when
    the fused contraction dim (2H) no longer fits one MXU pass (256)."""
    try:
        kind = jax.devices()[0].device_kind.lower()
        if "v5 lite" in kind or "v5e" in kind:
            return True
    except Exception:
        pass
    return (2 * hidden_size) > 256


def _make_encoder_kernel(T, Bp, H, num_layers, split):
    """Fused multi-layer bidirectional LSTM kernel.

    Refs (in order):
      x_ref:   (T*Bp, D0)  time-major, row block t = x_t (Bp padded batch)   [VMEM in]
      per layer l (fused):  wih (Din, 8H), whh (2H, 8H),            b (1, 8H)
      per layer l (split):  wih (Din, 8H), whh_f (H, 4H), whh_b (H, 4H), b (1, 8H)
      out_ref: (T*Bp, 2H)  last layer outputs, cols [fwd | bwd]              [VMEM out]
      gx_ref:  (T*Bp, 8H)  hoisted input projection                          [scratch]
    Column layout of 8H-wide tensors: [fwd (i|f|g|o) 4H | bwd (i|f|g|o) 4H].
    """
    H4 = 4 * H
    npl = 4 if split else 3   # weight refs per layer

    def lstm_cell(g, c):
        # g: (Bp, 4H) pre-activations [i | f | g | o]; c: (Bp, H)
        i_g = jax.nn.sigmoid(g[:, 0 * H:1 * H])
        f_g = jax.nn.sigmoid(g[:, 1 * H:2 * H])
        g_g = jnp.tanh(g[:, 2 * H:3 * H])
        o_g = jax.nn.sigmoid(g[:, 3 * H:4 * H])
        c_new = f_g * c + i_g * g_g
        h_new = o_g * jnp.tanh(c_new)
        return h_new, c_new

    def kernel(*refs):
        x_ref = refs[0]
        w_refs = refs[1:1 + npl * num_layers]
        out_ref = refs[1 + npl * num_layers]
        gx_ref = refs[2 + npl * num_layers]

        layer_in = x_ref[...]                     # (T*Bp, Din), register value
        for layer in range(num_layers):
            lw = w_refs[npl * layer: npl * (layer + 1)]
            wih = lw[0][...]
            b = lw[-1][...]
            # Hoisted whole-sequence input projection: one MXU matmul per layer.
            gx_ref[...] = (
                jnp.dot(layer_in, wih, preferred_element_type=jnp.float32) + b)

            if split:
                whh_f = lw[1][...]                # (H, 4H)
                whh_b = lw[2][...]                # (H, 4H)
            else:
                whh = lw[1][...]                  # (2H, 8H) block-diagonal

            h_f = jnp.zeros((Bp, H), jnp.float32)
            h_b = jnp.zeros((Bp, H), jnp.float32)
            c_f = jnp.zeros((Bp, H), jnp.float32)
            c_b = jnp.zeros((Bp, H), jnp.float32)
            hs_f = [None] * T
            hs_b = [None] * T

            # Statically unrolled time loop (T is small for this module); fwd and
            # bwd directions advance together, sharing the recurrent matmul.
            for i in range(T):
                tf = i
                tb = T - 1 - i
                # Aligned loads: row starts are multiples of 8 (Bp padded), column
                # starts/sizes are multiples of 4H (=128 lanes at H=32).
                gxf = gx_ref[pl.ds(tf * Bp, Bp), pl.ds(0, H4)]     # (Bp, 4H)
                gxb = gx_ref[pl.ds(tb * Bp, Bp), pl.ds(H4, H4)]    # (Bp, 4H)
                if split:
                    g_f = gxf + jnp.dot(h_f, whh_f,
                                        preferred_element_type=jnp.float32)
                    g_b = gxb + jnp.dot(h_b, whh_b,
                                        preferred_element_type=jnp.float32)
                else:
                    hcat = jnp.concatenate([h_f, h_b], axis=1)     # (Bp, 2H)
                    rec = jnp.dot(hcat, whh,
                                  preferred_element_type=jnp.float32)  # (Bp, 8H)
                    g_f = gxf + rec[:, :H4]
                    g_b = gxb + rec[:, H4:]
                h_f, c_f = lstm_cell(g_f, c_f)
                h_b, c_b = lstm_cell(g_b, c_b)
                hs_f[tf] = h_f        # forward output belongs to time tf
                hs_b[tb] = h_b        # backward output belongs to time tb

            # Register-carried output: ONE bulk store per layer instead of 2*T
            # narrow masked column stores inside the recurrence.
            layer_out = jnp.concatenate(
                [jnp.concatenate([hs_f[t], hs_b[t]], axis=1) for t in range(T)],
                axis=0)                                            # (T*Bp, 2H)
            if layer == num_layers - 1:
                out_ref[...] = layer_out
            else:
                layer_in = layer_out   # stays in registers; no scratch round-trip

    return kernel


class LSTMEncoderPallas:
    """Pallas implementation of LSTMencoder (bidirectional, num_layers layers)."""

    def __init__(self, dim_outputs, dim_inputs, dim_states, length,
                 hidden_size=32, num_layers=2, bd=True, key=None,
                 split_recurrent=None):
        assert bd, "this implementation mirrors the default bd=True"
        self.dim_outputs = dim_outputs
        self.dim_inputs = dim_inputs
        self.dim_states = dim_states
        self.length = length
        self.hidden_size = hidden_size
        self.num_layers = num_layers
        self.bd = bd
        self.split_recurrent = (_default_split_recurrent(hidden_size)
                                if split_recurrent is None else split_recurrent)

        if key is None:
            key = jax.random.PRNGKey(0)
        H = hidden_size
        k = 1.0 / math.sqrt(H)

        self.raw = []     # per layer: {fwd/bwd: (wihT (Din,4H), whhT (H,4H), b (1,4H))}
        self.fused = []   # per layer: tuple of kernel weight arrays (layout above)
        for layer in range(num_layers):
            din = (dim_inputs + dim_outputs) if layer == 0 else 2 * H
            per_dir = {}
            for d_name in ("fwd", "bwd"):
                key, k1, k2, k3, k4 = jax.random.split(key, 5)
                # PyTorch stores W_ih: (4H, Din), W_hh: (4H, H); pre-transpose.
                w_ih = jax.random.uniform(k1, (4 * H, din), jnp.float32, -k, k)
                w_hh = jax.random.uniform(k2, (4 * H, H), jnp.float32, -k, k)
                b_ih = jax.random.uniform(k3, (4 * H,), jnp.float32, -k, k)
                b_hh = jax.random.uniform(k4, (4 * H,), jnp.float32, -k, k)
                per_dir[d_name] = (
                    jnp.transpose(w_ih),                 # (Din, 4H)
                    jnp.transpose(w_hh),                 # (H, 4H)
                    (b_ih + b_hh).reshape(1, 4 * H),     # (1, 4H)
                )
            self.raw.append(per_dir)

            wih_c = jnp.concatenate([per_dir["fwd"][0], per_dir["bwd"][0]], axis=1)
            b_c = jnp.concatenate([per_dir["fwd"][2], per_dir["bwd"][2]], axis=1)
            if self.split_recurrent:
                self.fused.append((wih_c, per_dir["fwd"][1], per_dir["bwd"][1], b_c))
            else:
                zeros_h = jnp.zeros((H, 4 * H), jnp.float32)
                whh_c = jnp.concatenate(
                    [jnp.concatenate([per_dir["fwd"][1], zeros_h], axis=1),
                     jnp.concatenate([zeros_h, per_dir["bwd"][1]], axis=1)],
                    axis=0)                              # (2H, 8H) block-diagonal
                self.fused.append((wih_c, whh_c, b_c))

        self._jit_forward = jax.jit(self._forward)

    # ----- fused Pallas forward -----
    def _forward(self, output_sequence, input_sequence):
        if input_sequence is None:
            io = output_sequence
        else:
            io = jnp.concatenate(
                [output_sequence, input_sequence[:, ::-1, :]], axis=-1)
        B, T, D0 = io.shape
        H = self.hidden_size
        Bp = _round_up(B, 8)   # sublane-align every per-step row block

        # time-major, batch padded to Bp, flattened to (T*Bp, D0).
        x_tm = jnp.transpose(io, (1, 0, 2)).astype(jnp.float32)     # (T, B, D0)
        if Bp != B:
            x_tm = jnp.pad(x_tm, ((0, 0), (0, Bp - B), (0, 0)))
        x2d = x_tm.reshape(T * Bp, D0)

        kernel = _make_encoder_kernel(T, Bp, H, self.num_layers,
                                      self.split_recurrent)
        vmem = pl.BlockSpec(memory_space=pltpu.MemorySpace.VMEM)
        flat_params = [p for lp in self.fused for p in lp]

        param_bytes = sum(int(np.prod(p.shape)) * 4 for p in flat_params)
        act_bytes = (T * Bp * D0 + T * Bp * 2 * H + T * Bp * 8 * H) * 4
        vmem_limit = int(min(max(2 * (param_bytes + act_bytes) + (4 << 20),
                                 16 << 20), 100 << 20))

        out2d = pl.pallas_call(
            kernel,
            out_shape=jax.ShapeDtypeStruct((T * Bp, 2 * H), jnp.float32),
            in_specs=[vmem] * (1 + len(flat_params)),
            out_specs=vmem,
            scratch_shapes=[pltpu.VMEM((T * Bp, 8 * H), jnp.float32)],
            compiler_params=pltpu.CompilerParams(vmem_limit_bytes=vmem_limit),
        )(x2d, *flat_params)

        out = out2d.reshape(T, Bp, 2 * H)[:, :B]
        return jnp.transpose(out, (1, 0, 2))   # (B, T, 2H)

    def __call__(self, output_sequence, input_sequence=None):
        return self._jit_forward(output_sequence, input_sequence)

    # ----- pure-JAX reference (no Pallas) for correctness checking -----
    def reference(self, output_sequence, input_sequence=None):
        if input_sequence is None:
            io = output_sequence
        else:
            io = jnp.concatenate(
                [output_sequence, input_sequence[:, ::-1, :]], axis=-1)
        x = jnp.transpose(io, (1, 0, 2)).astype(jnp.float32)  # (T, B, D)
        H = self.hidden_size

        def run_dir(x_tbd, wih, whh, b, reverse):
            seq = x_tbd[::-1] if reverse else x_tbd
            B = x_tbd.shape[1]

            def step(carry, x_t):
                h, c = carry
                g = x_t @ wih + h @ whh + b
                i_g = jax.nn.sigmoid(g[:, 0 * H:1 * H])
                f_g = jax.nn.sigmoid(g[:, 1 * H:2 * H])
                g_g = jnp.tanh(g[:, 2 * H:3 * H])
                o_g = jax.nn.sigmoid(g[:, 3 * H:4 * H])
                c_new = f_g * c + i_g * g_g
                h_new = o_g * jnp.tanh(c_new)
                return (h_new, c_new), h_new

            init = (jnp.zeros((B, H), jnp.float32),
                    jnp.zeros((B, H), jnp.float32))
            _, hs = lax.scan(step, init, seq)
            return hs[::-1] if reverse else hs

        for layer in range(self.num_layers):
            pf = self.raw[layer]["fwd"]
            pb = self.raw[layer]["bwd"]
            out_f = run_dir(x, *pf, reverse=False)
            out_b = run_dir(x, *pb, reverse=True)
            x = jnp.concatenate([out_f, out_b], axis=-1)
        return jnp.transpose(x, (1, 0, 2))


if __name__ == "__main__":
    # Small shapes consistent with the module.
    B, T = 2, 8
    dim_outputs, dim_inputs, dim_states = 4, 4, 3
    hidden_size, num_layers = 32, 2

    key = jax.random.PRNGKey(0)
    k_out, k_in, k_param = jax.random.split(key, 3)
    output_sequence = jax.random.normal(k_out, (B, T, dim_outputs), jnp.float32)
    input_sequence = jax.random.normal(k_in, (B, T, dim_inputs), jnp.float32)

    enc = LSTMEncoderPallas(dim_outputs, dim_inputs, dim_states, T,
                            hidden_size=hidden_size, num_layers=num_layers,
                            bd=True, key=k_param)

    out = jax.block_until_ready(enc(output_sequence, input_sequence))
    assert out.shape == (B, T, 2 * hidden_size), out.shape

    ref = jax.block_until_ready(enc.reference(output_sequence, input_sequence))
    np.testing.assert_allclose(np.asarray(out), np.asarray(ref),
                               rtol=1e-5, atol=1e-5)

    print("KERNEL_OK")
</pallas_src>

<mosaic_0001>
module attributes {stable_mosaic.version = 11 : i64} {
  func.func @kernel(%arg0: memref<64x8xf32, #tpu.memory_space<vmem>>, %arg1: memref<8x256xf32, #tpu.memory_space<vmem>>, %arg2: memref<64x256xf32, #tpu.memory_space<vmem>>, %arg3: memref<1x256xf32, #tpu.memory_space<vmem>>, %arg4: memref<64x256xf32, #tpu.memory_space<vmem>>, %arg5: memref<64x256xf32, #tpu.memory_space<vmem>>, %arg6: memref<1x256xf32, #tpu.memory_space<vmem>>, %arg7: memref<64x64xf32, #tpu.memory_space<vmem>>, %arg8: memref<64x256xf32, #tpu.memory_space<vmem>>) attributes {dimension_semantics = [], scalar_prefetch = 0 : i64, scratch_operands = 1 : i64, tpu.core_type = #tpu.core_type<tc>} {
    %c0 = arith.constant 0 : index
    %c0_0 = arith.constant 0 : index
    %0 = vector.load %arg0[%c0, %c0_0] : memref<64x8xf32, #tpu.memory_space<vmem>>, vector<64x8xf32>
    %c0_1 = arith.constant 0 : index
    %c0_2 = arith.constant 0 : index
    %1 = vector.load %arg1[%c0_1, %c0_2] : memref<8x256xf32, #tpu.memory_space<vmem>>, vector<8x256xf32>
    %c0_3 = arith.constant 0 : index
    %c0_4 = arith.constant 0 : index
    %2 = vector.load %arg3[%c0_3, %c0_4] : memref<1x256xf32, #tpu.memory_space<vmem>>, vector<1x256xf32>
    %cst = arith.constant dense<0.000000e+00> : vector<64x256xf32>
    %3 = tpu.matmul %0, %1, %cst {dimension_numbers = #tpu.dot_dimension_numbers<[1], [0], [0], [1], [0, 0, 1, 1], [], []>} : vector<64x8xf32>, vector<8x256xf32>, vector<64x256xf32> -> vector<64x256xf32>
    %4 = vector.broadcast %2 : vector<1x256xf32> to vector<64x256xf32>
    %5 = arith.addf %3, %4 : vector<64x256xf32>
    %c0_5 = arith.constant 0 : index
    %c0_6 = arith.constant 0 : index
    %6 = vector.load %arg8[%c0_5, %c0_6] : memref<64x256xf32, #tpu.memory_space<vmem>>, vector<64x256xf32>
    tpu.vector_store %arg8[%c0_5, %c0_6], %5 {strides = array<i32>} : memref<64x256xf32, #tpu.memory_space<vmem>>, vector<64x256xf32>,
    %c0_7 = arith.constant 0 : index
    %c0_8 = arith.constant 0 : index
    %7 = vector.load %arg2[%c0_7, %c0_8] : memref<64x256xf32, #tpu.memory_space<vmem>>, vector<64x256xf32>
    %cst_9 = arith.constant 0.000000e+00 : f32
    %8 = vector.broadcast %cst_9 : f32 to vector<8x32xf32>
    %cst_10 = arith.constant 0.000000e+00 : f32
    %9 = vector.broadcast %cst_10 : f32 to vector<8x32xf32>
    %cst_11 = arith.constant 0.000000e+00 : f32
    %10 = vector.broadcast %cst_11 : f32 to vector<8x32xf32>
    %cst_12 = arith.constant 0.000000e+00 : f32
    %11 = vector.broadcast %cst_12 : f32 to vector<8x32xf32>
    %c0_13 = arith.constant 0 : index
    %c0_14 = arith.constant 0 : index
    %12 = vector.load %arg8[%c0_13, %c0_14] : memref<64x256xf32, #tpu.memory_space<vmem>>, vector<8x128xf32>
    %c56 = arith.constant 56 : index
    %c128 = arith.constant 128 : index
    %13 = vector.load %arg8[%c56, %c128] : memref<64x256xf32, #tpu.memory_space<vmem>>, vector<8x128xf32>
    %14 = tpu.concatenate %8, %9 in 1 : vector<8x32xf32>, vector<8x32xf32> -> vector<8x64xf32>
    %cst_15 = arith.constant dense<0.000000e+00> : vector<8x256xf32>
    %15 = tpu.matmul %14, %7, %cst_15 {dimension_numbers = #tpu.dot_dimension_numbers<[1], [0], [0], [1], [0, 0, 1, 1], [], []>} : vector<8x64xf32>, vector<64x256xf32>, vector<8x256xf32> -> vector<8x256xf32>
    %16 = vector.extract_strided_slice %15 {offsets = [0, 0], sizes = [8, 128], strides = [1, 1]} : vector<8x256xf32> to vector<8x128xf32>
    %17 = arith.addf %12, %16 : vector<8x128xf32>
    %18 = vector.extract_strided_slice %15 {offsets = [0, 128], sizes = [8, 128], strides = [1, 1]} : vector<8x256xf32> to vector<8x128xf32>
    %19 = arith.addf %13, %18 : vector<8x128xf32>
    %20 = vector.extract_strided_slice %17 {offsets = [0, 0], sizes = [8, 32], strides = [1, 1]} : vector<8x128xf32> to vector<8x32xf32>
    %21 = arith.negf %20 : vector<8x32xf32>
    %22 = math.exp %21 : vector<8x32xf32>
    %cst_16 = arith.constant 1.000000e+00 : f32
    %23 = vector.broadcast %cst_16 : f32 to vector<8x32xf32>
    %24 = arith.addf %23, %22 : vector<8x32xf32>
    %25 = arith.divf %23, %24 : vector<8x32xf32>
    %26 = vector.extract_strided_slice %17 {offsets = [0, 32], sizes = [8, 32], strides = [1, 1]} : vector<8x128xf32> to vector<8x32xf32>
    %27 = arith.negf %26 : vector<8x32xf32>
    %28 = math.exp %27 : vector<8x32xf32>
    %cst_17 = arith.constant 1.000000e+00 : f32
    %29 = vector.broadcast %cst_17 : f32 to vector<8x32xf32>
    %30 = arith.addf %29, %28 : vector<8x32xf32>
    %31 = arith.divf %29, %30 : vector<8x32xf32>
    %32 = vector.extract_strided_slice %17 {offsets = [0, 64], sizes = [8, 32], strides = [1, 1]} : vector<8x128xf32> to vector<8x32xf32>
    %33 = math.tanh %32 : vector<8x32xf32>
    %34 = vector.extract_strided_slice %17 {offsets = [0, 96], sizes = [8, 32], strides = [1, 1]} : vector<8x128xf32> to vector<8x32xf32>
    %35 = arith.negf %34 : vector<8x32xf32>
    %36 = math.exp %35 : vector<8x32xf32>
    %cst_18 = arith.constant 1.000000e+00 : f32
    %37 = vector.broadcast %cst_18 : f32 to vector<8x32xf32>
    %38 = arith.addf %37, %36 : vector<8x32xf32>
    %39 = arith.divf %37, %38 : vector<8x32xf32>
    %40 = arith.mulf %31, %10 : vector<8x32xf32>
    %41 = arith.mulf %25, %33 : vector<8x32xf32>
    %42 = arith.addf %40, %41 : vector<8x32xf32>
    %43 = math.tanh %42 : vector<8x32xf32>
    %44 = arith.mulf %39, %43 : vector<8x32xf32>
    %45 = vector.extract_strided_slice %19 {offsets = [0, 0], sizes = [8, 32], strides = [1, 1]} : vector<8x128xf32> to vector<8x32xf32>
    %46 = arith.negf %45 : vector<8x32xf32>
    %47 = math.exp %46 : vector<8x32xf32>
    %cst_19 = arith.constant 1.000000e+00 : f32
    %48 = vector.broadcast %cst_19 : f32 to vector<8x32xf32>
    %49 = arith.addf %48, %47 : vector<8x32xf32>
    %50 = arith.divf %48, %49 : vector<8x32xf32>
    %51 = vector.extract_strided_slice %19 {offsets = [0, 32], sizes = [8, 32], strides = [1, 1]} : vector<8x128xf32> to vector<8x32xf32>
    %52 = arith.negf %51 : vector<8x32xf32>
    %53 = math.exp %52 : vector<8x32xf32>
    %cst_20 = arith.constant 1.000000e+00 : f32
    %54 = vector.broadcast %cst_20 : f32 to vector<8x32xf32>
    %55 = arith.addf %54, %53 : vector<8x32xf32>
    %56 = arith.divf %54, %55 : vector<8x32xf32>
    %57 = vector.extract_strided_slice %19 {offsets = [0, 64], sizes = [8, 32], strides = [1, 1]} : vector<8x128xf32> to vector<8x32xf32>
    %58 = math.tanh %57 : vector<8x32xf32>
    %59 = vector.extract_strided_slice %19 {offsets = [0, 96], sizes = [8, 32], strides = [1, 1]} : vector<8x128xf32> to vector<8x32xf32>
    %60 = arith.negf %59 : vector<8x32xf32>
    %61 = math.exp %60 : vector<8x32xf32>
    %cst_21 = arith.constant 1.000000e+00 : f32
    %62 = vector.broadcast %cst_21 : f32 to vector<8x32xf32>
    %63 = arith.addf %62, %61 : vector<8x32xf32>
    %64 = arith.divf %62, %63 : vector<8x32xf32>
    %65 = arith.mulf %56, %11 : vector<8x32xf32>
    %66 = arith.mulf %50, %58 : vector<8x32xf32>
    %67 = arith.addf %65, %66 : vector<8x32xf32>
    %68 = math.tanh %67 : vector<8x32xf32>
    %69 = arith.mulf %64, %68 : vector<8x32xf32>
    %c8 = arith.constant 8 : index
    %c0_22 = arith.constant 0 : index
    %70 = vector.load %arg8[%c8, %c0_22] : memref<64x256xf32, #tpu.memory_space<vmem>>, vector<8x128xf32>
    %c48 = arith.constant 48 : index
    %c128_23 = arith.constant 128 : index
    %71 = vector.load %arg8[%c48, %c128_23] : memref<64x256xf32, #tpu.memory_space<vmem>>, vector<8x128xf32>
    %72 = tpu.concatenate %44, %69 in 1 : vector<8x32xf32>, vector<8x32xf32> -> vector<8x64xf32>
    %cst_24 = arith.constant dense<0.000000e+00> : vector<8x256xf32>
    %73 = tpu.matmul %72, %7, %cst_24 {dimension_numbers = #tpu.dot_dimension_numbers<[1], [0], [0], [1], [0, 0, 1, 1], [], []>} : vector<8x64xf32>, vector<64x256xf32>, vector<8x256xf32> -> vector<8x256xf32>
    %74 = vector.extract_strided_slice %73 {offsets = [0, 0], sizes = [8, 128], strides = [1, 1]} : vector<8x256xf32> to vector<8x128xf32>
    %75 = arith.addf %70, %74 : vector<8x128xf32>
    %76 = vector.extract_strided_slice %73 {offsets = [0, 128], sizes = [8, 128], strides = [1, 1]} : vector<8x256xf32> to vector<8x128xf32>
    %77 = arith.addf %71, %76 : vector<8x128xf32>
    %78 = vector.extract_strided_slice %75 {offsets = [0, 0], sizes = [8, 32], strides = [1, 1]} : vector<8x128xf32> to vector<8x32xf32>
    %79 = arith.negf %78 : vector<8x32xf32>
    %80 = math.exp %79 : vector<8x32xf32>
    %cst_25 = arith.constant 1.000000e+00 : f32
    %81 = vector.broadcast %cst_25 : f32 to vector<8x32xf32>
    %82 = arith.addf %81, %80 : vector<8x32xf32>
    %83 = arith.divf %81, %82 : vector<8x32xf32>
    %84 = vector.extract_strided_slice %75 {offsets = [0, 32], sizes = [8, 32], strides = [1, 1]} : vector<8x128xf32> to vector<8x32xf32>
    %85 = arith.negf %84 : vector<8x32xf32>
    %86 = math.exp %85 : vector<8x32xf32>
    %cst_26 = arith.constant 1.000000e+00 : f32
    %87 = vector.broadcast %cst_26 : f32 to vector<8x32xf32>
    %88 = arith.addf %87, %86 : vector<8x32xf32>
    %89 = arith.divf %87, %88 : vector<8x32xf32>
    %90 = vector.extract_strided_slice %75 {offsets = [0, 64], sizes = [8, 32], strides = [1, 1]} : vector<8x128xf32> to vector<8x32xf32>
    %91 = math.tanh %90 : vector<8x32xf32>
    %92 = vector.extract_strided_slice %75 {offsets = [0, 96], sizes = [8, 32], strides = [1, 1]} : vector<8x128xf32> to vector<8x32xf32>
    %93 = arith.negf %92 : vector<8x32xf32>
    %94 = math.exp %93 : vector<8x32xf32>
    %cst_27 = arith.constant 1.000000e+00 : f32
    %95 = vector.broadcast %cst_27 : f32 to vector<8x32xf32>
    %96 = arith.addf %95, %94 : vector<8x32xf32>
    %97 = arith.divf %95, %96 : vector<8x32xf32>
    %98 = arith.mulf %89, %42 : vector<8x32xf32>
    %99 = arith.mulf %83, %91 : vector<8x32xf32>
    %100 = arith.addf %98, %99 : vector<8x32xf32>
    %101 = math.tanh %100 : vector<8x32xf32>
    %102 = arith.mulf %97, %101 : vector<8x32xf32>
    %103 = vector.extract_strided_slice %77 {offsets = [0, 0], sizes = [8, 32], strides = [1, 1]} : vector<8x128xf32> to vector<8x32xf32>
    %104 = arith.negf %103 : vector<8x32xf32>
    %105 = math.exp %104 : vector<8x32xf32>
    %cst_28 = arith.constant 1.000000e+00 : f32
    %106 = vector.broadcast %cst_28 : f32 to vector<8x32xf32>
    %107 = arith.addf %106, %105 : vector<8x32xf32>
    %108 = arith.divf %106, %107 : vector<8x32xf32>
    %109 = vector.extract_strided_slice %77 {offsets = [0, 32], sizes = [8, 32], strides = [1, 1]} : vector<8x128xf32> to vector<8x32xf32>
    %110 = arith.negf %109 : vector<8x32xf32>
    %111 = math.exp %110 : vector<8x32xf32>
    %cst_29 = arith.constant 1.000000e+00 : f32
    %112 = vector.broadcast %cst_29 : f32 to vector<8x32xf32>
    %113 = arith.addf %112, %111 : vector<8x32xf32>
    %114 = arith.divf %112, %113 : vector<8x32xf32>
    %115 = vector.extract_strided_slice %77 {offsets = [0, 64], sizes = [8, 32], strides = [1, 1]} : vector<8x128xf32> to vector<8x32xf32>
    %116 = math.tanh %115 : vector<8x32xf32>
    %117 = vector.extract_strided_slice %77 {offsets = [0, 96], sizes = [8, 32], strides = [1, 1]} : vector<8x128xf32> to vector<8x32xf32>
    %118 = arith.negf %117 : vector<8x32xf32>
    %119 = math.exp %118 : vector<8x32xf32>
    %cst_30 = arith.constant 1.000000e+00 : f32
    %120 = vector.broadcast %cst_30 : f32 to vector<8x32xf32>
    %121 = arith.addf %120, %119 : vector<8x32xf32>
    %122 = arith.divf %120, %121 : vector<8x32xf32>
    %123 = arith.mulf %114, %67 : vector<8x32xf32>
    %124 = arith.mulf %108, %116 : vector<8x32xf32>
    %125 = arith.addf %123, %124 : vector<8x32xf32>
    %126 = math.tanh %125 : vector<8x32xf32>
    %127 = arith.mulf %122, %126 : vector<8x32xf32>
    %c16 = arith.constant 16 : index
    %c0_31 = arith.constant 0 : index
    %128 = vector.load %arg8[%c16, %c0_31] : memref<64x256xf32, #tpu.memory_space<vmem>>, vector<8x128xf32>
    %c40 = arith.constant 40 : index
    %c128_32 = arith.constant 128 : index
    %129 = vector.load %arg8[%c40, %c128_32] : memref<64x256xf32, #tpu.memory_space<vmem>>, vector<8x128xf32>
    %130 = tpu.concatenate %102, %127 in 1 : vector<8x32xf32>, vector<8x32xf32> -> vector<8x64xf32>
    %cst_33 = arith.constant dense<0.000000e+00> : vector<8x256xf32>
    %131 = tpu.matmul %130, %7, %cst_33 {dimension_numbers = #tpu.dot_dimension_numbers<[1], [0], [0], [1], [0, 0, 1, 1], [], []>} : vector<8x64xf32>, vector<64x256xf32>, vector<8x256xf32> -> vector<8x256xf32>
    %132 = vector.extract_strided_slice %131 {offsets = [0, 0], sizes = [8, 128], strides = [1, 1]} : vector<8x256xf32> to vector<8x128xf32>
    %133 = arith.addf %128, %132 : vector<8x128xf32>
    %134 = vector.extract_strided_slice %131 {offsets = [0, 128], sizes = [8, 128], strides = [1, 1]} : vector<8x256xf32> to vector<8x128xf32>
    %135 = arith.addf %129, %134 : vector<8x128xf32>
    %136 = vector.extract_strided_slice %133 {offsets = [0, 0], sizes = [8, 32], strides = [1, 1]} : vector<8x128xf32> to vector<8x32xf32>
    %137 = arith.negf %136 : vector<8x32xf32>
    %138 = math.exp %137 : vector<8x32xf32>
    %cst_34 = arith.constant 1.000000e+00 : f32
    %139 = vector.broadcast %cst_34 : f32 to vector<8x32xf32>
    %140 = arith.addf %139, %138 : vector<8x32xf32>
    %141 = arith.divf %139, %140 : vector<8x32xf32>
    %142 = vector.extract_strided_slice %133 {offsets = [0, 32], sizes = [8, 32], strides = [1, 1]} : vector<8x128xf32> to vector<8x32xf32>
    %143 = arith.negf %142 : vector<8x32xf32>
    %144 = math.exp %143 : vector<8x32xf32>
    %cst_35 = arith.constant 1.000000e+00 : f32
    %145 = vector.broadcast %cst_35 : f32 to vector<8x32xf32>
    %146 = arith.addf %145, %144 : vector<8x32xf32>
    %147 = arith.divf %145, %146 : vector<8x32xf32>
    %148 = vector.extract_strided_slice %133 {offsets = [0, 64], sizes = [8, 32], strides = [1, 1]} : vector<8x128xf32> to vector<8x32xf32>
    %149 = math.tanh %148 : vector<8x32xf32>
    %150 = vector.extract_strided_slice %133 {offsets = [0, 96], sizes = [8, 32], strides = [1, 1]} : vector<8x128xf32> to vector<8x32xf32>
    %151 = arith.negf %150 : vector<8x32xf32>
    %152 = math.exp %151 : vector<8x32xf32>
    %cst_36 = arith.constant 1.000000e+00 : f32
    %153 = vector.broadcast %cst_36 : f32 to vector<8x32xf32>
    %154 = arith.addf %153, %152 : vector<8x32xf32>
    %155 = arith.divf %153, %154 : vector<8x32xf32>
    %156 = arith.mulf %147, %100 : vector<8x32xf32>
    %157 = arith.mulf %141, %149 : vector<8x32xf32>
    %158 = arith.addf %156, %157 : vector<8x32xf32>
    %159 = math.tanh %158 : vector<8x32xf32>
    %160 = arith.mulf %155, %159 : vector<8x32xf32>
    %161 = vector.extract_strided_slice %135 {offsets = [0, 0], sizes = [8, 32], strides = [1, 1]} : vector<8x128xf32> to vector<8x32xf32>
    %162 = arith.negf %161 : vector<8x32xf32>
    %163 = math.exp %162 : vector<8x32xf32>
    %cst_37 = arith.constant 1.000000e+00 : f32
    %164 = vector.broadcast %cst_37 : f32 to vector<8x32xf32>
    %165 = arith.addf %164, %163 : vector<8x32xf32>
    %166 = arith.divf %164, %165 : vector<8x32xf32>
    %167 = vector.extract_strided_slice %135 {offsets = [0, 32], sizes = [8, 32], strides = [1, 1]} : vector<8x128xf32> to vector<8x32xf32>
    %168 = arith.negf %167 : vector<8x32xf32>
    %169 = math.exp %168 : vector<8x32xf32>
    %cst_38 = arith.constant 1.000000e+00 : f32
    %170 = vector.broadcast %cst_38 : f32 to vector<8x32xf32>
    %171 = arith.addf %170, %169 : vector<8x32xf32>
    %172 = arith.divf %170, %171 : vector<8x32xf32>
    %173 = vector.extract_strided_slice %135 {offsets = [0, 64], sizes = [8, 32], strides = [1, 1]} : vector<8x128xf32> to vector<8x32xf32>
    %174 = math.tanh %173 : vector<8x32xf32>
    %175 = vector.extract_strided_slice %135 {offsets = [0, 96], sizes = [8, 32], strides = [1, 1]} : vector<8x128xf32> to vector<8x32xf32>
    %176 = arith.negf %175 : vector<8x32xf32>
    %177 = math.exp %176 : vector<8x32xf32>
    %cst_39 = arith.constant 1.000000e+00 : f32
    %178 = vector.broadcast %cst_39 : f32 to vector<8x32xf32>
    %179 = arith.addf %178, %177 : vector<8x32xf32>
    %180 = arith.divf %178, %179 : vector<8x32xf32>
    %181 = arith.mulf %172, %125 : vector<8x32xf32>
    %182 = arith.mulf %166, %174 : vector<8x32xf32>
    %183 = arith.addf %181, %182 : vector<8x32xf32>
    %184 = math.tanh %183 : vector<8x32xf32>
    %185 = arith.mulf %180, %184 : vector<8x32xf32>
    %c24 = arith.constant 24 : index
    %c0_40 = arith.constant 0 : index
    %186 = vector.load %arg8[%c24, %c0_40] : memref<64x256xf32, #tpu.memory_space<vmem>>, vector<8x128xf32>
    %c32 = arith.constant 32 : index
    %c128_41 = arith.constant 128 : index
    %187 = vector.load %arg8[%c32, %c128_41] : memref<64x256xf32, #tpu.memory_space<vmem>>, vector<8x128xf32>
    %188 = tpu.concatenate %160, %185 in 1 : vector<8x32xf32>, vector<8x32xf32> -> vector<8x64xf32>
    %cst_42 = arith.constant dense<0.000000e+00> : vector<8x256xf32>
    %189 = tpu.matmul %188, %7, %cst_42 {dimension_numbers = #tpu.dot_dimension_numbers<[1], [0], [0], [1], [0, 0, 1, 1], [], []>} : vector<8x64xf32>, vector<64x256xf32>, vector<8x256xf32> -> vector<8x256xf32>
    %190 = vector.extract_strided_slice %189 {offsets = [0, 0], sizes = [8, 128], strides = [1, 1]} : vector<8x256xf32> to vector<8x128xf32>
    %191 = arith.addf %186, %190 : vector<8x128xf32>
    %192 = vector.extract_strided_slice %189 {offsets = [0, 128], sizes = [8, 128], strides = [1, 1]} : vector<8x256xf32> to vector<8x128xf32>
    %193 = arith.addf %187, %192 : vector<8x128xf32>
    %194 = vector.extract_strided_slice %191 {offsets = [0, 0], sizes = [8, 32], strides = [1, 1]} : vector<8x128xf32> to vector<8x32xf32>
    %195 = arith.negf %194 : vector<8x32xf32>
    %196 = math.exp %195 : vector<8x32xf32>
    %cst_43 = arith.constant 1.000000e+00 : f32
    %197 = vector.broadcast %cst_43 : f32 to vector<8x32xf32>
    %198 = arith.addf %197, %196 : vector<8x32xf32>
    %199 = arith.divf %197, %198 : vector<8x32xf32>
    %200 = vector.extract_strided_slice %191 {offsets = [0, 32], sizes = [8, 32], strides = [1, 1]} : vector<8x128xf32> to vector<8x32xf32>
    %201 = arith.negf %200 : vector<8x32xf32>
    %202 = math.exp %201 : vector<8x32xf32>
    %cst_44 = arith.constant 1.000000e+00 : f32
    %203 = vector.broadcast %cst_44 : f32 to vector<8x32xf32>
    %204 = arith.addf %203, %202 : vector<8x32xf32>
    %205 = arith.divf %203, %204 : vector<8x32xf32>
    %206 = vector.extract_strided_slice %191 {offsets = [0, 64], sizes = [8, 32], strides = [1, 1]} : vector<8x128xf32> to vector<8x32xf32>
    %207 = math.tanh %206 : vector<8x32xf32>
    %208 = vector.extract_strided_slice %191 {offsets = [0, 96], sizes = [8, 32], strides = [1, 1]} : vector<8x128xf32> to vector<8x32xf32>
    %209 = arith.negf %208 : vector<8x32xf32>
    %210 = math.exp %209 : vector<8x32xf32>
    %cst_45 = arith.constant 1.000000e+00 : f32
    %211 = vector.broadcast %cst_45 : f32 to vector<8x32xf32>
    %212 = arith.addf %211, %210 : vector<8x32xf32>
    %213 = arith.divf %211, %212 : vector<8x32xf32>
    %214 = arith.mulf %205, %158 : vector<8x32xf32>
    %215 = arith.mulf %199, %207 : vector<8x32xf32>
    %216 = arith.addf %214, %215 : vector<8x32xf32>
    %217 = math.tanh %216 : vector<8x32xf32>
    %218 = arith.mulf %213, %217 : vector<8x32xf32>
    %219 = vector.extract_strided_slice %193 {offsets = [0, 0], sizes = [8, 32], strides = [1, 1]} : vector<8x128xf32> to vector<8x32xf32>
    %220 = arith.negf %219 : vector<8x32xf32>
    %221 = math.exp %220 : vector<8x32xf32>
    %cst_46 = arith.constant 1.000000e+00 : f32
    %222 = vector.broadcast %cst_46 : f32 to vector<8x32xf32>
    %223 = arith.addf %222, %221 : vector<8x32xf32>
    %224 = arith.divf %222, %223 : vector<8x32xf32>
    %225 = vector.extract_strided_slice %193 {offsets = [0, 32], sizes = [8, 32], strides = [1, 1]} : vector<8x128xf32> to vector<8x32xf32>
    %226 = arith.negf %225 : vector<8x32xf32>
    %227 = math.exp %226 : vector<8x32xf32>
    %cst_47 = arith.constant 1.000000e+00 : f32
    %228 = vector.broadcast %cst_47 : f32 to vector<8x32xf32>
    %229 = arith.addf %228, %227 : vector<8x32xf32>
    %230 = arith.divf %228, %229 : vector<8x32xf32>
    %231 = vector.extract_strided_slice %193 {offsets = [0, 64], sizes = [8, 32], strides = [1, 1]} : vector<8x128xf32> to vector<8x32xf32>
    %232 = math.tanh %231 : vector<8x32xf32>
    %233 = vector.extract_strided_slice %193 {offsets = [0, 96], sizes = [8, 32], strides = [1, 1]} : vector<8x128xf32> to vector<8x32xf32>
    %234 = arith.negf %233 : vector<8x32xf32>
    %235 = math.exp %234 : vector<8x32xf32>
    %cst_48 = arith.constant 1.000000e+00 : f32
    %236 = vector.broadcast %cst_48 : f32 to vector<8x32xf32>
    %237 = arith.addf %236, %235 : vector<8x32xf32>
    %238 = arith.divf %236, %237 : vector<8x32xf32>
    %239 = arith.mulf %230, %183 : vector<8x32xf32>
    %240 = arith.mulf %224, %232 : vector<8x32xf32>
    %241 = arith.addf %239, %240 : vector<8x32xf32>
    %242 = math.tanh %241 : vector<8x32xf32>
    %243 = arith.mulf %238, %242 : vector<8x32xf32>
    %c32_49 = arith.constant 32 : index
    %c0_50 = arith.constant 0 : index
    %244 = vector.load %arg8[%c32_49, %c0_50] : memref<64x256xf32, #tpu.memory_space<vmem>>, vector<8x128xf32>
    %c24_51 = arith.constant 24 : index
    %c128_52 = arith.constant 128 : index
    %245 = vector.load %arg8[%c24_51, %c128_52] : memref<64x256xf32, #tpu.memory_space<vmem>>, vector<8x128xf32>
    %246 = tpu.concatenate %218, %243 in 1 : vector<8x32xf32>, vector<8x32xf32> -> vector<8x64xf32>
    %cst_53 = arith.constant dense<0.000000e+00> : vector<8x256xf32>
    %247 = tpu.matmul %246, %7, %cst_53 {dimension_numbers = #tpu.dot_dimension_numbers<[1], [0], [0], [1], [0, 0, 1, 1], [], []>} : vector<8x64xf32>, vector<64x256xf32>, vector<8x256xf32> -> vector<8x256xf32>
    %248 = vector.extract_strided_slice %247 {offsets = [0, 0], sizes = [8, 128], strides = [1, 1]} : vector<8x256xf32> to vector<8x128xf32>
    %249 = arith.addf %244, %248 : vector<8x128xf32>
    %250 = vector.extract_strided_slice %247 {offsets = [0, 128], sizes = [8, 128], strides = [1, 1]} : vector<8x256xf32> to vector<8x128xf32>
    %251 = arith.addf %245, %250 : vector<8x128xf32>
    %252 = vector.extract_strided_slice %249 {offsets = [0, 0], sizes = [8, 32], strides = [1, 1]} : vector<8x128xf32> to vector<8x32xf32>
    %253 = arith.negf %252 : vector<8x32xf32>
    %254 = math.exp %253 : vector<8x32xf32>
    %cst_54 = arith.constant 1.000000e+00 : f32
    %255 = vector.broadcast %cst_54 : f32 to vector<8x32xf32>
    %256 = arith.addf %255, %254 : vector<8x32xf32>
    %257 = arith.divf %255, %256 : vector<8x32xf32>
    %258 = vector.extract_strided_slice %249 {offsets = [0, 32], sizes = [8, 32], strides = [1, 1]} : vector<8x128xf32> to vector<8x32xf32>
    %259 = arith.negf %258 : vector<8x32xf32>
    %260 = math.exp %259 : vector<8x32xf32>
    %cst_55 = arith.constant 1.000000e+00 : f32
    %261 = vector.broadcast %cst_55 : f32 to vector<8x32xf32>
    %262 = arith.addf %261, %260 : vector<8x32xf32>
    %263 = arith.divf %261, %262 : vector<8x32xf32>
    %264 = vector.extract_strided_slice %249 {offsets = [0, 64], sizes = [8, 32], strides = [1, 1]} : vector<8x128xf32> to vector<8x32xf32>
    %265 = math.tanh %264 : vector<8x32xf32>
    %266 = vector.extract_strided_slice %249 {offsets = [0, 96], sizes = [8, 32], strides = [1, 1]} : vector<8x128xf32> to vector<8x32xf32>
    %267 = arith.negf %266 : vector<8x32xf32>
    %268 = math.exp %267 : vector<8x32xf32>
    %cst_56 = arith.constant 1.000000e+00 : f32
    %269 = vector.broadcast %cst_56 : f32 to vector<8x32xf32>
    %270 = arith.addf %269, %268 : vector<8x32xf32>
    %271 = arith.divf %269, %270 : vector<8x32xf32>
    %272 = arith.mulf %263, %216 : vector<8x32xf32>
    %273 = arith.mulf %257, %265 : vector<8x32xf32>
    %274 = arith.addf %272, %273 : vector<8x32xf32>
    %275 = math.tanh %274 : vector<8x32xf32>
    %276 = arith.mulf %271, %275 : vector<8x32xf32>
    %277 = vector.extract_strided_slice %251 {offsets = [0, 0], sizes = [8, 32], strides = [1, 1]} : vector<8x128xf32> to vector<8x32xf32>
    %278 = arith.negf %277 : vector<8x32xf32>
    %279 = math.exp %278 : vector<8x32xf32>
    %cst_57 = arith.constant 1.000000e+00 : f32
    %280 = vector.broadcast %cst_57 : f32 to vector<8x32xf32>
    %281 = arith.addf %280, %279 : vector<8x32xf32>
    %282 = arith.divf %280, %281 : vector<8x32xf32>
    %283 = vector.extract_strided_slice %251 {offsets = [0, 32], sizes = [8, 32], strides = [1, 1]} : vector<8x128xf32> to vector<8x32xf32>
    %284 = arith.negf %283 : vector<8x32xf32>
    %285 = math.exp %284 : vector<8x32xf32>
    %cst_58 = arith.constant 1.000000e+00 : f32
    %286 = vector.broadcast %cst_58 : f32 to vector<8x32xf32>
    %287 = arith.addf %286, %285 : vector<8x32xf32>
    %288 = arith.divf %286, %287 : vector<8x32xf32>
    %289 = vector.extract_strided_slice %251 {offsets = [0, 64], sizes = [8, 32], strides = [1, 1]} : vector<8x128xf32> to vector<8x32xf32>
    %290 = math.tanh %289 : vector<8x32xf32>
    %291 = vector.extract_strided_slice %251 {offsets = [0, 96], sizes = [8, 32], strides = [1, 1]} : vector<8x128xf32> to vector<8x32xf32>
    %292 = arith.negf %291 : vector<8x32xf32>
    %293 = math.exp %292 : vector<8x32xf32>
    %cst_59 = arith.constant 1.000000e+00 : f32
    %294 = vector.broadcast %cst_59 : f32 to vector<8x32xf32>
    %295 = arith.addf %294, %293 : vector<8x32xf32>
    %296 = arith.divf %294, %295 : vector<8x32xf32>
    %297 = arith.mulf %288, %241 : vector<8x32xf32>
    %298 = arith.mulf %282, %290 : vector<8x32xf32>
    %299 = arith.addf %297, %298 : vector<8x32xf32>
    %300 = math.tanh %299 : vector<8x32xf32>
    %301 = arith.mulf %296, %300 : vector<8x32xf32>
    %c40_60 = arith.constant 40 : index
    %c0_61 = arith.constant 0 : index
    %302 = vector.load %arg8[%c40_60, %c0_61] : memref<64x256xf32, #tpu.memory_space<vmem>>, vector<8x128xf32>
    %c16_62 = arith.constant 16 : index
    %c128_63 = arith.constant 128 : index
    %303 = vector.load %arg8[%c16_62, %c128_63] : memref<64x256xf32, #tpu.memory_space<vmem>>, vector<8x128xf32>
    %304 = tpu.concatenate %276, %301 in 1 : vector<8x32xf32>, vector<8x32xf32> -> vector<8x64xf32>
    %cst_64 = arith.constant dense<0.000000e+00> : vector<8x256xf32>
    %305 = tpu.matmul %304, %7, %cst_64 {dimension_numbers = #tpu.dot_dimension_numbers<[1], [0], [0], [1], [0, 0, 1, 1], [], []>} : vector<8x64xf32>, vector<64x256xf32>, vector<8x256xf32> -> vector<8x256xf32>
    %306 = vector.extract_strided_slice %305 {offsets = [0, 0], sizes = [8, 128], strides = [1, 1]} : vector<8x256xf32> to vector<8x128xf32>
    %307 = arith.addf %302, %306 : vector<8x128xf32>
    %308 = vector.extract_strided_slice %305 {offsets = [0, 128], sizes = [8, 128], strides = [1, 1]} : vector<8x256xf32> to vector<8x128xf32>
    %309 = arith.addf %303, %308 : vector<8x128xf32>
    %310 = vector.extract_strided_slice %307 {offsets = [0, 0], sizes = [8, 32], strides = [1, 1]} : vector<8x128xf32> to vector<8x32xf32>
    %311 = arith.negf %310 : vector<8x32xf32>
    %312 = math.exp %311 : vector<8x32xf32>
    %cst_65 = arith.constant 1.000000e+00 : f32
    %313 = vector.broadcast %cst_65 : f32 to vector<8x32xf32>
    %314 = arith.addf %313, %312 : vector<8x32xf32>
    %315 = arith.divf %313, %314 : vector<8x32xf32>
    %316 = vector.extract_strided_slice %307 {offsets = [0, 32], sizes = [8, 32], strides = [1, 1]} : vector<8x128xf32> to vector<8x32xf32>
    %317 = arith.negf %316 : vector<8x32xf32>
    %318 = math.exp %317 : vector<8x32xf32>
    %cst_66 = arith.constant 1.000000e+00 : f32
    %319 = vector.broadcast %cst_66 : f32 to vector<8x32xf32>
    %320 = arith.addf %319, %318 : vector<8x32xf32>
    %321 = arith.divf %319, %320 : vector<8x32xf32>
    %322 = vector.extract_strided_slice %307 {offsets = [0, 64], sizes = [8, 32], strides = [1, 1]} : vector<8x128xf32> to vector<8x32xf32>
    %323 = math.tanh %322 : vector<8x32xf32>
    %324 = vector.extract_strided_slice %307 {offsets = [0, 96], sizes = [8, 32], strides = [1, 1]} : vector<8x128xf32> to vector<8x32xf32>
    %325 = arith.negf %324 : vector<8x32xf32>
    %326 = math.exp %325 : vector<8x32xf32>
    %cst_67 = arith.constant 1.000000e+00 : f32
    %327 = vector.broadcast %cst_67 : f32 to vector<8x32xf32>
    %328 = arith.addf %327, %326 : vector<8x32xf32>
    %329 = arith.divf %327, %328 : vector<8x32xf32>
    %330 = arith.mulf %321, %274 : vector<8x32xf32>
    %331 = arith.mulf %315, %323 : vector<8x32xf32>
    %332 = arith.addf %330, %331 : vector<8x32xf32>
    %333 = math.tanh %332 : vector<8x32xf32>
    %334 = arith.mulf %329, %333 : vector<8x32xf32>
    %335 = vector.extract_strided_slice %309 {offsets = [0, 0], sizes = [8, 32], strides = [1, 1]} : vector<8x128xf32> to vector<8x32xf32>
    %336 = arith.negf %335 : vector<8x32xf32>
    %337 = math.exp %336 : vector<8x32xf32>
    %cst_68 = arith.constant 1.000000e+00 : f32
    %338 = vector.broadcast %cst_68 : f32 to vector<8x32xf32>
    %339 = arith.addf %338, %337 : vector<8x32xf32>
    %340 = arith.divf %338, %339 : vector<8x32xf32>
    %341 = vector.extract_strided_slice %309 {offsets = [0, 32], sizes = [8, 32], strides = [1, 1]} : vector<8x128xf32> to vector<8x32xf32>
    %342 = arith.negf %341 : vector<8x32xf32>
    %343 = math.exp %342 : vector<8x32xf32>
    %cst_69 = arith.constant 1.000000e+00 : f32
    %344 = vector.broadcast %cst_69 : f32 to vector<8x32xf32>
    %345 = arith.addf %344, %343 : vector<8x32xf32>
    %346 = arith.divf %344, %345 : vector<8x32xf32>
    %347 = vector.extract_strided_slice %309 {offsets = [0, 64], sizes = [8, 32], strides = [1, 1]} : vector<8x128xf32> to vector<8x32xf32>
    %348 = math.tanh %347 : vector<8x32xf32>
    %349 = vector.extract_strided_slice %309 {offsets = [0, 96], sizes = [8, 32], strides = [1, 1]} : vector<8x128xf32> to vector<8x32xf32>
    %350 = arith.negf %349 : vector<8x32xf32>
    %351 = math.exp %350 : vector<8x32xf32>
    %cst_70 = arith.constant 1.000000e+00 : f32
    %352 = vector.broadcast %cst_70 : f32 to vector<8x32xf32>
    %353 = arith.addf %352, %351 : vector<8x32xf32>
    %354 = arith.divf %352, %353 : vector<8x32xf32>
    %355 = arith.mulf %346, %299 : vector<8x32xf32>
    %356 = arith.mulf %340, %348 : vector<8x32xf32>
    %357 = arith.addf %355, %356 : vector<8x32xf32>
    %358 = math.tanh %357 : vector<8x32xf32>
    %359 = arith.mulf %354, %358 : vector<8x32xf32>
    %c48_71 = arith.constant 48 : index
    %c0_72 = arith.constant 0 : index
    %360 = vector.load %arg8[%c48_71, %c0_72] : memref<64x256xf32, #tpu.memory_space<vmem>>, vector<8x128xf32>
    %c8_73 = arith.constant 8 : index
    %c128_74 = arith.constant 128 : index
    %361 = vector.load %arg8[%c8_73, %c128_74] : memref<64x256xf32, #tpu.memory_space<vmem>>, vector<8x128xf32>
    %362 = tpu.concatenate %334, %359 in 1 : vector<8x32xf32>, vector<8x32xf32> -> vector<8x64xf32>
    %cst_75 = arith.constant dense<0.000000e+00> : vector<8x256xf32>
    %363 = tpu.matmul %362, %7, %cst_75 {dimension_numbers = #tpu.dot_dimension_numbers<[1], [0], [0], [1], [0, 0, 1, 1], [], []>} : vector<8x64xf32>, vector<64x256xf32>, vector<8x256xf32> -> vector<8x256xf32>
    %364 = vector.extract_strided_slice %363 {offsets = [0, 0], sizes = [8, 128], strides = [1, 1]} : vector<8x256xf32> to vector<8x128xf32>
    %365 = arith.addf %360, %364 : vector<8x128xf32>
    %366 = vector.extract_strided_slice %363 {offsets = [0, 128], sizes = [8, 128], strides = [1, 1]} : vector<8x256xf32> to vector<8x128xf32>
    %367 = arith.addf %361, %366 : vector<8x128xf32>
    %368 = vector.extract_strided_slice %365 {offsets = [0, 0], sizes = [8, 32], strides = [1, 1]} : vector<8x128xf32> to vector<8x32xf32>
    %369 = arith.negf %368 : vector<8x32xf32>
    %370 = math.exp %369 : vector<8x32xf32>
    %cst_76 = arith.constant 1.000000e+00 : f32
    %371 = vector.broadcast %cst_76 : f32 to vector<8x32xf32>
    %372 = arith.addf %371, %370 : vector<8x32xf32>
    %373 = arith.divf %371, %372 : vector<8x32xf32>
    %374 = vector.extract_strided_slice %365 {offsets = [0, 32], sizes = [8, 32], strides = [1, 1]} : vector<8x128xf32> to vector<8x32xf32>
    %375 = arith.negf %374 : vector<8x32xf32>
    %376 = math.exp %375 : vector<8x32xf32>
    %cst_77 = arith.constant 1.000000e+00 : f32
    %377 = vector.broadcast %cst_77 : f32 to vector<8x32xf32>
    %378 = arith.addf %377, %376 : vector<8x32xf32>
    %379 = arith.divf %377, %378 : vector<8x32xf32>
    %380 = vector.extract_strided_slice %365 {offsets = [0, 64], sizes = [8, 32], strides = [1, 1]} : vector<8x128xf32> to vector<8x32xf32>
    %381 = math.tanh %380 : vector<8x32xf32>
    %382 = vector.extract_strided_slice %365 {offsets = [0, 96], sizes = [8, 32], strides = [1, 1]} : vector<8x128xf32> to vector<8x32xf32>
    %383 = arith.negf %382 : vector<8x32xf32>
    %384 = math.exp %383 : vector<8x32xf32>
    %cst_78 = arith.constant 1.000000e+00 : f32
    %385 = vector.broadcast %cst_78 : f32 to vector<8x32xf32>
    %386 = arith.addf %385, %384 : vector<8x32xf32>
    %387 = arith.divf %385, %386 : vector<8x32xf32>
    %388 = arith.mulf %379, %332 : vector<8x32xf32>
    %389 = arith.mulf %373, %381 : vector<8x32xf32>
    %390 = arith.addf %388, %389 : vector<8x32xf32>
    %391 = math.tanh %390 : vector<8x32xf32>
    %392 = arith.mulf %387, %391 : vector<8x32xf32>
    %393 = vector.extract_strided_slice %367 {offsets = [0, 0], sizes = [8, 32], strides = [1, 1]} : vector<8x128xf32> to vector<8x32xf32>
    %394 = arith.negf %393 : vector<8x32xf32>
    %395 = math.exp %394 : vector<8x32xf32>
    %cst_79 = arith.constant 1.000000e+00 : f32
    %396 = vector.broadcast %cst_79 : f32 to vector<8x32xf32>
    %397 = arith.addf %396, %395 : vector<8x32xf32>
    %398 = arith.divf %396, %397 : vector<8x32xf32>
    %399 = vector.extract_strided_slice %367 {offsets = [0, 32], sizes = [8, 32], strides = [1, 1]} : vector<8x128xf32> to vector<8x32xf32>
    %400 = arith.negf %399 : vector<8x32xf32>
    %401 = math.exp %400 : vector<8x32xf32>
    %cst_80 = arith.constant 1.000000e+00 : f32
    %402 = vector.broadcast %cst_80 : f32 to vector<8x32xf32>
    %403 = arith.addf %402, %401 : vector<8x32xf32>
    %404 = arith.divf %402, %403 : vector<8x32xf32>
    %405 = vector.extract_strided_slice %367 {offsets = [0, 64], sizes = [8, 32], strides = [1, 1]} : vector<8x128xf32> to vector<8x32xf32>
    %406 = math.tanh %405 : vector<8x32xf32>
    %407 = vector.extract_strided_slice %367 {offsets = [0, 96], sizes = [8, 32], strides = [1, 1]} : vector<8x128xf32> to vector<8x32xf32>
    %408 = arith.negf %407 : vector<8x32xf32>
    %409 = math.exp %408 : vector<8x32xf32>
    %cst_81 = arith.constant 1.000000e+00 : f32
    %410 = vector.broadcast %cst_81 : f32 to vector<8x32xf32>
    %411 = arith.addf %410, %409 : vector<8x32xf32>
    %412 = arith.divf %410, %411 : vector<8x32xf32>
    %413 = arith.mulf %404, %357 : vector<8x32xf32>
    %414 = arith.mulf %398, %406 : vector<8x32xf32>
    %415 = arith.addf %413, %414 : vector<8x32xf32>
    %416 = math.tanh %415 : vector<8x32xf32>
    %417 = arith.mulf %412, %416 : vector<8x32xf32>
    %c56_82 = arith.constant 56 : index
    %c0_83 = arith.constant 0 : index
    %418 = vector.load %arg8[%c56_82, %c0_83] : memref<64x256xf32, #tpu.memory_space<vmem>>, vector<8x128xf32>
    %c0_84 = arith.constant 0 : index
    %c128_85 = arith.constant 128 : index
    %419 = vector.load %arg8[%c0_84, %c128_85] : memref<64x256xf32, #tpu.memory_space<vmem>>, vector<8x128xf32>
    %420 = tpu.concatenate %392, %417 in 1 : vector<8x32xf32>, vector<8x32xf32> -> vector<8x64xf32>
    %cst_86 = arith.constant dense<0.000000e+00> : vector<8x256xf32>
    %421 = tpu.matmul %420, %7, %cst_86 {dimension_numbers = #tpu.dot_dimension_numbers<[1], [0], [0], [1], [0, 0, 1, 1], [], []>} : vector<8x64xf32>, vector<64x256xf32>, vector<8x256xf32> -> vector<8x256xf32>
    %422 = vector.extract_strided_slice %421 {offsets = [0, 0], sizes = [8, 128], strides = [1, 1]} : vector<8x256xf32> to vector<8x128xf32>
    %423 = arith.addf %418, %422 : vector<8x128xf32>
    %424 = vector.extract_strided_slice %421 {offsets = [0, 128], sizes = [8, 128], strides = [1, 1]} : vector<8x256xf32> to vector<8x128xf32>
    %425 = arith.addf %419, %424 : vector<8x128xf32>
    %426 = vector.extract_strided_slice %423 {offsets = [0, 0], sizes = [8, 32], strides = [1, 1]} : vector<8x128xf32> to vector<8x32xf32>
    %427 = arith.negf %426 : vector<8x32xf32>
    %428 = math.exp %427 : vector<8x32xf32>
    %cst_87 = arith.constant 1.000000e+00 : f32
    %429 = vector.broadcast %cst_87 : f32 to vector<8x32xf32>
    %430 = arith.addf %429, %428 : vector<8x32xf32>
    %431 = arith.divf %429, %430 : vector<8x32xf32>
    %432 = vector.extract_strided_slice %423 {offsets = [0, 32], sizes = [8, 32], strides = [1, 1]} : vector<8x128xf32> to vector<8x32xf32>
    %433 = arith.negf %432 : vector<8x32xf32>
    %434 = math.exp %433 : vector<8x32xf32>
    %cst_88 = arith.constant 1.000000e+00 : f32
    %435 = vector.broadcast %cst_88 : f32 to vector<8x32xf32>
    %436 = arith.addf %435, %434 : vector<8x32xf32>
    %437 = arith.divf %435, %436 : vector<8x32xf32>
    %438 = vector.extract_strided_slice %423 {offsets = [0, 64], sizes = [8, 32], strides = [1, 1]} : vector<8x128xf32> to vector<8x32xf32>
    %439 = math.tanh %438 : vector<8x32xf32>
    %440 = vector.extract_strided_slice %423 {offsets = [0, 96], sizes = [8, 32], strides = [1, 1]} : vector<8x128xf32> to vector<8x32xf32>
    %441 = arith.negf %440 : vector<8x32xf32>
    %442 = math.exp %441 : vector<8x32xf32>
    %cst_89 = arith.constant 1.000000e+00 : f32
    %443 = vector.broadcast %cst_89 : f32 to vector<8x32xf32>
    %444 = arith.addf %443, %442 : vector<8x32xf32>
    %445 = arith.divf %443, %444 : vector<8x32xf32>
    %446 = arith.mulf %437, %390 : vector<8x32xf32>
    %447 = arith.mulf %431, %439 : vector<8x32xf32>
    %448 = arith.addf %446, %447 : vector<8x32xf32>
    %449 = math.tanh %448 : vector<8x32xf32>
    %450 = arith.mulf %445, %449 : vector<8x32xf32>
    %451 = vector.extract_strided_slice %425 {offsets = [0, 0], sizes = [8, 32], strides = [1, 1]} : vector<8x128xf32> to vector<8x32xf32>
    %452 = arith.negf %451 : vector<8x32xf32>
    %453 = math.exp %452 : vector<8x32xf32>
    %cst_90 = arith.constant 1.000000e+00 : f32
    %454 = vector.broadcast %cst_90 : f32 to vector<8x32xf32>
    %455 = arith.addf %454, %453 : vector<8x32xf32>
    %456 = arith.divf %454, %455 : vector<8x32xf32>
    %457 = vector.extract_strided_slice %425 {offsets = [0, 32], sizes = [8, 32], strides = [1, 1]} : vector<8x128xf32> to vector<8x32xf32>
    %458 = arith.negf %457 : vector<8x32xf32>
    %459 = math.exp %458 : vector<8x32xf32>
    %cst_91 = arith.constant 1.000000e+00 : f32
    %460 = vector.broadcast %cst_91 : f32 to vector<8x32xf32>
    %461 = arith.addf %460, %459 : vector<8x32xf32>
    %462 = arith.divf %460, %461 : vector<8x32xf32>
    %463 = vector.extract_strided_slice %425 {offsets = [0, 64], sizes = [8, 32], strides = [1, 1]} : vector<8x128xf32> to vector<8x32xf32>
    %464 = math.tanh %463 : vector<8x32xf32>
    %465 = vector.extract_strided_slice %425 {offsets = [0, 96], sizes = [8, 32], strides = [1, 1]} : vector<8x128xf32> to vector<8x32xf32>
    %466 = arith.negf %465 : vector<8x32xf32>
    %467 = math.exp %466 : vector<8x32xf32>
    %cst_92 = arith.constant 1.000000e+00 : f32
    %468 = vector.broadcast %cst_92 : f32 to vector<8x32xf32>
    %469 = arith.addf %468, %467 : vector<8x32xf32>
    %470 = arith.divf %468, %469 : vector<8x32xf32>
    %471 = arith.mulf %462, %415 : vector<8x32xf32>
    %472 = arith.mulf %456, %464 : vector<8x32xf32>
    %473 = arith.addf %471, %472 : vector<8x32xf32>
    %474 = math.tanh %473 : vector<8x32xf32>
    %475 = arith.mulf %470, %474 : vector<8x32xf32>
    %476 = tpu.concatenate %44, %475 in 1 : vector<8x32xf32>, vector<8x32xf32> -> vector<8x64xf32>
    %477 = tpu.concatenate %102, %417 in 1 : vector<8x32xf32>, vector<8x32xf32> -> vector<8x64xf32>
    %478 = tpu.concatenate %160, %359 in 1 : vector<8x32xf32>, vector<8x32xf32> -> vector<8x64xf32>
    %479 = tpu.concatenate %218, %301 in 1 : vector<8x32xf32>, vector<8x32xf32> -> vector<8x64xf32>
    %480 = tpu.concatenate %276, %243 in 1 : vector<8x32xf32>, vector<8x32xf32> -> vector<8x64xf32>
    %481 = tpu.concatenate %334, %185 in 1 : vector<8x32xf32>, vector<8x32xf32> -> vector<8x64xf32>
    %482 = tpu.concatenate %392, %127 in 1 : vector<8x32xf32>, vector<8x32xf32> -> vector<8x64xf32>
    %483 = tpu.concatenate %450, %69 in 1 : vector<8x32xf32>, vector<8x32xf32> -> vector<8x64xf32>
    %484 = tpu.concatenate %476, %477, %478, %479, %480, %481, %482, %483 in 0 : vector<8x64xf32>, vector<8x64xf32>, vector<8x64xf32>, vector<8x64xf32>, vector<8x64xf32>, vector<8x64xf32>, vector<8x64xf32>, vector<8x64xf32> -> vector<64x64xf32>
    %c0_93 = arith.constant 0 : index
    %c0_94 = arith.constant 0 : index
    %485 = vector.load %arg4[%c0_93, %c0_94] : memref<64x256xf32, #tpu.memory_space<vmem>>, vector<64x256xf32>
    %c0_95 = arith.constant 0 : index
    %c0_96 = arith.constant 0 : index
    %486 = vector.load %arg6[%c0_95, %c0_96] : memref<1x256xf32, #tpu.memory_space<vmem>>, vector<1x256xf32>
    %cst_97 = arith.constant dense<0.000000e+00> : vector<64x256xf32>
    %487 = tpu.matmul %484, %485, %cst_97 {dimension_numbers = #tpu.dot_dimension_numbers<[1], [0], [0], [1], [0, 0, 1, 1], [], []>} : vector<64x64xf32>, vector<64x256xf32>, vector<64x256xf32> -> vector<64x256xf32>
    %488 = vector.broadcast %486 : vector<1x256xf32> to vector<64x256xf32>
    %489 = arith.addf %487, %488 : vector<64x256xf32>
    %c0_98 = arith.constant 0 : index
    %c0_99 = arith.constant 0 : index
    %490 = vector.load %arg8[%c0_98, %c0_99] : memref<64x256xf32, #tpu.memory_space<vmem>>, vector<64x256xf32>
    tpu.vector_store %arg8[%c0_98, %c0_99], %489 {strides = array<i32>} : memref<64x256xf32, #tpu.memory_space<vmem>>, vector<64x256xf32>,
    %c0_100 = arith.constant 0 : index
    %c0_101 = arith.constant 0 : index
    %491 = vector.load %arg5[%c0_100, %c0_101] : memref<64x256xf32, #tpu.memory_space<vmem>>, vector<64x256xf32>
    %cst_102 = arith.constant 0.000000e+00 : f32
    %492 = vector.broadcast %cst_102 : f32 to vector<8x32xf32>
    %cst_103 = arith.constant 0.000000e+00 : f32
    %493 = vector.broadcast %cst_103 : f32 to vector<8x32xf32>
    %cst_104 = arith.constant 0.000000e+00 : f32
    %494 = vector.broadcast %cst_104 : f32 to vector<8x32xf32>
    %cst_105 = arith.constant 0.000000e+00 : f32
    %495 = vector.broadcast %cst_105 : f32 to vector<8x32xf32>
    %c0_106 = arith.constant 0 : index
    %c0_107 = arith.constant 0 : index
    %496 = vector.load %arg8[%c0_106, %c0_107] : memref<64x256xf32, #tpu.memory_space<vmem>>, vector<8x128xf32>
    %c56_108 = arith.constant 56 : index
    %c128_109 = arith.constant 128 : index
    %497 = vector.load %arg8[%c56_108, %c128_109] : memref<64x256xf32, #tpu.memory_space<vmem>>, vector<8x128xf32>
    %498 = tpu.concatenate %492, %493 in 1 : vector<8x32xf32>, vector<8x32xf32> -> vector<8x64xf32>
    %cst_110 = arith.constant dense<0.000000e+00> : vector<8x256xf32>
    %499 = tpu.matmul %498, %491, %cst_110 {dimension_numbers = #tpu.dot_dimension_numbers<[1], [0], [0], [1], [0, 0, 1, 1], [], []>} : vector<8x64xf32>, vector<64x256xf32>, vector<8x256xf32> -> vector<8x256xf32>
    %500 = vector.extract_strided_slice %499 {offsets = [0, 0], sizes = [8, 128], strides = [1, 1]} : vector<8x256xf32> to vector<8x128xf32>
    %501 = arith.addf %496, %500 : vector<8x128xf32>
    %502 = vector.extract_strided_slice %499 {offsets = [0, 128], sizes = [8, 128], strides = [1, 1]} : vector<8x256xf32> to vector<8x128xf32>
    %503 = arith.addf %497, %502 : vector<8x128xf32>
    %504 = vector.extract_strided_slice %501 {offsets = [0, 0], sizes = [8, 32], strides = [1, 1]} : vector<8x128xf32> to vector<8x32xf32>
    %505 = arith.negf %504 : vector<8x32xf32>
    %506 = math.exp %505 : vector<8x32xf32>
    %cst_111 = arith.constant 1.000000e+00 : f32
    %507 = vector.broadcast %cst_111 : f32 to vector<8x32xf32>
    %508 = arith.addf %507, %506 : vector<8x32xf32>
    %509 = arith.divf %507, %508 : vector<8x32xf32>
    %510 = vector.extract_strided_slice %501 {offsets = [0, 32], sizes = [8, 32], strides = [1, 1]} : vector<8x128xf32> to vector<8x32xf32>
    %511 = arith.negf %510 : vector<8x32xf32>
    %512 = math.exp %511 : vector<8x32xf32>
    %cst_112 = arith.constant 1.000000e+00 : f32
    %513 = vector.broadcast %cst_112 : f32 to vector<8x32xf32>
    %514 = arith.addf %513, %512 : vector<8x32xf32>
    %515 = arith.divf %513, %514 : vector<8x32xf32>
    %516 = vector.extract_strided_slice %501 {offsets = [0, 64], sizes = [8, 32], strides = [1, 1]} : vector<8x128xf32> to vector<8x32xf32>
    %517 = math.tanh %516 : vector<8x32xf32>
    %518 = vector.extract_strided_slice %501 {offsets = [0, 96], sizes = [8, 32], strides = [1, 1]} : vector<8x128xf32> to vector<8x32xf32>
    %519 = arith.negf %518 : vector<8x32xf32>
    %520 = math.exp %519 : vector<8x32xf32>
    %cst_113 = arith.constant 1.000000e+00 : f32
    %521 = vector.broadcast %cst_113 : f32 to vector<8x32xf32>
    %522 = arith.addf %521, %520 : vector<8x32xf32>
    %523 = arith.divf %521, %522 : vector<8x32xf32>
    %524 = arith.mulf %515, %494 : vector<8x32xf32>
    %525 = arith.mulf %509, %517 : vector<8x32xf32>
    %526 = arith.addf %524, %525 : vector<8x32xf32>
    %527 = math.tanh %526 : vector<8x32xf32>
    %528 = arith.mulf %523, %527 : vector<8x32xf32>
    %529 = vector.extract_strided_slice %503 {offsets = [0, 0], sizes = [8, 32], strides = [1, 1]} : vector<8x128xf32> to vector<8x32xf32>
    %530 = arith.negf %529 : vector<8x32xf32>
    %531 = math.exp %530 : vector<8x32xf32>
    %cst_114 = arith.constant 1.000000e+00 : f32
    %532 = vector.broadcast %cst_114 : f32 to vector<8x32xf32>
    %533 = arith.addf %532, %531 : vector<8x32xf32>
    %534 = arith.divf %532, %533 : vector<8x32xf32>
    %535 = vector.extract_strided_slice %503 {offsets = [0, 32], sizes = [8, 32], strides = [1, 1]} : vector<8x128xf32> to vector<8x32xf32>
    %536 = arith.negf %535 : vector<8x32xf32>
    %537 = math.exp %536 : vector<8x32xf32>
    %cst_115 = arith.constant 1.000000e+00 : f32
    %538 = vector.broadcast %cst_115 : f32 to vector<8x32xf32>
    %539 = arith.addf %538, %537 : vector<8x32xf32>
    %540 = arith.divf %538, %539 : vector<8x32xf32>
    %541 = vector.extract_strided_slice %503 {offsets = [0, 64], sizes = [8, 32], strides = [1, 1]} : vector<8x128xf32> to vector<8x32xf32>
    %542 = math.tanh %541 : vector<8x32xf32>
    %543 = vector.extract_strided_slice %503 {offsets = [0, 96], sizes = [8, 32], strides = [1, 1]} : vector<8x128xf32> to vector<8x32xf32>
    %544 = arith.negf %543 : vector<8x32xf32>
    %545 = math.exp %544 : vector<8x32xf32>
    %cst_116 = arith.constant 1.000000e+00 : f32
    %546 = vector.broadcast %cst_116 : f32 to vector<8x32xf32>
    %547 = arith.addf %546, %545 : vector<8x32xf32>
    %548 = arith.divf %546, %547 : vector<8x32xf32>
    %549 = arith.mulf %540, %495 : vector<8x32xf32>
    %550 = arith.mulf %534, %542 : vector<8x32xf32>
    %551 = arith.addf %549, %550 : vector<8x32xf32>
    %552 = math.tanh %551 : vector<8x32xf32>
    %553 = arith.mulf %548, %552 : vector<8x32xf32>
    %c8_117 = arith.constant 8 : index
    %c0_118 = arith.constant 0 : index
    %554 = vector.load %arg8[%c8_117, %c0_118] : memref<64x256xf32, #tpu.memory_space<vmem>>, vector<8x128xf32>
    %c48_119 = arith.constant 48 : index
    %c128_120 = arith.constant 128 : index
    %555 = vector.load %arg8[%c48_119, %c128_120] : memref<64x256xf32, #tpu.memory_space<vmem>>, vector<8x128xf32>
    %556 = tpu.concatenate %528, %553 in 1 : vector<8x32xf32>, vector<8x32xf32> -> vector<8x64xf32>
    %cst_121 = arith.constant dense<0.000000e+00> : vector<8x256xf32>
    %557 = tpu.matmul %556, %491, %cst_121 {dimension_numbers = #tpu.dot_dimension_numbers<[1], [0], [0], [1], [0, 0, 1, 1], [], []>} : vector<8x64xf32>, vector<64x256xf32>, vector<8x256xf32> -> vector<8x256xf32>
    %558 = vector.extract_strided_slice %557 {offsets = [0, 0], sizes = [8, 128], strides = [1, 1]} : vector<8x256xf32> to vector<8x128xf32>
    %559 = arith.addf %554, %558 : vector<8x128xf32>
    %560 = vector.extract_strided_slice %557 {offsets = [0, 128], sizes = [8, 128], strides = [1, 1]} : vector<8x256xf32> to vector<8x128xf32>
    %561 = arith.addf %555, %560 : vector<8x128xf32>
    %562 = vector.extract_strided_slice %559 {offsets = [0, 0], sizes = [8, 32], strides = [1, 1]} : vector<8x128xf32> to vector<8x32xf32>
    %563 = arith.negf %562 : vector<8x32xf32>
    %564 = math.exp %563 : vector<8x32xf32>
    %cst_122 = arith.constant 1.000000e+00 : f32
    %565 = vector.broadcast %cst_122 : f32 to vector<8x32xf32>
    %566 = arith.addf %565, %564 : vector<8x32xf32>
    %567 = arith.divf %565, %566 : vector<8x32xf32>
    %568 = vector.extract_strided_slice %559 {offsets = [0, 32], sizes = [8, 32], strides = [1, 1]} : vector<8x128xf32> to vector<8x32xf32>
    %569 = arith.negf %568 : vector<8x32xf32>
    %570 = math.exp %569 : vector<8x32xf32>
    %cst_123 = arith.constant 1.000000e+00 : f32
    %571 = vector.broadcast %cst_123 : f32 to vector<8x32xf32>
    %572 = arith.addf %571, %570 : vector<8x32xf32>
    %573 = arith.divf %571, %572 : vector<8x32xf32>
    %574 = vector.extract_strided_slice %559 {offsets = [0, 64], sizes = [8, 32], strides = [1, 1]} : vector<8x128xf32> to vector<8x32xf32>
    %575 = math.tanh %574 : vector<8x32xf32>
    %576 = vector.extract_strided_slice %559 {offsets = [0, 96], sizes = [8, 32], strides = [1, 1]} : vector<8x128xf32> to vector<8x32xf32>
    %577 = arith.negf %576 : vector<8x32xf32>
    %578 = math.exp %577 : vector<8x32xf32>
    %cst_124 = arith.constant 1.000000e+00 : f32
    %579 = vector.broadcast %cst_124 : f32 to vector<8x32xf32>
    %580 = arith.addf %579, %578 : vector<8x32xf32>
    %581 = arith.divf %579, %580 : vector<8x32xf32>
    %582 = arith.mulf %573, %526 : vector<8x32xf32>
    %583 = arith.mulf %567, %575 : vector<8x32xf32>
    %584 = arith.addf %582, %583 : vector<8x32xf32>
    %585 = math.tanh %584 : vector<8x32xf32>
    %586 = arith.mulf %581, %585 : vector<8x32xf32>
    %587 = vector.extract_strided_slice %561 {offsets = [0, 0], sizes = [8, 32], strides = [1, 1]} : vector<8x128xf32> to vector<8x32xf32>
    %588 = arith.negf %587 : vector<8x32xf32>
    %589 = math.exp %588 : vector<8x32xf32>
    %cst_125 = arith.constant 1.000000e+00 : f32
    %590 = vector.broadcast %cst_125 : f32 to vector<8x32xf32>
    %591 = arith.addf %590, %589 : vector<8x32xf32>
    %592 = arith.divf %590, %591 : vector<8x32xf32>
    %593 = vector.extract_strided_slice %561 {offsets = [0, 32], sizes = [8, 32], strides = [1, 1]} : vector<8x128xf32> to vector<8x32xf32>
    %594 = arith.negf %593 : vector<8x32xf32>
    %595 = math.exp %594 : vector<8x32xf32>
    %cst_126 = arith.constant 1.000000e+00 : f32
    %596 = vector.broadcast %cst_126 : f32 to vector<8x32xf32>
    %597 = arith.addf %596, %595 : vector<8x32xf32>
    %598 = arith.divf %596, %597 : vector<8x32xf32>
    %599 = vector.extract_strided_slice %561 {offsets = [0, 64], sizes = [8, 32], strides = [1, 1]} : vector<8x128xf32> to vector<8x32xf32>
    %600 = math.tanh %599 : vector<8x32xf32>
    %601 = vector.extract_strided_slice %561 {offsets = [0, 96], sizes = [8, 32], strides = [1, 1]} : vector<8x128xf32> to vector<8x32xf32>
    %602 = arith.negf %601 : vector<8x32xf32>
    %603 = math.exp %602 : vector<8x32xf32>
    %cst_127 = arith.constant 1.000000e+00 : f32
    %604 = vector.broadcast %cst_127 : f32 to vector<8x32xf32>
    %605 = arith.addf %604, %603 : vector<8x32xf32>
    %606 = arith.divf %604, %605 : vector<8x32xf32>
    %607 = arith.mulf %598, %551 : vector<8x32xf32>
    %608 = arith.mulf %592, %600 : vector<8x32xf32>
    %609 = arith.addf %607, %608 : vector<8x32xf32>
    %610 = math.tanh %609 : vector<8x32xf32>
    %611 = arith.mulf %606, %610 : vector<8x32xf32>
    %c16_128 = arith.constant 16 : index
    %c0_129 = arith.constant 0 : index
    %612 = vector.load %arg8[%c16_128, %c0_129] : memref<64x256xf32, #tpu.memory_space<vmem>>, vector<8x128xf32>
    %c40_130 = arith.constant 40 : index
    %c128_131 = arith.constant 128 : index
    %613 = vector.load %arg8[%c40_130, %c128_131] : memref<64x256xf32, #tpu.memory_space<vmem>>, vector<8x128xf32>
    %614 = tpu.concatenate %586, %611 in 1 : vector<8x32xf32>, vector<8x32xf32> -> vector<8x64xf32>
    %cst_132 = arith.constant dense<0.000000e+00> : vector<8x256xf32>
    %615 = tpu.matmul %614, %491, %cst_132 {dimension_numbers = #tpu.dot_dimension_numbers<[1], [0], [0], [1], [0, 0, 1, 1], [], []>} : vector<8x64xf32>, vector<64x256xf32>, vector<8x256xf32> -> vector<8x256xf32>
    %616 = vector.extract_strided_slice %615 {offsets = [0, 0], sizes = [8, 128], strides = [1, 1]} : vector<8x256xf32> to vector<8x128xf32>
    %617 = arith.addf %612, %616 : vector<8x128xf32>
    %618 = vector.extract_strided_slice %615 {offsets = [0, 128], sizes = [8, 128], strides = [1, 1]} : vector<8x256xf32> to vector<8x128xf32>
    %619 = arith.addf %613, %618 : vector<8x128xf32>
    %620 = vector.extract_strided_slice %617 {offsets = [0, 0], sizes = [8, 32], strides = [1, 1]} : vector<8x128xf32> to vector<8x32xf32>
    %621 = arith.negf %620 : vector<8x32xf32>
    %622 = math.exp %621 : vector<8x32xf32>
    %cst_133 = arith.constant 1.000000e+00 : f32
    %623 = vector.broadcast %cst_133 : f32 to vector<8x32xf32>
    %624 = arith.addf %623, %622 : vector<8x32xf32>
    %625 = arith.divf %623, %624 : vector<8x32xf32>
    %626 = vector.extract_strided_slice %617 {offsets = [0, 32], sizes = [8, 32], strides = [1, 1]} : vector<8x128xf32> to vector<8x32xf32>
    %627 = arith.negf %626 : vector<8x32xf32>
    %628 = math.exp %627 : vector<8x32xf32>
    %cst_134 = arith.constant 1.000000e+00 : f32
    %629 = vector.broadcast %cst_134 : f32 to vector<8x32xf32>
    %630 = arith.addf %629, %628 : vector<8x32xf32>
    %631 = arith.divf %629, %630 : vector<8x32xf32>
    %632 = vector.extract_strided_slice %617 {offsets = [0, 64], sizes = [8, 32], strides = [1, 1]} : vector<8x128xf32> to vector<8x32xf32>
    %633 = math.tanh %632 : vector<8x32xf32>
    %634 = vector.extract_strided_slice %617 {offsets = [0, 96], sizes = [8, 32], strides = [1, 1]} : vector<8x128xf32> to vector<8x32xf32>
    %635 = arith.negf %634 : vector<8x32xf32>
    %636 = math.exp %635 : vector<8x32xf32>
    %cst_135 = arith.constant 1.000000e+00 : f32
    %637 = vector.broadcast %cst_135 : f32 to vector<8x32xf32>
    %638 = arith.addf %637, %636 : vector<8x32xf32>
    %639 = arith.divf %637, %638 : vector<8x32xf32>
    %640 = arith.mulf %631, %584 : vector<8x32xf32>
    %641 = arith.mulf %625, %633 : vector<8x32xf32>
    %642 = arith.addf %640, %641 : vector<8x32xf32>
    %643 = math.tanh %642 : vector<8x32xf32>
    %644 = arith.mulf %639, %643 : vector<8x32xf32>
    %645 = vector.extract_strided_slice %619 {offsets = [0, 0], sizes = [8, 32], strides = [1, 1]} : vector<8x128xf32> to vector<8x32xf32>
    %646 = arith.negf %645 : vector<8x32xf32>
    %647 = math.exp %646 : vector<8x32xf32>
    %cst_136 = arith.constant 1.000000e+00 : f32
    %648 = vector.broadcast %cst_136 : f32 to vector<8x32xf32>
    %649 = arith.addf %648, %647 : vector<8x32xf32>
    %650 = arith.divf %648, %649 : vector<8x32xf32>
    %651 = vector.extract_strided_slice %619 {offsets = [0, 32], sizes = [8, 32], strides = [1, 1]} : vector<8x128xf32> to vector<8x32xf32>
    %652 = arith.negf %651 : vector<8x32xf32>
    %653 = math.exp %652 : vector<8x32xf32>
    %cst_137 = arith.constant 1.000000e+00 : f32
    %654 = vector.broadcast %cst_137 : f32 to vector<8x32xf32>
    %655 = arith.addf %654, %653 : vector<8x32xf32>
    %656 = arith.divf %654, %655 : vector<8x32xf32>
    %657 = vector.extract_strided_slice %619 {offsets = [0, 64], sizes = [8, 32], strides = [1, 1]} : vector<8x128xf32> to vector<8x32xf32>
    %658 = math.tanh %657 : vector<8x32xf32>
    %659 = vector.extract_strided_slice %619 {offsets = [0, 96], sizes = [8, 32], strides = [1, 1]} : vector<8x128xf32> to vector<8x32xf32>
    %660 = arith.negf %659 : vector<8x32xf32>
    %661 = math.exp %660 : vector<8x32xf32>
    %cst_138 = arith.constant 1.000000e+00 : f32
    %662 = vector.broadcast %cst_138 : f32 to vector<8x32xf32>
    %663 = arith.addf %662, %661 : vector<8x32xf32>
    %664 = arith.divf %662, %663 : vector<8x32xf32>
    %665 = arith.mulf %656, %609 : vector<8x32xf32>
    %666 = arith.mulf %650, %658 : vector<8x32xf32>
    %667 = arith.addf %665, %666 : vector<8x32xf32>
    %668 = math.tanh %667 : vector<8x32xf32>
    %669 = arith.mulf %664, %668 : vector<8x32xf32>
    %c24_139 = arith.constant 24 : index
    %c0_140 = arith.constant 0 : index
    %670 = vector.load %arg8[%c24_139, %c0_140] : memref<64x256xf32, #tpu.memory_space<vmem>>, vector<8x128xf32>
    %c32_141 = arith.constant 32 : index
    %c128_142 = arith.constant 128 : index
    %671 = vector.load %arg8[%c32_141, %c128_142] : memref<64x256xf32, #tpu.memory_space<vmem>>, vector<8x128xf32>
    %672 = tpu.concatenate %644, %669 in 1 : vector<8x32xf32>, vector<8x32xf32> -> vector<8x64xf32>
    %cst_143 = arith.constant dense<0.000000e+00> : vector<8x256xf32>
    %673 = tpu.matmul %672, %491, %cst_143 {dimension_numbers = #tpu.dot_dimension_numbers<[1], [0], [0], [1], [0, 0, 1, 1], [], []>} : vector<8x64xf32>, vector<64x256xf32>, vector<8x256xf32> -> vector<8x256xf32>
    %674 = vector.extract_strided_slice %673 {offsets = [0, 0], sizes = [8, 128], strides = [1, 1]} : vector<8x256xf32> to vector<8x128xf32>
    %675 = arith.addf %670, %674 : vector<8x128xf32>
    %676 = vector.extract_strided_slice %673 {offsets = [0, 128], sizes = [8, 128], strides = [1, 1]} : vector<8x256xf32> to vector<8x128xf32>
    %677 = arith.addf %671, %676 : vector<8x128xf32>
    %678 = vector.extract_strided_slice %675 {offsets = [0, 0], sizes = [8, 32], strides = [1, 1]} : vector<8x128xf32> to vector<8x32xf32>
    %679 = arith.negf %678 : vector<8x32xf32>
    %680 = math.exp %679 : vector<8x32xf32>
    %cst_144 = arith.constant 1.000000e+00 : f32
    %681 = vector.broadcast %cst_144 : f32 to vector<8x32xf32>
    %682 = arith.addf %681, %680 : vector<8x32xf32>
    %683 = arith.divf %681, %682 : vector<8x32xf32>
    %684 = vector.extract_strided_slice %675 {offsets = [0, 32], sizes = [8, 32], strides = [1, 1]} : vector<8x128xf32> to vector<8x32xf32>
    %685 = arith.negf %684 : vector<8x32xf32>
    %686 = math.exp %685 : vector<8x32xf32>
    %cst_145 = arith.constant 1.000000e+00 : f32
    %687 = vector.broadcast %cst_145 : f32 to vector<8x32xf32>
    %688 = arith.addf %687, %686 : vector<8x32xf32>
    %689 = arith.divf %687, %688 : vector<8x32xf32>
    %690 = vector.extract_strided_slice %675 {offsets = [0, 64], sizes = [8, 32], strides = [1, 1]} : vector<8x128xf32> to vector<8x32xf32>
    %691 = math.tanh %690 : vector<8x32xf32>
    %692 = vector.extract_strided_slice %675 {offsets = [0, 96], sizes = [8, 32], strides = [1, 1]} : vector<8x128xf32> to vector<8x32xf32>
    %693 = arith.negf %692 : vector<8x32xf32>
    %694 = math.exp %693 : vector<8x32xf32>
    %cst_146 = arith.constant 1.000000e+00 : f32
    %695 = vector.broadcast %cst_146 : f32 to vector<8x32xf32>
    %696 = arith.addf %695, %694 : vector<8x32xf32>
    %697 = arith.divf %695, %696 : vector<8x32xf32>
    %698 = arith.mulf %689, %642 : vector<8x32xf32>
    %699 = arith.mulf %683, %691 : vector<8x32xf32>
    %700 = arith.addf %698, %699 : vector<8x32xf32>
    %701 = math.tanh %700 : vector<8x32xf32>
    %702 = arith.mulf %697, %701 : vector<8x32xf32>
    %703 = vector.extract_strided_slice %677 {offsets = [0, 0], sizes = [8, 32], strides = [1, 1]} : vector<8x128xf32> to vector<8x32xf32>
    %704 = arith.negf %703 : vector<8x32xf32>
    %705 = math.exp %704 : vector<8x32xf32>
    %cst_147 = arith.constant 1.000000e+00 : f32
    %706 = vector.broadcast %cst_147 : f32 to vector<8x32xf32>
    %707 = arith.addf %706, %705 : vector<8x32xf32>
    %708 = arith.divf %706, %707 : vector<8x32xf32>
    %709 = vector.extract_strided_slice %677 {offsets = [0, 32], sizes = [8, 32], strides = [1, 1]} : vector<8x128xf32> to vector<8x32xf32>
    %710 = arith.negf %709 : vector<8x32xf32>
    %711 = math.exp %710 : vector<8x32xf32>
    %cst_148 = arith.constant 1.000000e+00 : f32
    %712 = vector.broadcast %cst_148 : f32 to vector<8x32xf32>
    %713 = arith.addf %712, %711 : vector<8x32xf32>
    %714 = arith.divf %712, %713 : vector<8x32xf32>
    %715 = vector.extract_strided_slice %677 {offsets = [0, 64], sizes = [8, 32], strides = [1, 1]} : vector<8x128xf32> to vector<8x32xf32>
    %716 = math.tanh %715 : vector<8x32xf32>
    %717 = vector.extract_strided_slice %677 {offsets = [0, 96], sizes = [8, 32], strides = [1, 1]} : vector<8x128xf32> to vector<8x32xf32>
    %718 = arith.negf %717 : vector<8x32xf32>
    %719 = math.exp %718 : vector<8x32xf32>
    %cst_149 = arith.constant 1.000000e+00 : f32
    %720 = vector.broadcast %cst_149 : f32 to vector<8x32xf32>
    %721 = arith.addf %720, %719 : vector<8x32xf32>
    %722 = arith.divf %720, %721 : vector<8x32xf32>
    %723 = arith.mulf %714, %667 : vector<8x32xf32>
    %724 = arith.mulf %708, %716 : vector<8x32xf32>
    %725 = arith.addf %723, %724 : vector<8x32xf32>
    %726 = math.tanh %725 : vector<8x32xf32>
    %727 = arith.mulf %722, %726 : vector<8x32xf32>
    %c32_150 = arith.constant 32 : index
    %c0_151 = arith.constant 0 : index
    %728 = vector.load %arg8[%c32_150, %c0_151] : memref<64x256xf32, #tpu.memory_space<vmem>>, vector<8x128xf32>
    %c24_152 = arith.constant 24 : index
    %c128_153 = arith.constant 128 : index
    %729 = vector.load %arg8[%c24_152, %c128_153] : memref<64x256xf32, #tpu.memory_space<vmem>>, vector<8x128xf32>
    %730 = tpu.concatenate %702, %727 in 1 : vector<8x32xf32>, vector<8x32xf32> -> vector<8x64xf32>
    %cst_154 = arith.constant dense<0.000000e+00> : vector<8x256xf32>
    %731 = tpu.matmul %730, %491, %cst_154 {dimension_numbers = #tpu.dot_dimension_numbers<[1], [0], [0], [1], [0, 0, 1, 1], [], []>} : vector<8x64xf32>, vector<64x256xf32>, vector<8x256xf32> -> vector<8x256xf32>
    %732 = vector.extract_strided_slice %731 {offsets = [0, 0], sizes = [8, 128], strides = [1, 1]} : vector<8x256xf32> to vector<8x128xf32>
    %733 = arith.addf %728, %732 : vector<8x128xf32>
    %734 = vector.extract_strided_slice %731 {offsets = [0, 128], sizes = [8, 128], strides = [1, 1]} : vector<8x256xf32> to vector<8x128xf32>
    %735 = arith.addf %729, %734 : vector<8x128xf32>
    %736 = vector.extract_strided_slice %733 {offsets = [0, 0], sizes = [8, 32], strides = [1, 1]} : vector<8x128xf32> to vector<8x32xf32>
    %737 = arith.negf %736 : vector<8x32xf32>
    %738 = math.exp %737 : vector<8x32xf32>
    %cst_155 = arith.constant 1.000000e+00 : f32
    %739 = vector.broadcast %cst_155 : f32 to vector<8x32xf32>
    %740 = arith.addf %739, %738 : vector<8x32xf32>
    %741 = arith.divf %739, %740 : vector<8x32xf32>
    %742 = vector.extract_strided_slice %733 {offsets = [0, 32], sizes = [8, 32], strides = [1, 1]} : vector<8x128xf32> to vector<8x32xf32>
    %743 = arith.negf %742 : vector<8x32xf32>
    %744 = math.exp %743 : vector<8x32xf32>
    %cst_156 = arith.constant 1.000000e+00 : f32
    %745 = vector.broadcast %cst_156 : f32 to vector<8x32xf32>
    %746 = arith.addf %745, %744 : vector<8x32xf32>
    %747 = arith.divf %745, %746 : vector<8x32xf32>
    %748 = vector.extract_strided_slice %733 {offsets = [0, 64], sizes = [8, 32], strides = [1, 1]} : vector<8x128xf32> to vector<8x32xf32>
    %749 = math.tanh %748 : vector<8x32xf32>
    %750 = vector.extract_strided_slice %733 {offsets = [0, 96], sizes = [8, 32], strides = [1, 1]} : vector<8x128xf32> to vector<8x32xf32>
    %751 = arith.negf %750 : vector<8x32xf32>
    %752 = math.exp %751 : vector<8x32xf32>
    %cst_157 = arith.constant 1.000000e+00 : f32
    %753 = vector.broadcast %cst_157 : f32 to vector<8x32xf32>
    %754 = arith.addf %753, %752 : vector<8x32xf32>
    %755 = arith.divf %753, %754 : vector<8x32xf32>
    %756 = arith.mulf %747, %700 : vector<8x32xf32>
    %757 = arith.mulf %741, %749 : vector<8x32xf32>
    %758 = arith.addf %756, %757 : vector<8x32xf32>
    %759 = math.tanh %758 : vector<8x32xf32>
    %760 = arith.mulf %755, %759 : vector<8x32xf32>
    %761 = vector.extract_strided_slice %735 {offsets = [0, 0], sizes = [8, 32], strides = [1, 1]} : vector<8x128xf32> to vector<8x32xf32>
    %762 = arith.negf %761 : vector<8x32xf32>
    %763 = math.exp %762 : vector<8x32xf32>
    %cst_158 = arith.constant 1.000000e+00 : f32
    %764 = vector.broadcast %cst_158 : f32 to vector<8x32xf32>
    %765 = arith.addf %764, %763 : vector<8x32xf32>
    %766 = arith.divf %764, %765 : vector<8x32xf32>
    %767 = vector.extract_strided_slice %735 {offsets = [0, 32], sizes = [8, 32], strides = [1, 1]} : vector<8x128xf32> to vector<8x32xf32>
    %768 = arith.negf %767 : vector<8x32xf32>
    %769 = math.exp %768 : vector<8x32xf32>
    %cst_159 = arith.constant 1.000000e+00 : f32
    %770 = vector.broadcast %cst_159 : f32 to vector<8x32xf32>
    %771 = arith.addf %770, %769 : vector<8x32xf32>
    %772 = arith.divf %770, %771 : vector<8x32xf32>
    %773 = vector.extract_strided_slice %735 {offsets = [0, 64], sizes = [8, 32], strides = [1, 1]} : vector<8x128xf32> to vector<8x32xf32>
    %774 = math.tanh %773 : vector<8x32xf32>
    %775 = vector.extract_strided_slice %735 {offsets = [0, 96], sizes = [8, 32], strides = [1, 1]} : vector<8x128xf32> to vector<8x32xf32>
    %776 = arith.negf %775 : vector<8x32xf32>
    %777 = math.exp %776 : vector<8x32xf32>
    %cst_160 = arith.constant 1.000000e+00 : f32
    %778 = vector.broadcast %cst_160 : f32 to vector<8x32xf32>
    %779 = arith.addf %778, %777 : vector<8x32xf32>
    %780 = arith.divf %778, %779 : vector<8x32xf32>
    %781 = arith.mulf %772, %725 : vector<8x32xf32>
    %782 = arith.mulf %766, %774 : vector<8x32xf32>
    %783 = arith.addf %781, %782 : vector<8x32xf32>
    %784 = math.tanh %783 : vector<8x32xf32>
    %785 = arith.mulf %780, %784 : vector<8x32xf32>
    %c40_161 = arith.constant 40 : index
    %c0_162 = arith.constant 0 : index
    %786 = vector.load %arg8[%c40_161, %c0_162] : memref<64x256xf32, #tpu.memory_space<vmem>>, vector<8x128xf32>
    %c16_163 = arith.constant 16 : index
    %c128_164 = arith.constant 128 : index
    %787 = vector.load %arg8[%c16_163, %c128_164] : memref<64x256xf32, #tpu.memory_space<vmem>>, vector<8x128xf32>
    %788 = tpu.concatenate %760, %785 in 1 : vector<8x32xf32>, vector<8x32xf32> -> vector<8x64xf32>
    %cst_165 = arith.constant dense<0.000000e+00> : vector<8x256xf32>
    %789 = tpu.matmul %788, %491, %cst_165 {dimension_numbers = #tpu.dot_dimension_numbers<[1], [0], [0], [1], [0, 0, 1, 1], [], []>} : vector<8x64xf32>, vector<64x256xf32>, vector<8x256xf32> -> vector<8x256xf32>
    %790 = vector.extract_strided_slice %789 {offsets = [0, 0], sizes = [8, 128], strides = [1, 1]} : vector<8x256xf32> to vector<8x128xf32>
    %791 = arith.addf %786, %790 : vector<8x128xf32>
    %792 = vector.extract_strided_slice %789 {offsets = [0, 128], sizes = [8, 128], strides = [1, 1]} : vector<8x256xf32> to vector<8x128xf32>
    %793 = arith.addf %787, %792 : vector<8x128xf32>
    %794 = vector.extract_strided_slice %791 {offsets = [0, 0], sizes = [8, 32], strides = [1, 1]} : vector<8x128xf32> to vector<8x32xf32>
    %795 = arith.negf %794 : vector<8x32xf32>
    %796 = math.exp %795 : vector<8x32xf32>
    %cst_166 = arith.constant 1.000000e+00 : f32
    %797 = vector.broadcast %cst_166 : f32 to vector<8x32xf32>
    %798 = arith.addf %797, %796 : vector<8x32xf32>
    %799 = arith.divf %797, %798 : vector<8x32xf32>
    %800 = vector.extract_strided_slice %791 {offsets = [0, 32], sizes = [8, 32], strides = [1, 1]} : vector<8x128xf32> to vector<8x32xf32>
    %801 = arith.negf %800 : vector<8x32xf32>
    %802 = math.exp %801 : vector<8x32xf32>
    %cst_167 = arith.constant 1.000000e+00 : f32
    %803 = vector.broadcast %cst_167 : f32 to vector<8x32xf32>
    %804 = arith.addf %803, %802 : vector<8x32xf32>
    %805 = arith.divf %803, %804 : vector<8x32xf32>
    %806 = vector.extract_strided_slice %791 {offsets = [0, 64], sizes = [8, 32], strides = [1, 1]} : vector<8x128xf32> to vector<8x32xf32>
    %807 = math.tanh %806 : vector<8x32xf32>
    %808 = vector.extract_strided_slice %791 {offsets = [0, 96], sizes = [8, 32], strides = [1, 1]} : vector<8x128xf32> to vector<8x32xf32>
    %809 = arith.negf %808 : vector<8x32xf32>
    %810 = math.exp %809 : vector<8x32xf32>
    %cst_168 = arith.constant 1.000000e+00 : f32
    %811 = vector.broadcast %cst_168 : f32 to vector<8x32xf32>
    %812 = arith.addf %811, %810 : vector<8x32xf32>
    %813 = arith.divf %811, %812 : vector<8x32xf32>
    %814 = arith.mulf %805, %758 : vector<8x32xf32>
    %815 = arith.mulf %799, %807 : vector<8x32xf32>
    %816 = arith.addf %814, %815 : vector<8x32xf32>
    %817 = math.tanh %816 : vector<8x32xf32>
    %818 = arith.mulf %813, %817 : vector<8x32xf32>
    %819 = vector.extract_strided_slice %793 {offsets = [0, 0], sizes = [8, 32], strides = [1, 1]} : vector<8x128xf32> to vector<8x32xf32>
    %820 = arith.negf %819 : vector<8x32xf32>
    %821 = math.exp %820 : vector<8x32xf32>
    %cst_169 = arith.constant 1.000000e+00 : f32
    %822 = vector.broadcast %cst_169 : f32 to vector<8x32xf32>
    %823 = arith.addf %822, %821 : vector<8x32xf32>
    %824 = arith.divf %822, %823 : vector<8x32xf32>
    %825 = vector.extract_strided_slice %793 {offsets = [0, 32], sizes = [8, 32], strides = [1, 1]} : vector<8x128xf32> to vector<8x32xf32>
    %826 = arith.negf %825 : vector<8x32xf32>
    %827 = math.exp %826 : vector<8x32xf32>
    %cst_170 = arith.constant 1.000000e+00 : f32
    %828 = vector.broadcast %cst_170 : f32 to vector<8x32xf32>
    %829 = arith.addf %828, %827 : vector<8x32xf32>
    %830 = arith.divf %828, %829 : vector<8x32xf32>
    %831 = vector.extract_strided_slice %793 {offsets = [0, 64], sizes = [8, 32], strides = [1, 1]} : vector<8x128xf32> to vector<8x32xf32>
    %832 = math.tanh %831 : vector<8x32xf32>
    %833 = vector.extract_strided_slice %793 {offsets = [0, 96], sizes = [8, 32], strides = [1, 1]} : vector<8x128xf32> to vector<8x32xf32>
    %834 = arith.negf %833 : vector<8x32xf32>
    %835 = math.exp %834 : vector<8x32xf32>
    %cst_171 = arith.constant 1.000000e+00 : f32
    %836 = vector.broadcast %cst_171 : f32 to vector<8x32xf32>
    %837 = arith.addf %836, %835 : vector<8x32xf32>
    %838 = arith.divf %836, %837 : vector<8x32xf32>
    %839 = arith.mulf %830, %783 : vector<8x32xf32>
    %840 = arith.mulf %824, %832 : vector<8x32xf32>
    %841 = arith.addf %839, %840 : vector<8x32xf32>
    %842 = math.tanh %841 : vector<8x32xf32>
    %843 = arith.mulf %838, %842 : vector<8x32xf32>
    %c48_172 = arith.constant 48 : index
    %c0_173 = arith.constant 0 : index
    %844 = vector.load %arg8[%c48_172, %c0_173] : memref<64x256xf32, #tpu.memory_space<vmem>>, vector<8x128xf32>
    %c8_174 = arith.constant 8 : index
    %c128_175 = arith.constant 128 : index
    %845 = vector.load %arg8[%c8_174, %c128_175] : memref<64x256xf32, #tpu.memory_space<vmem>>, vector<8x128xf32>
    %846 = tpu.concatenate %818, %843 in 1 : vector<8x32xf32>, vector<8x32xf32> -> vector<8x64xf32>
    %cst_176 = arith.constant dense<0.000000e+00> : vector<8x256xf32>
    %847 = tpu.matmul %846, %491, %cst_176 {dimension_numbers = #tpu.dot_dimension_numbers<[1], [0], [0], [1], [0, 0, 1, 1], [], []>} : vector<8x64xf32>, vector<64x256xf32>, vector<8x256xf32> -> vector<8x256xf32>
    %848 = vector.extract_strided_slice %847 {offsets = [0, 0], sizes = [8, 128], strides = [1, 1]} : vector<8x256xf32> to vector<8x128xf32>
    %849 = arith.addf %844, %848 : vector<8x128xf32>
    %850 = vector.extract_strided_slice %847 {offsets = [0, 128], sizes = [8, 128], strides = [1, 1]} : vector<8x256xf32> to vector<8x128xf32>
    %851 = arith.addf %845, %850 : vector<8x128xf32>
    %852 = vector.extract_strided_slice %849 {offsets = [0, 0], sizes = [8, 32], strides = [1, 1]} : vector<8x128xf32> to vector<8x32xf32>
    %853 = arith.negf %852 : vector<8x32xf32>
    %854 = math.exp %853 : vector<8x32xf32>
    %cst_177 = arith.constant 1.000000e+00 : f32
    %855 = vector.broadcast %cst_177 : f32 to vector<8x32xf32>
    %856 = arith.addf %855, %854 : vector<8x32xf32>
    %857 = arith.divf %855, %856 : vector<8x32xf32>
    %858 = vector.extract_strided_slice %849 {offsets = [0, 32], sizes = [8, 32], strides = [1, 1]} : vector<8x128xf32> to vector<8x32xf32>
    %859 = arith.negf %858 : vector<8x32xf32>
    %860 = math.exp %859 : vector<8x32xf32>
    %cst_178 = arith.constant 1.000000e+00 : f32
    %861 = vector.broadcast %cst_178 : f32 to vector<8x32xf32>
    %862 = arith.addf %861, %860 : vector<8x32xf32>
    %863 = arith.divf %861, %862 : vector<8x32xf32>
    %864 = vector.extract_strided_slice %849 {offsets = [0, 64], sizes = [8, 32], strides = [1, 1]} : vector<8x128xf32> to vector<8x32xf32>
    %865 = math.tanh %864 : vector<8x32xf32>
    %866 = vector.extract_strided_slice %849 {offsets = [0, 96], sizes = [8, 32], strides = [1, 1]} : vector<8x128xf32> to vector<8x32xf32>
    %867 = arith.negf %866 : vector<8x32xf32>
    %868 = math.exp %867 : vector<8x32xf32>
    %cst_179 = arith.constant 1.000000e+00 : f32
    %869 = vector.broadcast %cst_179 : f32 to vector<8x32xf32>
    %870 = arith.addf %869, %868 : vector<8x32xf32>
    %871 = arith.divf %869, %870 : vector<8x32xf32>
    %872 = arith.mulf %863, %816 : vector<8x32xf32>
    %873 = arith.mulf %857, %865 : vector<8x32xf32>
    %874 = arith.addf %872, %873 : vector<8x32xf32>
    %875 = math.tanh %874 : vector<8x32xf32>
    %876 = arith.mulf %871, %875 : vector<8x32xf32>
    %877 = vector.extract_strided_slice %851 {offsets = [0, 0], sizes = [8, 32], strides = [1, 1]} : vector<8x128xf32> to vector<8x32xf32>
    %878 = arith.negf %877 : vector<8x32xf32>
    %879 = math.exp %878 : vector<8x32xf32>
    %cst_180 = arith.constant 1.000000e+00 : f32
    %880 = vector.broadcast %cst_180 : f32 to vector<8x32xf32>
    %881 = arith.addf %880, %879 : vector<8x32xf32>
    %882 = arith.divf %880, %881 : vector<8x32xf32>
    %883 = vector.extract_strided_slice %851 {offsets = [0, 32], sizes = [8, 32], strides = [1, 1]} : vector<8x128xf32> to vector<8x32xf32>
    %884 = arith.negf %883 : vector<8x32xf32>
    %885 = math.exp %884 : vector<8x32xf32>
    %cst_181 = arith.constant 1.000000e+00 : f32
    %886 = vector.broadcast %cst_181 : f32 to vector<8x32xf32>
    %887 = arith.addf %886, %885 : vector<8x32xf32>
    %888 = arith.divf %886, %887 : vector<8x32xf32>
    %889 = vector.extract_strided_slice %851 {offsets = [0, 64], sizes = [8, 32], strides = [1, 1]} : vector<8x128xf32> to vector<8x32xf32>
    %890 = math.tanh %889 : vector<8x32xf32>
    %891 = vector.extract_strided_slice %851 {offsets = [0, 96], sizes = [8, 32], strides = [1, 1]} : vector<8x128xf32> to vector<8x32xf32>
    %892 = arith.negf %891 : vector<8x32xf32>
    %893 = math.exp %892 : vector<8x32xf32>
    %cst_182 = arith.constant 1.000000e+00 : f32
    %894 = vector.broadcast %cst_182 : f32 to vector<8x32xf32>
    %895 = arith.addf %894, %893 : vector<8x32xf32>
    %896 = arith.divf %894, %895 : vector<8x32xf32>
    %897 = arith.mulf %888, %841 : vector<8x32xf32>
    %898 = arith.mulf %882, %890 : vector<8x32xf32>
    %899 = arith.addf %897, %898 : vector<8x32xf32>
    %900 = math.tanh %899 : vector<8x32xf32>
    %901 = arith.mulf %896, %900 : vector<8x32xf32>
    %c56_183 = arith.constant 56 : index
    %c0_184 = arith.constant 0 : index
    %902 = vector.load %arg8[%c56_183, %c0_184] : memref<64x256xf32, #tpu.memory_space<vmem>>, vector<8x128xf32>
    %c0_185 = arith.constant 0 : index
    %c128_186 = arith.constant 128 : index
    %903 = vector.load %arg8[%c0_185, %c128_186] : memref<64x256xf32, #tpu.memory_space<vmem>>, vector<8x128xf32>
    %904 = tpu.concatenate %876, %901 in 1 : vector<8x32xf32>, vector<8x32xf32> -> vector<8x64xf32>
    %cst_187 = arith.constant dense<0.000000e+00> : vector<8x256xf32>
    %905 = tpu.matmul %904, %491, %cst_187 {dimension_numbers = #tpu.dot_dimension_numbers<[1], [0], [0], [1], [0, 0, 1, 1], [], []>} : vector<8x64xf32>, vector<64x256xf32>, vector<8x256xf32> -> vector<8x256xf32>
    %906 = vector.extract_strided_slice %905 {offsets = [0, 0], sizes = [8, 128], strides = [1, 1]} : vector<8x256xf32> to vector<8x128xf32>
    %907 = arith.addf %902, %906 : vector<8x128xf32>
    %908 = vector.extract_strided_slice %905 {offsets = [0, 128], sizes = [8, 128], strides = [1, 1]} : vector<8x256xf32> to vector<8x128xf32>
    %909 = arith.addf %903, %908 : vector<8x128xf32>
    %910 = vector.extract_strided_slice %907 {offsets = [0, 0], sizes = [8, 32], strides = [1, 1]} : vector<8x128xf32> to vector<8x32xf32>
    %911 = arith.negf %910 : vector<8x32xf32>
    %912 = math.exp %911 : vector<8x32xf32>
    %cst_188 = arith.constant 1.000000e+00 : f32
    %913 = vector.broadcast %cst_188 : f32 to vector<8x32xf32>
    %914 = arith.addf %913, %912 : vector<8x32xf32>
    %915 = arith.divf %913, %914 : vector<8x32xf32>
    %916 = vector.extract_strided_slice %907 {offsets = [0, 32], sizes = [8, 32], strides = [1, 1]} : vector<8x128xf32> to vector<8x32xf32>
    %917 = arith.negf %916 : vector<8x32xf32>
    %918 = math.exp %917 : vector<8x32xf32>
    %cst_189 = arith.constant 1.000000e+00 : f32
    %919 = vector.broadcast %cst_189 : f32 to vector<8x32xf32>
    %920 = arith.addf %919, %918 : vector<8x32xf32>
    %921 = arith.divf %919, %920 : vector<8x32xf32>
    %922 = vector.extract_strided_slice %907 {offsets = [0, 64], sizes = [8, 32], strides = [1, 1]} : vector<8x128xf32> to vector<8x32xf32>
    %923 = math.tanh %922 : vector<8x32xf32>
    %924 = vector.extract_strided_slice %907 {offsets = [0, 96], sizes = [8, 32], strides = [1, 1]} : vector<8x128xf32> to vector<8x32xf32>
    %925 = arith.negf %924 : vector<8x32xf32>
    %926 = math.exp %925 : vector<8x32xf32>
    %cst_190 = arith.constant 1.000000e+00 : f32
    %927 = vector.broadcast %cst_190 : f32 to vector<8x32xf32>
    %928 = arith.addf %927, %926 : vector<8x32xf32>
    %929 = arith.divf %927, %928 : vector<8x32xf32>
    %930 = arith.mulf %921, %874 : vector<8x32xf32>
    %931 = arith.mulf %915, %923 : vector<8x32xf32>
    %932 = arith.addf %930, %931 : vector<8x32xf32>
    %933 = math.tanh %932 : vector<8x32xf32>
    %934 = arith.mulf %929, %933 : vector<8x32xf32>
    %935 = vector.extract_strided_slice %909 {offsets = [0, 0], sizes = [8, 32], strides = [1, 1]} : vector<8x128xf32> to vector<8x32xf32>
    %936 = arith.negf %935 : vector<8x32xf32>
    %937 = math.exp %936 : vector<8x32xf32>
    %cst_191 = arith.constant 1.000000e+00 : f32
    %938 = vector.broadcast %cst_191 : f32 to vector<8x32xf32>
    %939 = arith.addf %938, %937 : vector<8x32xf32>
    %940 = arith.divf %938, %939 : vector<8x32xf32>
    %941 = vector.extract_strided_slice %909 {offsets = [0, 32], sizes = [8, 32], strides = [1, 1]} : vector<8x128xf32> to vector<8x32xf32>
    %942 = arith.negf %941 : vector<8x32xf32>
    %943 = math.exp %942 : vector<8x32xf32>
    %cst_192 = arith.constant 1.000000e+00 : f32
    %944 = vector.broadcast %cst_192 : f32 to vector<8x32xf32>
    %945 = arith.addf %944, %943 : vector<8x32xf32>
    %946 = arith.divf %944, %945 : vector<8x32xf32>
    %947 = vector.extract_strided_slice %909 {offsets = [0, 64], sizes = [8, 32], strides = [1, 1]} : vector<8x128xf32> to vector<8x32xf32>
    %948 = math.tanh %947 : vector<8x32xf32>
    %949 = vector.extract_strided_slice %909 {offsets = [0, 96], sizes = [8, 32], strides = [1, 1]} : vector<8x128xf32> to vector<8x32xf32>
    %950 = arith.negf %949 : vector<8x32xf32>
    %951 = math.exp %950 : vector<8x32xf32>
    %cst_193 = arith.constant 1.000000e+00 : f32
    %952 = vector.broadcast %cst_193 : f32 to vector<8x32xf32>
    %953 = arith.addf %952, %951 : vector<8x32xf32>
    %954 = arith.divf %952, %953 : vector<8x32xf32>
    %955 = arith.mulf %946, %899 : vector<8x32xf32>
    %956 = arith.mulf %940, %948 : vector<8x32xf32>
    %957 = arith.addf %955, %956 : vector<8x32xf32>
    %958 = math.tanh %957 : vector<8x32xf32>
    %959 = arith.mulf %954, %958 : vector<8x32xf32>
    %960 = tpu.concatenate %528, %959 in 1 : vector<8x32xf32>, vector<8x32xf32> -> vector<8x64xf32>
    %961 = tpu.concatenate %586, %901 in 1 : vector<8x32xf32>, vector<8x32xf32> -> vector<8x64xf32>
    %962 = tpu.concatenate %644, %843 in 1 : vector<8x32xf32>, vector<8x32xf32> -> vector<8x64xf32>
    %963 = tpu.concatenate %702, %785 in 1 : vector<8x32xf32>, vector<8x32xf32> -> vector<8x64xf32>
    %964 = tpu.concatenate %760, %727 in 1 : vector<8x32xf32>, vector<8x32xf32> -> vector<8x64xf32>
    %965 = tpu.concatenate %818, %669 in 1 : vector<8x32xf32>, vector<8x32xf32> -> vector<8x64xf32>
    %966 = tpu.concatenate %876, %611 in 1 : vector<8x32xf32>, vector<8x32xf32> -> vector<8x64xf32>
    %967 = tpu.concatenate %934, %553 in 1 : vector<8x32xf32>, vector<8x32xf32> -> vector<8x64xf32>
    %968 = tpu.concatenate %960, %961, %962, %963, %964, %965, %966, %967 in 0 : vector<8x64xf32>, vector<8x64xf32>, vector<8x64xf32>, vector<8x64xf32>, vector<8x64xf32>, vector<8x64xf32>, vector<8x64xf32>, vector<8x64xf32> -> vector<64x64xf32>
    %c0_194 = arith.constant 0 : index
    %c0_195 = arith.constant 0 : index
    %969 = vector.load %arg7[%c0_194, %c0_195] : memref<64x64xf32, #tpu.memory_space<vmem>>, vector<64x64xf32>
    tpu.vector_store %arg7[%c0_194, %c0_195], %968 {strides = array<i32>} : memref<64x64xf32, #tpu.memory_space<vmem>>, vector<64x64xf32>,
    return
  }
}

</mosaic_0001>

<bundles_post_ra>
// kernel: _forward.1
= control target key start
LH: loop header
LB: loop body
LE: loop exit
PB: predicated region body
PF: predicated region fallthrough
CT: control target
= control target key end

     0   :  { %12 = vsyncpa [#allocation4], 0  ;;  %s3980_s0 = inlined_call_operand.vmem [shape: f32[64,8], index: 0, kind: input, shape index: {}]   ;;  %s3981_s1 = inlined_call_operand.vmem [shape: f32[8,256], index: 1, kind: input, shape index: {}]   ;;  %s3982_s2 = inlined_call_operand.hbm [shape: f32[64,256], index: 2, kind: input, shape index: {}]   ;;  %s3983_s3 = inlined_call_operand.vmem [shape: f32[1,256], index: 3, kind: input, shape index: {}]   ;;  %s3984_s4 = inlined_call_operand.hbm [shape: f32[64,256], index: 4, kind: input, shape index: {}]   ;;  %s3985_s5 = inlined_call_operand.vmem [shape: f32[64,256], index: 5, kind: input, shape index: {}]   ;;  %s3986_s6 = inlined_call_operand.vmem [shape: f32[1,256], index: 6, kind: input, shape index: {}]   ;;  %s3987_s7 = inlined_call_operand.vmem [shape: f32[64,64], index: 7, kind: output, shape index: {}]  }
   0x1   :  { %13 = vsyncpa [#allocation6], 0  ;;  %s2999_s24 = smov [#allocation3]  }
   0x2   :  { %s23_s25 = sshll.u32 %s2999_s24, 4  ;;  %s24_s25 = int_to_ptr.vmem [resolvable:$true] %s23_s25 }
   0x3   :  { %s2963_s26 = scalar_lea.vmem %s24_s25, 2048  ;;  %p2968_p1 = scmp.lt.s32.totalorder %s24_s25, %s24_s25 }
   0x4   :  { %p2964_p0 = scmp.ne.s32.totalorder %s24_s25, %s2963_s26  ;;  %p2969_p2 = scmp.lt.s32.totalorder %s2963_s26, %s2963_s26 }
   0x6   :  { %p2970_p3 = por %p2969_p2, %p2968_p1 }
   0x8   :  { %p2971_p4 = pnand %p2970_p3, %p2964_p0 }
   0xa   :  { %2974 = shalt.err (!%p2971_p4)
}
   0xb   :  { %s3000_s27 = smov 256   ;;  %s3001_s28 = smov 16  }
   0xc   :  { %29 = dma.hbm_to_vmem [thread:$0]  %s3982_s2, 2048, %s24_s25, [#allocation4], %s3000_s27, %s3000_s27, %s3001_s28  }
   0xd   :  { %s3002_s8 = smov [#allocation5]  }
   0xe   :  { %s37_s9 = sshll.u32 %s3002_s8, 4  ;;  %s38_s9 = int_to_ptr.vmem [resolvable:$true] %s37_s9 }
   0xf   :  { %s2983_s10 = scalar_lea.vmem %s38_s9, 2048  ;;  %p2988_p6 = scmp.lt.s32.totalorder %s38_s9, %s38_s9 }
  0x10   :  { %p2984_p5 = scmp.ne.s32.totalorder %s38_s9, %s2983_s10  ;;  %p2989_p7 = scmp.lt.s32.totalorder %s2983_s10, %s2983_s10 }
  0x12   :  { %p2990_p8 = por %p2989_p7, %p2988_p6 }
  0x14   :  { %p2991_p9 = pnand %p2990_p8, %p2984_p5 }
  0x16   :  { %2994 = shalt.err (!%p2991_p9)
}
  0x17   :  { %43 = dma.hbm_to_vmem [thread:$0]  %s3984_s4, 2048, %s38_s9, [#allocation6], %s3000_s27, %s3000_s27, %s3001_s28  }
  0x18   :  { %2995 = dma.done.wait [#allocation4], 2048  }
  0x19   :  { %2996 = vsyncadd [#allocation4], 4294965248 }
  0x1a   :  { %2997 = dma.done.wait [#allocation6], 2048  }
  0x1b   :  { %2998 = vsyncadd [#allocation6], 4294965248  ;;  %v3003_v0 = vmov 0.0   ;;  %v63_v1 = vld [vmem:[%s3981_s1 + $0x8] sm:$0xff]  ;;  %v3057_v2 = vld [vmem:[#allocation3 + $0x78] sm:$0xff]  ;;  %vm76_vm0 = vcmask 64512   ;;  %v66_v27 = vlaneseq }
  0x1c   :  { %165 = vmatprep.mubr.f32.mxu0 %v3003_v0  ;;  %316 = vmatprep.mubr.f32.mxu1 %v3003_v0  ;;  %v62_v3 = vld [vmem:[%s3981_s1] sm:$0xff]  ;;  %v3063_v4 = vld [vmem:[#allocation3 + $0x70] sm:$0xff]  ;;  %v3068_v6 = vld [vmem:[#allocation3 + $0x68] sm:$0xff]  ;;  %s3005_s8 = smov 32   ;;  %vm383_vm1 = vcmask 261120   ;;  %vm248_vm2 = vcmask 523264  }
  0x1d   :  { %131 = vmatprep.subr.mxu0 %v63_v1  ;;  %268 = vmatprep.subr.mxu1 %v3057_v2  ;;  %v54_v5 = vld [vmem:[%s3980_s0] sm:$0xff]  ;;  %v3073_v8 = vld [vmem:[#allocation3 + $0x58] sm:$0xff]  ;;  %v3077_v9 = vld [vmem:[#allocation3 + $0x50] sm:$0xff]  ;;  %v3184_v28 = vshrl.u32 %v66_v27, 7 }
  0x1e   :  { %132 = vmatpush1.msra.mxu0 %v62_v3  ;;  %269 = vmatpush1.msra.mxu1 %v3063_v4  ;;  %v3071_v7 = vld [vmem:[#allocation3 + $0x60] sm:$0xff]  ;;  %v55_v10 = vld [vmem:[%s3980_s0 + $0x8] sm:$0xff]  ;;  %v3091_v13 = vld [vmem:[#allocation3 + $0x38] sm:$0xff] }
  0x1f   :  { %2630 = vmatmul.mubr.msk.f32.vlgmr.msra.gmra.mxu0 %vm76_vm0, %v54_v5  ;;  %270 = vmatprep.subr.mxu1 %v3068_v6  ;;  %v3084_v11 = vld [vmem:[#allocation3 + $0x48] sm:$0xff]  ;;  %v3087_v12 = vld [vmem:[#allocation3 + $0x40] sm:$0xff]  ;;  %v3096_v14 = vld [vmem:[#allocation3 + $0x30] sm:$0xff]  ;;  %v72_v29 = vsub.s32 1, %v3184_v28  ;;  %v68_v31 = vsub.s32 0, %v3184_v28 }
  0x20   :  { %271 = vmatpush1.msra.mxu1 %v3071_v7  ;;  %171 = vmatprep.mubr.f32.mxu0 %v3003_v0  ;;  %v56_v15 = vld [vmem:[%s3980_s0 + $0x10] sm:$0xff]  ;;  %v3103_v16 = vld [vmem:[#allocation3 + $0x28] sm:$0xff]  ;;  %v3106_v17 = vld [vmem:[#allocation3 + $0x20] sm:$0xff] }
  0x21   :  { %272 = vmatprep.subr.mxu1 %v3073_v8  ;;  %539 = vmatprep.subr.mxu0 %v3057_v2  ;;  %v3110_v18 = vld [vmem:[#allocation3 + $0x18] sm:$0xff]  ;;  %v3115_v19 = vld [vmem:[#allocation3 + $0x10] sm:$0xff]  ;;  %v3122_v21 = vld [vmem:[#allocation3 + $0x8] sm:$0xff] }
  0x22   :  { %273 = vmatpush1.msra.mxu1 %v3077_v9  ;;  %540 = vmatpush1.msra.mxu0 %v3063_v4  ;;  %v57_v20 = vld [vmem:[%s3980_s0 + $0x18] sm:$0xff]  ;;  %v3125_v22 = vld [vmem:[#allocation3] sm:$0xff]  ;;  %v59_v24 = vld [vmem:[%s3980_s0 + $0x28] sm:$0xff] }
  0x23   :  { %2631 = vmatmul.mubr.msk.f32.gmra.mxu0 %vm76_vm0, %v55_v10  ;;  %274 = vmatprep.subr.mxu1 %v3084_v11  ;;  %v58_v23 = vld [vmem:[%s3980_s0 + $0x20] sm:$0xff]  ;;  %v60_v25 = vld [vmem:[%s3980_s0 + $0x30] sm:$0xff]  ;;  %v61_v26 = vld [vmem:[%s3980_s0 + $0x38] sm:$0xff] }
  0x24   :  { %275 = vmatpush1.msra.mxu1 %v3087_v12  ;;  %177 = vmatprep.mubr.f32.mxu0 %v3003_v0  ;;  %v64_v30 = vld [vmem:[%s3983_s3] sm:$0x3]  ;;  %s3004_s3 = smov 64  }
  0x25   :  { %276 = vmatprep.subr.mxu1 %v3091_v13  ;;  %541 = vmatprep.subr.mxu0 %v3068_v6  ;;  %v73_v32 = vrot.slane %v64_v30, %v72_v29  ;;  %v69_v35 = vrot.slane %v64_v30, %v68_v31 }
  0x26   :  { %277 = vmatpush1.msra.mxu1 %v3096_v14  ;;  %542 = vmatpush1.msra.mxu0 %v3071_v7 }
  0x27   :  { %2632 = vmatmul.mubr.msk.f32.gmra.mxu0 %vm76_vm0, %v56_v15  ;;  %278 = vmatprep.subr.mxu1 %v3103_v16 }
  0x28   :  { %279 = vmatpush1.msra.mxu1 %v3106_v17  ;;  %183 = vmatprep.mubr.f32.mxu0 %v3003_v0 }
  0x29   :  { %280 = vmatprep.subr.mxu1 %v3110_v18  ;;  %543 = vmatprep.subr.mxu0 %v3073_v8 }
  0x2a   :  { %281 = vmatpush1.msra.mxu1 %v3115_v19  ;;  %544 = vmatpush1.msra.mxu0 %v3077_v9 }
  0x2b   :  { %2633 = vmatmul.mubr.msk.f32.gmra.mxu0 %vm76_vm0, %v57_v20  ;;  %282 = vmatprep.subr.mxu1 %v3122_v21 }
  0x2c   :  { %283 = vmatpush1.msra.mxu1 %v3125_v22  ;;  %189 = vmatprep.mubr.f32.mxu0 %v3003_v0 }
  0x2d   :  { %317 = vmatmul.mubr.f32.vlgmr.msra.gmra.mxu1 %v3003_v0  ;;  %404 = vmatprep.subr.mxu1 %v3057_v2 }
  0x2e   :  { %405 = vmatpush1.msra.mxu1 %v3063_v4  ;;  %452 = vmatprep.mubr.f32.mxu1 %v3003_v0 }
  0x2f   :  { %2634 = vmatmul.mubr.msk.f32.gmra.mxu0 %vm76_vm0, %v58_v23  ;;  %406 = vmatprep.subr.mxu1 %v3068_v6 }
  0x30   :  { %195 = vmatprep.mubr.f32.mxu0 %v3003_v0  ;;  %407 = vmatpush1.msra.mxu1 %v3071_v7 }
  0x31   :  { %408 = vmatprep.subr.mxu1 %v3073_v8  ;;  %545 = vmatprep.subr.mxu0 %v3084_v11 }
  0x32   :  { %409 = vmatpush1.msra.mxu1 %v3077_v9  ;;  %546 = vmatpush1.msra.mxu0 %v3087_v12 }
  0x33   :  { %2635 = vmatmul.mubr.msk.f32.gmra.mxu0 %vm76_vm0, %v59_v24  ;;  %410 = vmatprep.subr.mxu1 %v3084_v11 }
  0x34   :  { %201 = vmatprep.mubr.f32.mxu0 %v3003_v0  ;;  %411 = vmatpush1.msra.mxu1 %v3087_v12 }
  0x35   :  { %412 = vmatprep.subr.mxu1 %v3091_v13  ;;  %547 = vmatprep.subr.mxu0 %v3091_v13 }
  0x36   :  { %413 = vmatpush1.msra.mxu1 %v3096_v14  ;;  %548 = vmatpush1.msra.mxu0 %v3096_v14 }
  0x37   :  { %2636 = vmatmul.mubr.msk.f32.gmra.mxu0 %vm76_vm0, %v60_v25  ;;  %414 = vmatprep.subr.mxu1 %v3103_v16 }
  0x38   :  { %207 = vmatprep.mubr.f32.mxu0 %v3003_v0  ;;  %415 = vmatpush1.msra.mxu1 %v3106_v17 }
  0x39   :  { %416 = vmatprep.subr.mxu1 %v3110_v18  ;;  %549 = vmatprep.subr.mxu0 %v3103_v16 }
  0x3a   :  { %417 = vmatpush1.msra.mxu1 %v3115_v19  ;;  %550 = vmatpush1.msra.mxu0 %v3106_v17 }
  0x3b   :  { %2637 = vmatmul.mubr.msk.f32.gmra.mxu0 %vm76_vm0, %v61_v26  ;;  %418 = vmatprep.subr.mxu1 %v3122_v21 }
  0x3c   :  { %419 = vmatpush1.msra.mxu1 %v3125_v22  ;;  %551 = vmatprep.subr.mxu0 %v3110_v18 }
  0x3d   :  { %552 = vmatpush1.msra.mxu0 %v3115_v19  ;;  %587 = vmatprep.mubr.f32.mxu0 %v3003_v0 }
  0x3e   :  { %553 = vmatprep.subr.mxu0 %v3122_v21  ;;  %674 = vmatprep.subr.mxu1 %v3057_v2 }
  0x3f   :  { %554 = vmatpush1.msra.mxu0 %v3125_v22 }
  0x40   :  { %809 = vmatprep.subr.mxu0 %v3057_v2 }
  0xdf   :  { %v167_v33 = vpop.f32.mrf.mxu0 }
  0xe0   :  { %v168_v46 = vadd.f32 %v167_v33, %v69_v35 }
  0xe1   :  { %v169_v34 = vpop.f32.mrf.mxu0 }
  0xe2   :  { %v3195_v36 = vadd.f32 %v169_v34, %v73_v32 }
  0xe3   :  { %v173_v37 = vpop.f32.mrf.mxu0 }
  0xe4   :  { %v3197_v38 = vadd.f32 %v173_v37, %v69_v35 }
  0xe5   :  { %v175_v39 = vpop.f32.mrf.mxu0 }
  0xe6   :  { %v3199_v40 = vadd.f32 %v175_v39, %v73_v32 }
  0xe7   :  { %v179_v41 = vpop.f32.mrf.mxu0 }
  0xe8   :  { %v3201_v42 = vadd.f32 %v179_v41, %v69_v35 }
  0xe9   :  { %v181_v43 = vpop.f32.mrf.mxu0 }
  0xea   :  { %v3203_v44 = vadd.f32 %v181_v43, %v73_v32 }
  0xeb   :  { %v185_v45 = vpop.f32.mrf.mxu0 }
  0xec   :  { %v3205_v47 = vadd.f32 %v185_v45, %v69_v35 }
  0xed   :  { %v187_v48 = vpop.f32.mrf.mxu0  ;;  %v318_v49 = vpop.f32.mrf.mxu1 }
  0xee   :  { %v3207_v50 = vadd.f32 %v187_v48, %v73_v32  ;;  %v323_v51 = vadd.f32 %v318_v49, %v168_v46 }
  0xef   :  { %v191_v52 = vpop.f32.mrf.mxu0  ;;  %v320_v20 = vpop.f32.mrf.mxu1 }
  0xf0   :  { %2699 = vtanh.f32 %v323_v51  ;;  %v3209_v53 = vadd.f32 %v191_v52, %v69_v35  ;;  %v2638_v25 = vmul.f32 -1.442695, %v323_v51 }
  0xf1   :  { %v193_v54 = vpop.f32.mrf.mxu0 }
  0xf2   :  { %v3211_v55 = vadd.f32 %v193_v54, %v73_v32 }
  0xf3   :  { %v197_v56 = vpop.f32.mrf.mxu0 }
  0xf4   :  { %v3213_v57 = vadd.f32 %v197_v56, %v69_v35 }
  0xf5   :  { %v199_v58 = vpop.f32.mrf.mxu0 }
  0xf6   :  { %v3215_v59 = vadd.f32 %v199_v58, %v73_v32 }
  0xf7   :  { %v203_v60 = vpop.f32.mrf.mxu0 }
  0xf8   :  { %v3217_v61 = vadd.f32 %v203_v60, %v69_v35 }
  0xf9   :  { %v205_v62 = vpop.f32.mrf.mxu0 }
  0xfa   :  { %v3219_v63 = vadd.f32 %v205_v62, %v73_v32 }
  0xfb   :  { %v209_v1 = vpop.f32.mrf.mxu0 }
  0xfc   :  { %v3221_v3 = vadd.f32 %v209_v1, %v69_v35 }
  0xfd   :  { %v2700_v5 = vpop.eup %2699  ;;  %v211_v10 = vpop.f32.mrf.mxu0 }
  0xfe   :  { %v212_v15 = vadd.f32 %v211_v10, %v73_v32  ;;  %334 = vrot.lane.b32.xlu0 %v2700_v5, %s3004_s3 }
 0x100   :  { %v324_v23 = vadd.f32 %v320_v20, %v212_v15 }
 0x102   :  { %2701 = vtanh.f32 %v324_v23  ;;  %v2639_v27 = vmul.f32 -1.442695, %v324_v23 }
 0x103   :  { %2703 = vpow2.f32 %v2638_v25 }
 0x104   :  { %2705 = vpow2.f32 %v2639_v27 }
 0x10f   :  { %v2702_v24 = vpop.eup %2701 }
 0x110   :  { %358 = vrot.lane.b32.xlu0 %v2702_v24, %s3004_s3  ;;  %v2704_v26 = vpop.eup %2703 }
 0x111   :  { %v328_v30 = vadd.f32 1.0, %v2704_v26  ;;  %v2706_v33 = vpop.eup %2705 }
 0x112   :  { %v352_v37 = vadd.f32 1.0, %v2706_v33 }
 0x113   :  { %2707 = vrcp.f32 %v328_v30 }
 0x114   :  { %2709 = vrcp.f32 %v352_v37 }
 0x120   :  { %v2708_v34 = vpop.eup %2707 }
 0x121   :  { %v2710_v39 = vpop.eup %2709  ;;  %v332_v45 = vmul.f32 0.0, %v2708_v34 }
 0x122   :  { %v356_v51 = vmul.f32 0.0, %v2710_v39 }
 0x170   :  { %v335_v35 = vpop.permute.xlu0 %334 }
 0x171   :  { %v337_v32 = vmul.f32 %v2708_v34, %v335_v35 }
 0x173   :  { %339 = vrot.lane.b32.xlu1 %v337_v32, %s3005_s8 }
 0x182   :  { %v359_v41 = vpop.permute.xlu0 %358 }
 0x183   :  { %v361_v43 = vmul.f32 %v2710_v39, %v359_v41 }
 0x185   :  { %363 = vrot.lane.b32.xlu1 %v361_v43, %s3005_s8 }
 0x1e5   :  { %v340_v46 = vpop.permute.xlu1 %339 }
 0x1e6   :  { %v3227_v48 = vadd.f32 %v340_v46, %v332_v45 }
 0x1e8   :  { %2711 = vtanh.f32 %v3227_v48 }
 0x1f5   :  { %v2712_v49 = vpop.eup %2711 }
 0x1f6   :  { %345 = vrot.lane.b32.xlu0 %v2712_v49, %s3004_s3 }
 0x1f7   :  { %v364_v52 = vpop.permute.xlu1 %363 }
 0x1f8   :  { %v3231_v54 = vadd.f32 %v364_v52, %v356_v51 }
 0x1fa   :  { %2713 = vtanh.f32 %v3231_v54 }
 0x207   :  { %v2714_v56 = vpop.eup %2713 }
 0x208   :  { %369 = vrot.lane.b32.xlu1 %v2714_v56, %s3004_s3 }
 0x268   :  { %v346_v58 = vpop.permute.xlu0 %345 }
 0x269   :  { %v348_v60 = vmul.f32 %v2708_v34, %v346_v58 }
 0x26b   :  { %376 = vrot.lane.b32.xlu0 %v348_v60, %s3005_s8 }
 0x27a   :  { %v370_v62 = vpop.permute.xlu1 %369 }
 0x27b   :  { %v372_v1 = vmul.f32 %v2710_v39, %v370_v62 }
 0x27d   :  { %380 = vrot.lane.b32.xlu1 %v372_v1, %s3004_s3 }
 0x2dd   :  { %v3237_v5 = vpop.permute.xlu0 %376 }
 0x2ef   :  { %v3239_v10 = vpop.permute.xlu1 %380 }
 0x2f0   :  { %v384_v15 = vsel %vm383_vm1, %v3237_v5, %v3239_v10 }
 0x2f1   :  { %2640 = vmatmul.mubr.msk.f32.vlgmr.msra.gmra.mxu1 %vm248_vm2, %v384_v15 }
 0x2f2   :  { %675 = vmatpush1.msra.mxu1 %v3063_v4  ;;  %722 = vmatprep.mubr.f32.mxu1 %v3003_v0 }
 0x2f3   :  { %676 = vmatprep.subr.mxu1 %v3068_v6 }
 0x2f4   :  { %677 = vmatpush1.msra.mxu1 %v3071_v7 }
 0x2f5   :  { %678 = vmatprep.subr.mxu1 %v3073_v8 }
 0x2f6   :  { %679 = vmatpush1.msra.mxu1 %v3077_v9 }
 0x2f7   :  { %680 = vmatprep.subr.mxu1 %v3084_v11 }
 0x2f8   :  { %681 = vmatpush1.msra.mxu1 %v3087_v12 }
 0x2f9   :  { %682 = vmatprep.subr.mxu1 %v3091_v13 }
 0x2fa   :  { %683 = vmatpush1.msra.mxu1 %v3096_v14 }
 0x2fb   :  { %684 = vmatprep.subr.mxu1 %v3103_v16 }
 0x2fc   :  { %685 = vmatpush1.msra.mxu1 %v3106_v17 }
 0x2fd   :  { %686 = vmatprep.subr.mxu1 %v3110_v18 }
 0x2fe   :  { %687 = vmatpush1.msra.mxu1 %v3115_v19 }
 0x2ff   :  { %688 = vmatprep.subr.mxu1 %v3122_v21 }
 0x300   :  { %689 = vmatpush1.msra.mxu1 %v3125_v22 }
 0x301   :  { %944 = vmatprep.subr.mxu1 %v3057_v2 }
 0x3b1   :  { %v454_v20 = vpop.f32.mrf.mxu1 }
 0x3b2   :  { %v459_v23 = vadd.f32 %v454_v20, %v3197_v38 }
 0x3b3   :  { %v456_v24 = vpop.f32.mrf.mxu1 }
 0x3b4   :  { %2715 = vtanh.f32 %v459_v23  ;;  %v460_v25 = vadd.f32 %v456_v24, %v3219_v63  ;;  %v2641_v30 = vmul.f32 -1.442695, %v459_v23 }
 0x3b6   :  { %2717 = vtanh.f32 %v460_v25  ;;  %v2642_v33 = vmul.f32 -1.442695, %v460_v25 }
 0x3b7   :  { %2719 = vpow2.f32 %v2641_v30 }
 0x3b8   :  { %2721 = vpow2.f32 %v2642_v33 }
 0x3c1   :  { %v2716_v26 = vpop.eup %2715 }
 0x3c2   :  { %470 = vrot.lane.b32.xlu0 %v2716_v26, %s3004_s3 }
 0x3c3   :  { %v2718_v27 = vpop.eup %2717 }
 0x3c4   :  { %494 = vrot.lane.b32.xlu1 %v2718_v27, %s3004_s3  ;;  %v2720_v34 = vpop.eup %2719 }
 0x3c5   :  { %v2722_v35 = vpop.eup %2721  ;;  %v464_v32 = vadd.f32 1.0, %v2720_v34 }
 0x3c6   :  { %v488_v37 = vadd.f32 1.0, %v2722_v35 }
 0x3c7   :  { %2723 = vrcp.f32 %v464_v32 }
 0x3c8   :  { %2725 = vrcp.f32 %v488_v37 }
 0x3d4   :  { %v2724_v38 = vpop.eup %2723 }
 0x3d5   :  { %v2726_v41 = vpop.eup %2725  ;;  %v468_v46 = vmul.f32 %v2724_v38, %v3227_v48 }
 0x3d6   :  { %v492_v52 = vmul.f32 %v2726_v41, %v3231_v54 }
 0x434   :  { %v471_v39 = vpop.permute.xlu0 %470 }
 0x435   :  { %v473_v63 = vmul.f32 %v2724_v38, %v471_v39 }
 0x436   :  { %v495_v43 = vpop.permute.xlu1 %494 }
 0x437   :  { %475 = vrot.lane.b32.xlu0 %v473_v63, %s3005_s8  ;;  %v497_v45 = vmul.f32 %v2726_v41, %v495_v43 }
 0x439   :  { %499 = vrot.lane.b32.xlu1 %v497_v45, %s3005_s8 }
 0x4a9   :  { %v476_v49 = vpop.permute.xlu0 %475 }
 0x4aa   :  { %v3269_v51 = vadd.f32 %v476_v49, %v468_v46 }
 0x4ab   :  { %v500_v56 = vpop.permute.xlu1 %499 }
 0x4ac   :  { %2727 = vtanh.f32 %v3269_v51  ;;  %v3273_v58 = vadd.f32 %v500_v56, %v492_v52 }
 0x4ae   :  { %2729 = vtanh.f32 %v3273_v58 }
 0x4b9   :  { %v2728_v60 = vpop.eup %2727 }
 0x4ba   :  { %481 = vrot.lane.b32.xlu0 %v2728_v60, %s3004_s3 }
 0x4bb   :  { %v2730_v62 = vpop.eup %2729 }
 0x4bc   :  { %505 = vrot.lane.b32.xlu1 %v2730_v62, %s3004_s3 }
 0x52c   :  { %v482_v1 = vpop.permute.xlu0 %481 }
 0x52d   :  { %v484_v48 = vmul.f32 %v2724_v38, %v482_v1 }
 0x52e   :  { %v506_v15 = vpop.permute.xlu1 %505 }
 0x52f   :  { %512 = vrot.lane.b32.xlu0 %v484_v48, %s3005_s8  ;;  %v508_v20 = vmul.f32 %v2726_v41, %v506_v15 }
 0x531   :  { %516 = vrot.lane.b32.xlu1 %v508_v20, %s3004_s3 }
 0x5a1   :  { %v3280_v54 = vpop.permute.xlu0 %512 }
 0x5a3   :  { %v3282_v23 = vpop.permute.xlu1 %516 }
 0x5a4   :  { %v519_v24 = vsel %vm383_vm1, %v3280_v54, %v3282_v23 }
 0x5a5   :  { %2643 = vmatmul.mubr.msk.f32.vlgmr.msra.gmra.mxu0 %vm248_vm2, %v519_v24 }
 0x5a6   :  { %810 = vmatpush1.msra.mxu0 %v3063_v4  ;;  %857 = vmatprep.mubr.f32.mxu0 %v3003_v0 }
 0x5a7   :  { %811 = vmatprep.subr.mxu0 %v3068_v6 }
 0x5a8   :  { %812 = vmatpush1.msra.mxu0 %v3071_v7 }
 0x5a9   :  { %813 = vmatprep.subr.mxu0 %v3073_v8 }
 0x5aa   :  { %814 = vmatpush1.msra.mxu0 %v3077_v9 }
 0x5ab   :  { %815 = vmatprep.subr.mxu0 %v3084_v11 }
 0x5ac   :  { %816 = vmatpush1.msra.mxu0 %v3087_v12 }
 0x5ad   :  { %817 = vmatprep.subr.mxu0 %v3091_v13 }
 0x5ae   :  { %818 = vmatpush1.msra.mxu0 %v3096_v14 }
 0x5af   :  { %819 = vmatprep.subr.mxu0 %v3103_v16 }
 0x5b0   :  { %820 = vmatpush1.msra.mxu0 %v3106_v17 }
 0x5b1   :  { %821 = vmatprep.subr.mxu0 %v3110_v18 }
 0x5b2   :  { %822 = vmatpush1.msra.mxu0 %v3115_v19 }
 0x5b3   :  { %823 = vmatprep.subr.mxu0 %v3122_v21 }
 0x5b4   :  { %824 = vmatpush1.msra.mxu0 %v3125_v22 }
 0x5b5   :  { %1079 = vmatprep.subr.mxu0 %v3057_v2 }
 0x665   :  { %v589_v25 = vpop.f32.mrf.mxu0 }
 0x666   :  { %v594_v26 = vadd.f32 %v589_v25, %v3201_v42 }
 0x667   :  { %v591_v27 = vpop.f32.mrf.mxu0 }
 0x668   :  { %2731 = vtanh.f32 %v594_v26  ;;  %v595_v30 = vadd.f32 %v591_v27, %v3215_v59  ;;  %v2644_v35 = vmul.f32 -1.442695, %v594_v26 }
 0x66a   :  { %2733 = vtanh.f32 %v595_v30  ;;  %v2645_v32 = vmul.f32 -1.442695, %v595_v30 }
 0x66b   :  { %2735 = vpow2.f32 %v2644_v35 }
 0x66c   :  { %2737 = vpow2.f32 %v2645_v32 }
 0x675   :  { %v2732_v33 = vpop.eup %2731 }
 0x676   :  { %605 = vrot.lane.b32.xlu0 %v2732_v33, %s3004_s3 }
 0x677   :  { %v2734_v34 = vpop.eup %2733 }
 0x678   :  { %629 = vrot.lane.b32.xlu1 %v2734_v34, %s3004_s3  ;;  %v2736_v37 = vpop.eup %2735 }
 0x679   :  { %v2738_v38 = vpop.eup %2737  ;;  %v599_v39 = vadd.f32 1.0, %v2736_v37 }
 0x67a   :  { %v623_v63 = vadd.f32 1.0, %v2738_v38 }
 0x67b   :  { %2739 = vrcp.f32 %v599_v39 }
 0x67c   :  { %2741 = vrcp.f32 %v623_v63 }
 0x688   :  { %v2740_v42 = vpop.eup %2739 }
 0x689   :  { %v2742_v43 = vpop.eup %2741  ;;  %v603_v49 = vmul.f32 %v2740_v42, %v3269_v51 }
 0x68a   :  { %v627_v60 = vmul.f32 %v2742_v43, %v3273_v58 }
 0x6e8   :  { %v606_v41 = vpop.permute.xlu0 %605 }
 0x6e9   :  { %v608_v59 = vmul.f32 %v2740_v42, %v606_v41 }
 0x6ea   :  { %v630_v45 = vpop.permute.xlu1 %629 }
 0x6eb   :  { %610 = vrot.lane.b32.xlu0 %v608_v59, %s3005_s8  ;;  %v632_v46 = vmul.f32 %v2742_v43, %v630_v45 }
 0x6ed   :  { %634 = vrot.lane.b32.xlu1 %v632_v46, %s3005_s8 }
 0x75d   :  { %v611_v52 = vpop.permute.xlu0 %610 }
 0x75e   :  { %v3312_v56 = vadd.f32 %v611_v52, %v603_v49 }
 0x75f   :  { %v635_v62 = vpop.permute.xlu1 %634 }
 0x760   :  { %2743 = vtanh.f32 %v3312_v56  ;;  %v3316_v1 = vadd.f32 %v635_v62, %v627_v60 }
 0x762   :  { %2745 = vtanh.f32 %v3316_v1 }
 0x76d   :  { %v2744_v48 = vpop.eup %2743 }
 0x76e   :  { %616 = vrot.lane.b32.xlu0 %v2744_v48, %s3004_s3 }
 0x76f   :  { %v2746_v15 = vpop.eup %2745 }
 0x770   :  { %640 = vrot.lane.b32.xlu1 %v2746_v15, %s3004_s3 }
 0x7e0   :  { %v617_v20 = vpop.permute.xlu0 %616 }
 0x7e1   :  { %v619_v51 = vmul.f32 %v2740_v42, %v617_v20 }
 0x7e2   :  { %v641_v24 = vpop.permute.xlu1 %640 }
 0x7e3   :  { %647 = vrot.lane.b32.xlu0 %v619_v51, %s3005_s8  ;;  %v643_v25 = vmul.f32 %v2742_v43, %v641_v24 }
 0x7e5   :  { %651 = vrot.lane.b32.xlu1 %v643_v25, %s3004_s3 }
 0x855   :  { %v3323_v58 = vpop.permute.xlu0 %647 }
 0x857   :  { %v3325_v26 = vpop.permute.xlu1 %651 }
 0x858   :  { %v654_v27 = vsel %vm383_vm1, %v3323_v58, %v3325_v26 }
 0x859   :  { %2646 = vmatmul.mubr.msk.f32.vlgmr.msra.gmra.mxu1 %vm248_vm2, %v654_v27 }
 0x85a   :  { %945 = vmatpush1.msra.mxu1 %v3063_v4  ;;  %992 = vmatprep.mubr.f32.mxu1 %v3003_v0 }
 0x85b   :  { %946 = vmatprep.subr.mxu1 %v3068_v6 }
 0x85c   :  { %947 = vmatpush1.msra.mxu1 %v3071_v7 }
 0x85d   :  { %948 = vmatprep.subr.mxu1 %v3073_v8 }
 0x85e   :  { %949 = vmatpush1.msra.mxu1 %v3077_v9 }
 0x85f   :  { %950 = vmatprep.subr.mxu1 %v3084_v11 }
 0x860   :  { %951 = vmatpush1.msra.mxu1 %v3087_v12 }
 0x861   :  { %952 = vmatprep.subr.mxu1 %v3091_v13 }
 0x862   :  { %953 = vmatpush1.msra.mxu1 %v3096_v14 }
 0x863   :  { %954 = vmatprep.subr.mxu1 %v3103_v16 }
 0x864   :  { %955 = vmatpush1.msra.mxu1 %v3106_v17 }
 0x865   :  { %956 = vmatprep.subr.mxu1 %v3110_v18 }
 0x866   :  { %957 = vmatpush1.msra.mxu1 %v3115_v19 }
 0x867   :  { %958 = vmatprep.subr.mxu1 %v3122_v21 }
 0x868   :  { %959 = vmatpush1.msra.mxu1 %v3125_v22 }
 0x869   :  { %1214 = vmatprep.subr.mxu1 %v3057_v2 }
 0x919   :  { %v724_v30 = vpop.f32.mrf.mxu1 }
 0x91a   :  { %v729_v33 = vadd.f32 %v724_v30, %v3205_v47 }
 0x91b   :  { %v726_v34 = vpop.f32.mrf.mxu1 }
 0x91c   :  { %2747 = vtanh.f32 %v729_v33  ;;  %v730_v35 = vadd.f32 %v726_v34, %v3211_v55  ;;  %v2647_v38 = vmul.f32 -1.442695, %v729_v33 }
 0x91e   :  { %2749 = vtanh.f32 %v730_v35  ;;  %v2648_v39 = vmul.f32 -1.442695, %v730_v35 }
 0x91f   :  { %2751 = vpow2.f32 %v2647_v38 }
 0x920   :  { %2753 = vpow2.f32 %v2648_v39 }
 0x929   :  { %v2748_v32 = vpop.eup %2747 }
 0x92a   :  { %740 = vrot.lane.b32.xlu0 %v2748_v32, %s3004_s3 }
 0x92b   :  { %v2750_v37 = vpop.eup %2749 }
 0x92c   :  { %764 = vrot.lane.b32.xlu1 %v2750_v37, %s3004_s3  ;;  %v2752_v63 = vpop.eup %2751 }
 0x92d   :  { %v2754_v2 = vpop.eup %2753  ;;  %v734_v42 = vadd.f32 1.0, %v2752_v63 }
 0x92e   :  { %v758_v41 = vadd.f32 1.0, %v2754_v2 }
 0x92f   :  { %2755 = vrcp.f32 %v734_v42 }
 0x930   :  { %2757 = vrcp.f32 %v758_v41 }
 0x93c   :  { %v2756_v47 = vpop.eup %2755 }
 0x93d   :  { %v2758_v43 = vpop.eup %2757  ;;  %v738_v49 = vmul.f32 %v2756_v47, %v3312_v56 }
 0x93e   :  { %v762_v62 = vmul.f32 %v2758_v43, %v3316_v1 }
 0x99c   :  { %v741_v59 = vpop.permute.xlu0 %740 }
 0x99d   :  { %v743_v55 = vmul.f32 %v2756_v47, %v741_v59 }
 0x99e   :  { %v765_v45 = vpop.permute.xlu1 %764 }
 0x99f   :  { %745 = vrot.lane.b32.xlu0 %v743_v55, %s3005_s8  ;;  %v767_v46 = vmul.f32 %v2758_v43, %v765_v45 }
 0x9a1   :  { %769 = vrot.lane.b32.xlu1 %v767_v46, %s3005_s8 }
 0xa11   :  { %v746_v52 = vpop.permute.xlu0 %745 }
 0xa12   :  { %v3355_v60 = vadd.f32 %v746_v52, %v738_v49 }
 0xa13   :  { %v770_v48 = vpop.permute.xlu1 %769 }
 0xa14   :  { %2759 = vtanh.f32 %v3355_v60  ;;  %v3359_v15 = vadd.f32 %v770_v48, %v762_v62 }
 0xa16   :  { %2761 = vtanh.f32 %v3359_v15 }
 0xa21   :  { %v2760_v20 = vpop.eup %2759 }
 0xa22   :  { %751 = vrot.lane.b32.xlu0 %v2760_v20, %s3004_s3 }
 0xa23   :  { %v2762_v51 = vpop.eup %2761 }
 0xa24   :  { %775 = vrot.lane.b32.xlu1 %v2762_v51, %s3004_s3 }
 0xa94   :  { %v752_v24 = vpop.permute.xlu0 %751 }
 0xa95   :  { %v754_v56 = vmul.f32 %v2756_v47, %v752_v24 }
 0xa96   :  { %v776_v25 = vpop.permute.xlu1 %775 }
 0xa97   :  { %782 = vrot.lane.b32.xlu0 %v754_v56, %s3005_s8  ;;  %v778_v27 = vmul.f32 %v2758_v43, %v776_v25 }
 0xa99   :  { %786 = vrot.lane.b32.xlu1 %v778_v27, %s3004_s3 }
 0xb09   :  { %v3366_v1 = vpop.permute.xlu0 %782 }
 0xb0b   :  { %v3368_v30 = vpop.permute.xlu1 %786 }
 0xb0c   :  { %v789_v33 = vsel %vm383_vm1, %v3366_v1, %v3368_v30 }
 0xb0d   :  { %2649 = vmatmul.mubr.msk.f32.vlgmr.msra.gmra.mxu0 %vm248_vm2, %v789_v33 }
 0xb0e   :  { %1080 = vmatpush1.msra.mxu0 %v3063_v4  ;;  %1127 = vmatprep.mubr.f32.mxu0 %v3003_v0 }
 0xb0f   :  { %1081 = vmatprep.subr.mxu0 %v3068_v6 }
 0xb10   :  { %1082 = vmatpush1.msra.mxu0 %v3071_v7 }
 0xb11   :  { %1083 = vmatprep.subr.mxu0 %v3073_v8 }
 0xb12   :  { %1084 = vmatpush1.msra.mxu0 %v3077_v9 }
 0xb13   :  { %1085 = vmatprep.subr.mxu0 %v3084_v11 }
 0xb14   :  { %1086 = vmatpush1.msra.mxu0 %v3087_v12 }
 0xb15   :  { %1087 = vmatprep.subr.mxu0 %v3091_v13 }
 0xb16   :  { %1088 = vmatpush1.msra.mxu0 %v3096_v14 }
 0xb17   :  { %1089 = vmatprep.subr.mxu0 %v3103_v16 }
 0xb18   :  { %1090 = vmatpush1.msra.mxu0 %v3106_v17 }
 0xb19   :  { %1091 = vmatprep.subr.mxu0 %v3110_v18 }
 0xb1a   :  { %1092 = vmatpush1.msra.mxu0 %v3115_v19 }
 0xb1b   :  { %1093 = vmatprep.subr.mxu0 %v3122_v21 }
 0xb1c   :  { %1094 = vmatpush1.msra.mxu0 %v3125_v22 }
 0xbcd   :  { %v859_v34 = vpop.f32.mrf.mxu0 }
 0xbce   :  { %v864_v35 = vadd.f32 %v859_v34, %v3209_v53 }
 0xbcf   :  { %v861_v32 = vpop.f32.mrf.mxu0 }
 0xbd0   :  { %2763 = vtanh.f32 %v864_v35  ;;  %v865_v37 = vadd.f32 %v861_v32, %v3207_v50  ;;  %v2650_v63 = vmul.f32 -1.442695, %v864_v35 }
 0xbd2   :  { %2765 = vtanh.f32 %v865_v37  ;;  %v2651_v2 = vmul.f32 -1.442695, %v865_v37 }
 0xbd3   :  { %2767 = vpow2.f32 %v2650_v63 }
 0xbd4   :  { %2769 = vpow2.f32 %v2651_v2 }
 0xbdd   :  { %v2764_v38 = vpop.eup %2763 }
 0xbde   :  { %875 = vrot.lane.b32.xlu0 %v2764_v38, %s3004_s3 }
 0xbdf   :  { %v2766_v39 = vpop.eup %2765 }
 0xbe0   :  { %899 = vrot.lane.b32.xlu1 %v2766_v39, %s3004_s3  ;;  %v2768_v42 = vpop.eup %2767 }
 0xbe1   :  { %v2770_v41 = vpop.eup %2769  ;;  %v869_v47 = vadd.f32 1.0, %v2768_v42 }
 0xbe2   :  { %v893_v59 = vadd.f32 1.0, %v2770_v41 }
 0xbe3   :  { %2771 = vrcp.f32 %v869_v47 }
 0xbe4   :  { %2773 = vrcp.f32 %v893_v59 }
 0xbf0   :  { %v2772_v53 = vpop.eup %2771 }
 0xbf1   :  { %v2774_v43 = vpop.eup %2773  ;;  %v873_v49 = vmul.f32 %v2772_v53, %v3355_v60 }
 0xbf2   :  { %v897_v48 = vmul.f32 %v2774_v43, %v3359_v15 }
 0xc50   :  { %v876_v55 = vpop.permute.xlu0 %875 }
 0xc51   :  { %v878_v50 = vmul.f32 %v2772_v53, %v876_v55 }
 0xc52   :  { %v900_v45 = vpop.permute.xlu1 %899 }
 0xc53   :  { %880 = vrot.lane.b32.xlu0 %v878_v50, %s3005_s8  ;;  %v902_v46 = vmul.f32 %v2774_v43, %v900_v45 }
 0xc55   :  { %904 = vrot.lane.b32.xlu1 %v902_v46, %s3005_s8 }
 0xcc5   :  { %v881_v52 = vpop.permute.xlu0 %880 }
 0xcc6   :  { %v3397_v62 = vadd.f32 %v881_v52, %v873_v49 }
 0xcc7   :  { %v905_v20 = vpop.permute.xlu1 %904 }
 0xcc8   :  { %2775 = vtanh.f32 %v3397_v62  ;;  %v3401_v51 = vadd.f32 %v905_v20, %v897_v48 }
 0xcca   :  { %2777 = vtanh.f32 %v3401_v51 }
 0xcd5   :  { %v2776_v24 = vpop.eup %2775 }
 0xcd6   :  { %886 = vrot.lane.b32.xlu0 %v2776_v24, %s3004_s3 }
 0xcd7   :  { %v2778_v56 = vpop.eup %2777 }
 0xcd8   :  { %910 = vrot.lane.b32.xlu1 %v2778_v56, %s3004_s3 }
 0xd48   :  { %v887_v25 = vpop.permute.xlu0 %886 }
 0xd49   :  { %v889_v60 = vmul.f32 %v2772_v53, %v887_v25 }
 0xd4a   :  { %v911_v27 = vpop.permute.xlu1 %910 }
 0xd4b   :  { %917 = vrot.lane.b32.xlu0 %v889_v60, %s3005_s8  ;;  %v913_v33 = vmul.f32 %v2774_v43, %v911_v27 }
 0xd4d   :  { %921 = vrot.lane.b32.xlu1 %v913_v33, %s3004_s3 }
 0xdbd   :  { %v3408_v15 = vpop.permute.xlu0 %917 }
 0xdbf   :  { %v3410_v34 = vpop.permute.xlu1 %921 }
 0xdc0   :  { %v924_v35 = vsel %vm383_vm1, %v3408_v15, %v3410_v34 }
 0xdc1   :  { %2652 = vmatmul.mubr.msk.f32.vlgmr.msra.gmra.mxu1 %vm248_vm2, %v924_v35 }
 0xdc2   :  { %1215 = vmatpush1.msra.mxu1 %v3063_v4  ;;  %1262 = vmatprep.mubr.f32.mxu1 %v3003_v0 }
 0xdc3   :  { %1216 = vmatprep.subr.mxu1 %v3068_v6 }
 0xdc4   :  { %1217 = vmatpush1.msra.mxu1 %v3071_v7 }
 0xdc5   :  { %1218 = vmatprep.subr.mxu1 %v3073_v8 }
 0xdc6   :  { %1219 = vmatpush1.msra.mxu1 %v3077_v9 }
 0xdc7   :  { %1220 = vmatprep.subr.mxu1 %v3084_v11 }
 0xdc8   :  { %1221 = vmatpush1.msra.mxu1 %v3087_v12 }
 0xdc9   :  { %1222 = vmatprep.subr.mxu1 %v3091_v13 }
 0xdca   :  { %1223 = vmatpush1.msra.mxu1 %v3096_v14 }
 0xdcb   :  { %1224 = vmatprep.subr.mxu1 %v3103_v16 }
 0xdcc   :  { %1225 = vmatpush1.msra.mxu1 %v3106_v17 }
 0xdcd   :  { %1226 = vmatprep.subr.mxu1 %v3110_v18 }
 0xdce   :  { %1227 = vmatpush1.msra.mxu1 %v3115_v19 }
 0xdcf   :  { %1228 = vmatprep.subr.mxu1 %v3122_v21 }
 0xdd0   :  { %1229 = vmatpush1.msra.mxu1 %v3125_v22 }
 0xe81   :  { %v994_v4 = vpop.f32.mrf.mxu1 }
 0xe82   :  { %v999_v6 = vadd.f32 %v994_v4, %v3213_v57 }
 0xe83   :  { %v996_v7 = vpop.f32.mrf.mxu1 }
 0xe84   :  { %2779 = vtanh.f32 %v999_v6  ;;  %v1000_v8 = vadd.f32 %v996_v7, %v3203_v44  ;;  %v2653_v12 = vmul.f32 -1.442695, %v999_v6 }
 0xe86   :  { %2781 = vtanh.f32 %v1000_v8  ;;  %v2654_v13 = vmul.f32 -1.442695, %v1000_v8 }
 0xe87   :  { %2783 = vpow2.f32 %v2653_v12 }
 0xe88   :  { %2785 = vpow2.f32 %v2654_v13 }
 0xe91   :  { %v2780_v9 = vpop.eup %2779 }
 0xe92   :  { %1010 = vrot.lane.b32.xlu0 %v2780_v9, %s3004_s3 }
 0xe93   :  { %v2782_v11 = vpop.eup %2781 }
 0xe94   :  { %1034 = vrot.lane.b32.xlu1 %v2782_v11, %s3004_s3  ;;  %v2784_v14 = vpop.eup %2783 }
 0xe95   :  { %v2786_v16 = vpop.eup %2785  ;;  %v1004_v17 = vadd.f32 1.0, %v2784_v14 }
 0xe96   :  { %v1028_v18 = vadd.f32 1.0, %v2786_v16 }
 0xe97   :  { %2787 = vrcp.f32 %v1004_v17 }
 0xe98   :  { %2789 = vrcp.f32 %v1028_v18 }
 0xea4   :  { %v2788_v19 = vpop.eup %2787 }
 0xea5   :  { %v2790_v44 = vpop.eup %2789  ;;  %v1008_v37 = vmul.f32 %v2788_v19, %v3397_v62 }
 0xea6   :  { %v1032_v63 = vmul.f32 %v2790_v44, %v3401_v51 }
 0xf04   :  { %v1011_v21 = vpop.permute.xlu0 %1010 }
 0xf05   :  { %v1013_v22 = vmul.f32 %v2788_v19, %v1011_v21 }
 0xf06   :  { %v1035_v57 = vpop.permute.xlu1 %1034 }
 0xf07   :  { %1015 = vrot.lane.b32.xlu0 %v1013_v22, %s3005_s8  ;;  %v1037_v32 = vmul.f32 %v2790_v44, %v1035_v57 }
 0xf09   :  { %1039 = vrot.lane.b32.xlu1 %v1037_v32, %s3005_s8 }
 0xf79   :  { %v1016_v38 = vpop.permute.xlu0 %1015 }
 0xf7a   :  { %v1018_v39 = vadd.f32 %v1016_v38, %v1008_v37 }
 0xf7b   :  { %v1040_v2 = vpop.permute.xlu1 %1039 }
 0xf7c   :  { %2791 = vtanh.f32 %v1018_v39  ;;  %v1042_v42 = vadd.f32 %v1040_v2, %v1032_v63 }
 0xf7e   :  { %2793 = vtanh.f32 %v1042_v42 }
 0xf89   :  { %v2792_v41 = vpop.eup %2791 }
 0xf8a   :  { %1021 = vrot.lane.b32.xlu0 %v2792_v41, %s3004_s3 }
 0xf8b   :  { %v2794_v47 = vpop.eup %2793 }
 0xf8c   :  { %1045 = vrot.lane.b32.xlu1 %v2794_v47, %s3004_s3 }
 0xffc   :  { %v1022_v59 = vpop.permute.xlu0 %1021 }
 0xffd   :  { %v1024_v53 = vmul.f32 %v2788_v19, %v1022_v59 }
 0xffe   :  { %v1046_v55 = vpop.permute.xlu1 %1045 }
 0xfff   :  { %1052 = vrot.lane.b32.xlu0 %v1024_v53, %s3005_s8  ;;  %v1048_v50 = vmul.f32 %v2790_v44, %v1046_v55 }
0x1001   :  { %1056 = vrot.lane.b32.xlu1 %v1048_v50, %s3004_s3 }
0x1071   :  { %v3444_v43 = vpop.permute.xlu0 %1052 }
0x1073   :  { %v3446_v45 = vpop.permute.xlu1 %1056 }
0x1074   :  { %v1059_v46 = vsel %vm383_vm1, %v3444_v43, %v3446_v45 }
0x1075   :  { %2655 = vmatmul.mubr.msk.f32.vlgmr.msra.gmra.mxu0 %vm248_vm2, %v1059_v46 }
0x1076   :  { %1451 = vmatprep.mubr.f32.mxu0 %v3003_v0 }
0x1135   :  { %v1129_v49 = vpop.f32.mrf.mxu0 }
0x1136   :  { %v1134_v52 = vadd.f32 %v1129_v49, %v3217_v61 }
0x1137   :  { %v1131_v62 = vpop.f32.mrf.mxu0 }
0x1138   :  { %2795 = vtanh.f32 %v1134_v52  ;;  %v1135_v48 = vadd.f32 %v1131_v62, %v3199_v40  ;;  %v2656_v24 = vmul.f32 -1.442695, %v1134_v52 }
0x113a   :  { %2797 = vtanh.f32 %v1135_v48  ;;  %v2657_v56 = vmul.f32 -1.442695, %v1135_v48 }
0x113b   :  { %2799 = vpow2.f32 %v2656_v24 }
0x113c   :  { %2801 = vpow2.f32 %v2657_v56 }
0x1145   :  { %v2796_v20 = vpop.eup %2795 }
0x1146   :  { %1145 = vrot.lane.b32.xlu0 %v2796_v20, %s3004_s3 }
0x1147   :  { %v2798_v51 = vpop.eup %2797 }
0x1148   :  { %1169 = vrot.lane.b32.xlu1 %v2798_v51, %s3004_s3  ;;  %v2800_v25 = vpop.eup %2799 }
0x1149   :  { %v2802_v60 = vpop.eup %2801  ;;  %v1139_v27 = vadd.f32 1.0, %v2800_v25 }
0x114a   :  { %v1163_v33 = vadd.f32 1.0, %v2802_v60  ;;  %v1350_v60 = vld [vmem:[#allocation5 + $0x78] sm:$0xff] }
0x114b   :  { %2803 = vrcp.f32 %v1139_v27  ;;  %v1349_v27 = vld [vmem:[#allocation5 + $0x70] sm:$0xff]  ;;  %1403 = vmatprep.subr.mxu0 %v1350_v60 }
0x114c   :  { %2805 = vrcp.f32 %v1163_v33  ;;  %v1348_v33 = vld [vmem:[#allocation5 + $0x68] sm:$0xff]  ;;  %1404 = vmatpush1.msra.mxu0 %v1349_v27 }
0x114d   :  { %1405 = vmatprep.subr.mxu0 %v1348_v33 }
0x1158   :  { %v2804_v61 = vpop.eup %2803 }
0x1159   :  { %v2806_v4 = vpop.eup %2805  ;;  %v1143_v8 = vmul.f32 %v2804_v61, %v1018_v39 }
0x115a   :  { %v1167_v12 = vmul.f32 %v2806_v4, %v1042_v42 }
0x11b8   :  { %v1146_v35 = vpop.permute.xlu0 %1145 }
0x11b9   :  { %v1148_v40 = vmul.f32 %v2804_v61, %v1146_v35  ;;  %v1347_v35 = vld [vmem:[#allocation5 + $0x60] sm:$0xff] }
0x11ba   :  { %v1170_v6 = vpop.permute.xlu1 %1169  ;;  %1406 = vmatpush1.msra.mxu0 %v1347_v35 }
0x11bb   :  { %1150 = vrot.lane.b32.xlu0 %v1148_v40, %s3005_s8  ;;  %v1172_v7 = vmul.f32 %v2806_v4, %v1170_v6  ;;  %v3494_v40 = vld [vmem:[%s3985_s5 + $0x70] sm:$0xff]  ;;  %v3500_v6 = vld [vmem:[%s3985_s5 + $0x68] sm:$0xff] }
0x11bd   :  { %1174 = vrot.lane.b32.xlu1 %v1172_v7, %s3005_s8  ;;  %v1345_v7 = vld [vmem:[#allocation5 + $0x50] sm:$0xff] }
0x122d   :  { %v1151_v9 = vpop.permute.xlu0 %1150 }
0x122e   :  { %v1153_v11 = vadd.f32 %v1151_v9, %v1143_v8  ;;  %v3506_v8 = vld [vmem:[%s3985_s5 + $0x60] sm:$0xff]  ;;  %v3511_v9 = vld [vmem:[%s3985_s5 + $0x58] sm:$0xff] }
0x122f   :  { %v1175_v13 = vpop.permute.xlu1 %1174 }
0x1230   :  { %2807 = vtanh.f32 %v1153_v11  ;;  %v1177_v14 = vadd.f32 %v1175_v13, %v1167_v12  ;;  %v3517_v12 = vld [vmem:[%s3985_s5 + $0x50] sm:$0xff]  ;;  %v1343_v13 = vld [vmem:[#allocation5 + $0x40] sm:$0xff] }
0x1232   :  { %2809 = vtanh.f32 %v1177_v14 }
0x123d   :  { %v2808_v16 = vpop.eup %2807 }
0x123e   :  { %1156 = vrot.lane.b32.xlu0 %v2808_v16, %s3004_s3  ;;  %v3524_v16 = vld [vmem:[%s3985_s5 + $0x48] sm:$0xff] }
0x123f   :  { %v2810_v17 = vpop.eup %2809 }
0x1240   :  { %1180 = vrot.lane.b32.xlu1 %v2810_v17, %s3004_s3 }
0x12b0   :  { %v1157_v18 = vpop.permute.xlu0 %1156 }
0x12b1   :  { %v1159_v19 = vmul.f32 %v2804_v61, %v1157_v18  ;;  %v3489_v61 = vld [vmem:[%s3985_s5 + $0x78] sm:$0xff]  ;;  %v1341_v18 = vld [vmem:[#allocation5 + $0x30] sm:$0xff] }
0x12b2   :  { %v1181_v21 = vpop.permute.xlu1 %1180  ;;  %1550 = vmatprep.subr.mxu1 %v3489_v61 }
0x12b3   :  { %1187 = vrot.lane.b32.xlu0 %v1159_v19, %s3005_s8  ;;  %v1183_v22 = vmul.f32 %v2806_v4, %v1181_v21  ;;  %v1346_v4 = vld [vmem:[#allocation5 + $0x58] sm:$0xff]  ;;  %v3530_v19 = vld [vmem:[%s3985_s5 + $0x40] sm:$0xff]  ;;  %v1340_v21 = vld [vmem:[#allocation5 + $0x28] sm:$0xff] }
0x12b4   :  { %1407 = vmatprep.subr.mxu0 %v1346_v4 }
0x12b5   :  { %1191 = vrot.lane.b32.xlu1 %v1183_v22, %s3004_s3  ;;  %1408 = vmatpush1.msra.mxu0 %v1345_v7  ;;  %v3537_v22 = vld [vmem:[%s3985_s5 + $0x38] sm:$0xff] }
0x1325   :  { %v3463_v44 = vpop.permute.xlu0 %1187 }
0x1327   :  { %v3465_v57 = vpop.permute.xlu1 %1191 }
0x1328   :  { %v1194_v32 = vsel %vm383_vm1, %v3463_v44, %v3465_v57 }
0x1329   :  { %2658 = vmatmul.mubr.msk.f32.vlgmr.msra.gmra.mxu1 %vm248_vm2, %v1194_v32  ;;  %v1339_v32 = vld [vmem:[#allocation5 + $0x20] sm:$0xff] }
0x132a   :  { %1598 = vmatprep.mubr.f32.mxu1 %v3003_v0  ;;  %1551 = vmatpush1.msra.mxu1 %v3494_v40 }
0x132b   :  { %1552 = vmatprep.subr.mxu1 %v3500_v6 }
0x132c   :  { %1553 = vmatpush1.msra.mxu1 %v3506_v8 }
0x132d   :  { %1554 = vmatprep.subr.mxu1 %v3511_v9 }
0x132e   :  { %1555 = vmatpush1.msra.mxu1 %v3517_v12 }
0x132f   :  { %1556 = vmatprep.subr.mxu1 %v3524_v16 }
0x1330   :  { %1557 = vmatpush1.msra.mxu1 %v3530_v19 }
0x1331   :  { %1558 = vmatprep.subr.mxu1 %v3537_v22 }
0x13e9   :  { %v1264_v37 = vpop.f32.mrf.mxu1 }
0x13ea   :  { %v1269_v38 = vadd.f32 %v1264_v37, %v3221_v3 }
0x13eb   :  { %v1266_v39 = vpop.f32.mrf.mxu1 }
0x13ec   :  { %2811 = vtanh.f32 %v1269_v38  ;;  %v1270_v63 = vadd.f32 %v1266_v39, %v3195_v36  ;;  %v2659_v41 = vmul.f32 -1.442695, %v1269_v38  ;;  %v3543_v38 = vld [vmem:[%s3985_s5 + $0x30] sm:$0xff]  ;;  %v1338_v39 = vld [vmem:[#allocation5 + $0x18] sm:$0xff] }
0x13ed   :  { %1559 = vmatpush1.msra.mxu1 %v3543_v38 }
0x13ee   :  { %2813 = vtanh.f32 %v1270_v63  ;;  %v2660_v47 = vmul.f32 -1.442695, %v1270_v63  ;;  %v3549_v63 = vld [vmem:[%s3985_s5 + $0x28] sm:$0xff] }
0x13ef   :  { %2815 = vpow2.f32 %v2659_v41  ;;  %1560 = vmatprep.subr.mxu1 %v3549_v63  ;;  %v1336_v41 = vld [vmem:[#allocation5 + $0x8] sm:$0xff] }
0x13f0   :  { %2817 = vpow2.f32 %v2660_v47  ;;  %v3563_v47 = vld [vmem:[%s3985_s5 + $0x18] sm:$0xff] }
0x13f9   :  { %v2812_v2 = vpop.eup %2811 }
0x13fa   :  { %1280 = vrot.lane.b32.xlu1 %v2812_v2, %s3004_s3  ;;  %v1337_v2 = vld [vmem:[#allocation5 + $0x10] sm:$0xff] }
0x13fb   :  { %v2814_v42 = vpop.eup %2813 }
0x13fc   :  { %1304 = vrot.lane.b32.xlu0 %v2814_v42, %s3004_s3  ;;  %v2816_v59 = vpop.eup %2815  ;;  %v3557_v42 = vld [vmem:[%s3985_s5 + $0x20] sm:$0xff] }
0x13fd   :  { %v2818_v53 = vpop.eup %2817  ;;  %v1274_v55 = vadd.f32 1.0, %v2816_v59  ;;  %1561 = vmatpush1.msra.mxu1 %v3557_v42  ;;  %v1335_v59 = vld [vmem:[#allocation5] sm:$0xff] }
0x13fe   :  { %v1298_v50 = vadd.f32 1.0, %v2818_v53  ;;  %1562 = vmatprep.subr.mxu1 %v3563_v47  ;;  %v3569_v53 = vld [vmem:[%s3985_s5 + $0x10] sm:$0xff] }
0x13ff   :  { %2819 = vrcp.f32 %v1274_v55  ;;  %1563 = vmatpush1.msra.mxu1 %v3569_v53  ;;  %v3575_v55 = vld [vmem:[%s3985_s5 + $0x8] sm:$0xff] }
0x1400   :  { %2821 = vrcp.f32 %v1298_v50  ;;  %1564 = vmatprep.subr.mxu1 %v3575_v55  ;;  %v3581_v50 = vld [vmem:[%s3985_s5] sm:$0xff] }
0x1401   :  { %1565 = vmatpush1.msra.mxu1 %v3581_v50 }
0x1402   :  { %1599 = vmatmul.mubr.f32.vlgmr.msra.gmra.mxu1 %v3003_v0  ;;  %1685 = vmatprep.subr.mxu1 %v3489_v61 }
0x1403   :  { %1686 = vmatpush1.msra.mxu1 %v3494_v40  ;;  %1733 = vmatprep.mubr.f32.mxu1 %v3003_v0 }
0x1404   :  { %1687 = vmatprep.subr.mxu1 %v3500_v6 }
0x1405   :  { %1688 = vmatpush1.msra.mxu1 %v3506_v8 }
0x1406   :  { %1689 = vmatprep.subr.mxu1 %v3511_v9 }
0x1407   :  { %1690 = vmatpush1.msra.mxu1 %v3517_v12 }
0x1408   :  { %1691 = vmatprep.subr.mxu1 %v3524_v16 }
0x1409   :  { %1692 = vmatpush1.msra.mxu1 %v3530_v19 }
0x140a   :  { %1693 = vmatprep.subr.mxu1 %v3537_v22 }
0x140b   :  { %1694 = vmatpush1.msra.mxu1 %v3543_v38 }
0x140c   :  { %v3476_v3 = vpop.eup %2819  ;;  %1695 = vmatprep.subr.mxu1 %v3549_v63 }
0x140d   :  { %v3479_v49 = vpop.eup %2821  ;;  %v1278_v48 = vmul.f32 %v3476_v3, %v1153_v11  ;;  %v1344_v11 = vld [vmem:[#allocation5 + $0x48] sm:$0xff]  ;;  %1696 = vmatpush1.msra.mxu1 %v3557_v42 }
0x140e   :  { %v1302_v24 = vmul.f32 %v3479_v49, %v1177_v14  ;;  %v1342_v14 = vld [vmem:[#allocation5 + $0x38] sm:$0xff]  ;;  %1409 = vmatprep.subr.mxu0 %v1344_v11  ;;  %1697 = vmatprep.subr.mxu1 %v3563_v47 }
0x140f   :  { %1410 = vmatpush1.msra.mxu0 %v1343_v13  ;;  %1698 = vmatpush1.msra.mxu1 %v3569_v53 }
0x1410   :  { %1411 = vmatprep.subr.mxu0 %v1342_v14  ;;  %1699 = vmatprep.subr.mxu1 %v3575_v55 }
0x1411   :  { %1412 = vmatpush1.msra.mxu0 %v1341_v18  ;;  %1700 = vmatpush1.msra.mxu1 %v3581_v50 }
0x1412   :  { %1413 = vmatprep.subr.mxu0 %v1340_v21  ;;  %1955 = vmatprep.subr.mxu1 %v3489_v61 }
0x1413   :  { %1414 = vmatpush1.msra.mxu0 %v1339_v32 }
0x1414   :  { %1415 = vmatprep.subr.mxu0 %v1338_v39 }
0x1415   :  { %1416 = vmatpush1.msra.mxu0 %v1337_v2 }
0x1416   :  { %1417 = vmatprep.subr.mxu0 %v1336_v41 }
0x1417   :  { %1418 = vmatpush1.msra.mxu0 %v1335_v59 }
0x1418   :  { %1820 = vmatprep.subr.mxu0 %v3489_v61 }
0x146c   :  { %v1281_v36 = vpop.permute.xlu1 %1280 }
0x146d   :  { %v1283_v46 = vmul.f32 %v3476_v3, %v1281_v36 }
0x146e   :  { %v1305_v52 = vpop.permute.xlu0 %1304 }
0x146f   :  { %1285 = vrot.lane.b32.xlu1 %v1283_v46, %s3005_s8  ;;  %v1307_v62 = vmul.f32 %v3479_v49, %v1305_v52 }
0x1471   :  { %1309 = vrot.lane.b32.xlu0 %v1307_v62, %s3005_s8 }
0x14e1   :  { %v1286_v20 = vpop.permute.xlu1 %1285 }
0x14e2   :  { %v1288_v51 = vadd.f32 %v1286_v20, %v1278_v48  ;;  %v1324_v48 = vsel %vm383_vm1, %v3280_v54, %v3465_v57  ;;  %v1326_v54 = vsel %vm383_vm1, %v3366_v1, %v3410_v34  ;;  %v1328_v1 = vsel %vm383_vm1, %v3444_v43, %v3325_v26  ;;  %v1351_v26 = vld [vmem:[%s3986_s6] sm:$0x3] }
0x14e3   :  { %v1310_v56 = vpop.permute.xlu0 %1309  ;;  %v1356_v43 = vrot.slane %v1351_v26, %v68_v31 }
0x14e4   :  { %2823 = vtanh.f32 %v1288_v51  ;;  %v1312_v25 = vadd.f32 %v1310_v56, %v1302_v24 }
0x14e6   :  { %2825 = vtanh.f32 %v1312_v25 }
0x14f1   :  { %v2824_v17 = vpop.eup %2823 }
0x14f2   :  { %1291 = vrot.lane.b32.xlu1 %v2824_v17, %s3004_s3 }
0x14f3   :  { %v2826_v37 = vpop.eup %2825 }
0x14f4   :  { %1315 = vrot.lane.b32.xlu0 %v2826_v37, %s3004_s3 }
0x1564   :  { %v1292_v36 = vpop.permute.xlu1 %1291 }
0x1565   :  { %v1294_v46 = vmul.f32 %v3476_v3, %v1292_v36 }
0x1566   :  { %v1316_v52 = vpop.permute.xlu0 %1315 }
0x1567   :  { %1331 = vrot.lane.b32.xlu1 %v1294_v46, %s3005_s8  ;;  %v1318_v62 = vmul.f32 %v3479_v49, %v1316_v52 }
0x1569   :  { %1320 = vrot.lane.b32.xlu0 %v1318_v62, %s3004_s3 }
0x15db   :  { %v1321_v3 = vpop.permute.xlu0 %1320 }
0x15dc   :  { %v1323_v49 = vsel %vm383_vm1, %v3237_v5, %v1321_v3  ;;  %v1325_v5 = vsel %vm383_vm1, %v3323_v58, %v3446_v45  ;;  %v1327_v58 = vsel %vm383_vm1, %v3408_v15, %v3368_v30  ;;  %v1329_v30 = vsel %vm383_vm1, %v3463_v44, %v3282_v23  ;;  %v1332_v15 = vpop.permute.xlu1 %1331  ;;  %v1600_v44 = vpop.f32.mrf.mxu1 }
0x15dd   :  { %2661 = vmatmul.mubr.msk.f32.vlgmr.msra.gmra.mxu0 %vm248_vm2, %v1323_v49  ;;  %v1334_v34 = vsel %vm383_vm1, %v1332_v15, %v3239_v10  ;;  %v1360_v23 = vrot.slane %v1351_v26, %v72_v29 }
0x15de   :  { %1457 = vmatprep.mubr.f32.mxu0 %v3003_v0  ;;  %1821 = vmatpush1.msra.mxu0 %v3494_v40  ;;  %v1602_v49 = vpop.f32.mrf.mxu1 }
0x15df   :  { %1822 = vmatprep.subr.mxu0 %v3500_v6 }
0x15e0   :  { %1823 = vmatpush1.msra.mxu0 %v3506_v8 }
0x15e1   :  { %2662 = vmatmul.mubr.msk.f32.gmra.mxu0 %vm248_vm2, %v1324_v48  ;;  %1824 = vmatprep.subr.mxu0 %v3511_v9 }
0x15e2   :  { %1463 = vmatprep.mubr.f32.mxu0 %v3003_v0  ;;  %1825 = vmatpush1.msra.mxu0 %v3517_v12 }
0x15e3   :  { %1826 = vmatprep.subr.mxu0 %v3524_v16 }
0x15e4   :  { %1827 = vmatpush1.msra.mxu0 %v3530_v19 }
0x15e5   :  { %2663 = vmatmul.mubr.msk.f32.gmra.mxu0 %vm248_vm2, %v1325_v5  ;;  %1828 = vmatprep.subr.mxu0 %v3537_v22 }
0x15e6   :  { %1469 = vmatprep.mubr.f32.mxu0 %v3003_v0  ;;  %1829 = vmatpush1.msra.mxu0 %v3543_v38 }
0x15e7   :  { %1830 = vmatprep.subr.mxu0 %v3549_v63 }
0x15e8   :  { %1831 = vmatpush1.msra.mxu0 %v3557_v42 }
0x15e9   :  { %2664 = vmatmul.mubr.msk.f32.gmra.mxu0 %vm248_vm2, %v1326_v54  ;;  %1832 = vmatprep.subr.mxu0 %v3563_v47 }
0x15ea   :  { %1475 = vmatprep.mubr.f32.mxu0 %v3003_v0  ;;  %1833 = vmatpush1.msra.mxu0 %v3569_v53 }
0x15eb   :  { %1834 = vmatprep.subr.mxu0 %v3575_v55 }
0x15ec   :  { %1835 = vmatpush1.msra.mxu0 %v3581_v50 }
0x15ed   :  { %2665 = vmatmul.mubr.msk.f32.gmra.mxu0 %vm248_vm2, %v1327_v58  ;;  %2090 = vmatprep.subr.mxu0 %v3489_v61 }
0x15ee   :  { %1481 = vmatprep.mubr.f32.mxu0 %v3003_v0 }
0x15f1   :  { %2666 = vmatmul.mubr.msk.f32.gmra.mxu0 %vm248_vm2, %v1328_v1 }
0x15f2   :  { %1487 = vmatprep.mubr.f32.mxu0 %v3003_v0 }
0x15f5   :  { %2667 = vmatmul.mubr.msk.f32.gmra.mxu0 %vm248_vm2, %v1329_v30 }
0x15f6   :  { %1493 = vmatprep.mubr.f32.mxu0 %v3003_v0 }
0x15f9   :  { %2668 = vmatmul.mubr.msk.f32.gmra.mxu0 %vm248_vm2, %v1334_v34 }
0x15fa   :  { %1868 = vmatprep.mubr.f32.mxu0 %v3003_v0 }
0x169d   :  { %v1453_v45 = vpop.f32.mrf.mxu0 }
0x169e   :  { %v1454_v57 = vadd.f32 %v1453_v45, %v1356_v43 }
0x169f   :  { %v1455_v20 = vpop.f32.mrf.mxu0 }
0x16a0   :  { %v3669_v51 = vadd.f32 %v1455_v20, %v1360_v23  ;;  %v1605_v10 = vadd.f32 %v1600_v44, %v1454_v57 }
0x16a1   :  { %v1459_v24 = vpop.f32.mrf.mxu0 }
0x16a2   :  { %2827 = vtanh.f32 %v1605_v10  ;;  %v3671_v56 = vadd.f32 %v1459_v24, %v1356_v43  ;;  %v2669_v54 = vmul.f32 -1.442695, %v1605_v10 }
0x16a3   :  { %v1461_v25 = vpop.f32.mrf.mxu0 }
0x16a4   :  { %v3673_v60 = vadd.f32 %v1461_v25, %v1360_v23 }
0x16a5   :  { %v1465_v27 = vpop.f32.mrf.mxu0 }
0x16a6   :  { %v3675_v33 = vadd.f32 %v1465_v27, %v1356_v43 }
0x16a7   :  { %v1467_v31 = vpop.f32.mrf.mxu0 }
0x16a8   :  { %v3677_v28 = vadd.f32 %v1467_v31, %v1360_v23 }
0x16a9   :  { %v1471_v29 = vpop.f32.mrf.mxu0 }
0x16aa   :  { %v3679_v35 = vadd.f32 %v1471_v29, %v1356_v43 }
0x16ab   :  { %v1473_v4 = vpop.f32.mrf.mxu0 }
0x16ac   :  { %v3681_v7 = vadd.f32 %v1473_v4, %v1360_v23 }
0x16ad   :  { %v1477_v11 = vpop.f32.mrf.mxu0 }
0x16ae   :  { %v3683_v13 = vadd.f32 %v1477_v11, %v1356_v43 }
0x16af   :  { %v2828_v14 = vpop.eup %2827  ;;  %v1479_v17 = vpop.f32.mrf.mxu0 }
0x16b0   :  { %v3685_v18 = vadd.f32 %v1479_v17, %v1360_v23  ;;  %1616 = vrot.lane.b32.xlu0 %v2828_v14, %s3004_s3 }
0x16b1   :  { %v1483_v21 = vpop.f32.mrf.mxu0 }
0x16b2   :  { %v3688_v32 = vadd.f32 %v1483_v21, %v1356_v43 }
0x16b3   :  { %v1485_v37 = vpop.f32.mrf.mxu0 }
0x16b4   :  { %v3690_v39 = vadd.f32 %v1485_v37, %v1360_v23 }
0x16b5   :  { %v1489_v2 = vpop.f32.mrf.mxu0 }
0x16b6   :  { %v3692_v41 = vadd.f32 %v1489_v2, %v1356_v43 }
0x16b7   :  { %v1491_v59 = vpop.f32.mrf.mxu0 }
0x16b8   :  { %v3694_v36 = vadd.f32 %v1491_v59, %v1360_v23 }
0x16b9   :  { %v1495_v46 = vpop.f32.mrf.mxu0 }
0x16ba   :  { %v3696_v52 = vadd.f32 %v1495_v46, %v1356_v43 }
0x16bb   :  { %v1497_v62 = vpop.f32.mrf.mxu0 }
0x16bc   :  { %v1498_v3 = vadd.f32 %v1497_v62, %v1360_v23 }
0x16be   :  { %v1606_v48 = vadd.f32 %v1602_v49, %v1498_v3 }
0x16c0   :  { %2829 = vtanh.f32 %v1606_v48  ;;  %v2670_v30 = vmul.f32 -1.442695, %v1606_v48 }
0x16c1   :  { %2831 = vpow2.f32 %v2669_v54 }
0x16cd   :  { %v2830_v5 = vpop.eup %2829 }
0x16ce   :  { %1640 = vrot.lane.b32.xlu1 %v2830_v5, %s3004_s3  ;;  %v2832_v58 = vpop.eup %2831 }
0x16cf   :  { %v1610_v1 = vadd.f32 1.0, %v2832_v58 }
0x16d1   :  { %2833 = vrcp.f32 %v1610_v1 }
0x16d2   :  { %2835 = vpow2.f32 %v2670_v30 }
0x16de   :  { %v2834_v15 = vpop.eup %2833 }
0x16df   :  { %v2836_v43 = vpop.eup %2835  ;;  %v1614_v20 = vmul.f32 0.0, %v2834_v15 }
0x16e0   :  { %v1634_v23 = vadd.f32 1.0, %v2836_v43 }
0x16e2   :  { %2837 = vrcp.f32 %v1634_v23 }
0x16ef   :  { %v2838_v45 = vpop.eup %2837 }
0x16f0   :  { %v1638_v27 = vmul.f32 0.0, %v2838_v45 }
0x1722   :  { %v1617_v34 = vpop.permute.xlu0 %1616 }
0x1723   :  { %v1619_v26 = vmul.f32 %v2834_v15, %v1617_v34 }
0x1725   :  { %1621 = vrot.lane.b32.xlu0 %v1619_v26, %s3005_s8 }
0x1740   :  { %v1641_v44 = vpop.permute.xlu1 %1640 }
0x1741   :  { %v1643_v57 = vmul.f32 %v2838_v45, %v1641_v44 }
0x1743   :  { %1645 = vrot.lane.b32.xlu1 %v1643_v57, %s3005_s8 }
0x1797   :  { %v1622_v10 = vpop.permute.xlu0 %1621 }
0x1798   :  { %v3701_v24 = vadd.f32 %v1622_v10, %v1614_v20 }
0x179a   :  { %2839 = vtanh.f32 %v3701_v24 }
0x17a7   :  { %v2840_v25 = vpop.eup %2839 }
0x17a8   :  { %1627 = vrot.lane.b32.xlu0 %v2840_v25, %s3004_s3 }
0x17b5   :  { %v1646_v31 = vpop.permute.xlu1 %1645 }
0x17b6   :  { %v1648_v29 = vadd.f32 %v1646_v31, %v1638_v27 }
0x17b8   :  { %2841 = vtanh.f32 %v1648_v29 }
0x17c5   :  { %v2842_v4 = vpop.eup %2841 }
0x17c6   :  { %1651 = vrot.lane.b32.xlu1 %v2842_v4, %s3004_s3 }
0x181a   :  { %v1628_v11 = vpop.permute.xlu0 %1627 }
0x181b   :  { %v1630_v14 = vmul.f32 %v2834_v15, %v1628_v11 }
0x181d   :  { %1658 = vrot.lane.b32.xlu0 %v1630_v14, %s3005_s8 }
0x1838   :  { %v1652_v17 = vpop.permute.xlu1 %1651 }
0x1839   :  { %v1654_v21 = vmul.f32 %v2838_v45, %v1652_v17 }
0x183b   :  { %1662 = vrot.lane.b32.xlu1 %v1654_v21, %s3004_s3 }
0x188f   :  { %v3708_v37 = vpop.permute.xlu0 %1658 }
0x18ad   :  { %v3710_v2 = vpop.permute.xlu1 %1662 }
0x18ae   :  { %v1665_v59 = vsel %vm383_vm1, %v3708_v37, %v3710_v2 }
0x18af   :  { %2671 = vmatmul.mubr.msk.f32.vlgmr.msra.gmra.mxu1 %vm248_vm2, %v1665_v59 }
0x18b0   :  { %1956 = vmatpush1.msra.mxu1 %v3494_v40  ;;  %2003 = vmatprep.mubr.f32.mxu1 %v3003_v0 }
0x18b1   :  { %1957 = vmatprep.subr.mxu1 %v3500_v6 }
0x18b2   :  { %1958 = vmatpush1.msra.mxu1 %v3506_v8 }
0x18b3   :  { %1959 = vmatprep.subr.mxu1 %v3511_v9 }
0x18b4   :  { %1960 = vmatpush1.msra.mxu1 %v3517_v12 }
0x18b5   :  { %1961 = vmatprep.subr.mxu1 %v3524_v16 }
0x18b6   :  { %1962 = vmatpush1.msra.mxu1 %v3530_v19 }
0x18b7   :  { %1963 = vmatprep.subr.mxu1 %v3537_v22 }
0x18b8   :  { %1964 = vmatpush1.msra.mxu1 %v3543_v38 }
0x18b9   :  { %1965 = vmatprep.subr.mxu1 %v3549_v63 }
0x18ba   :  { %1966 = vmatpush1.msra.mxu1 %v3557_v42 }
0x18bb   :  { %1967 = vmatprep.subr.mxu1 %v3563_v47 }
0x18bc   :  { %1968 = vmatpush1.msra.mxu1 %v3569_v53 }
0x18bd   :  { %1969 = vmatprep.subr.mxu1 %v3575_v55 }
0x18be   :  { %1970 = vmatpush1.msra.mxu1 %v3581_v50 }
0x18bf   :  { %2225 = vmatprep.subr.mxu1 %v3489_v61 }
0x196f   :  { %v1735_v46 = vpop.f32.mrf.mxu1 }
0x1970   :  { %v1740_v62 = vadd.f32 %v1735_v46, %v3671_v56 }
0x1971   :  { %v1737_v3 = vpop.f32.mrf.mxu1 }
0x1972   :  { %2843 = vtanh.f32 %v1740_v62  ;;  %v1741_v49 = vadd.f32 %v1737_v3, %v3694_v36  ;;  %v2672_v54 = vmul.f32 -1.442695, %v1740_v62 }
0x1974   :  { %2845 = vtanh.f32 %v1741_v49  ;;  %v2673_v58 = vmul.f32 -1.442695, %v1741_v49 }
0x1975   :  { %2847 = vpow2.f32 %v2672_v54 }
0x1976   :  { %2849 = vpow2.f32 %v2673_v58 }
0x197f   :  { %v2844_v48 = vpop.eup %2843 }
0x1980   :  { %1751 = vrot.lane.b32.xlu0 %v2844_v48, %s3004_s3 }
0x1981   :  { %v2846_v5 = vpop.eup %2845 }
0x1982   :  { %1775 = vrot.lane.b32.xlu1 %v2846_v5, %s3004_s3  ;;  %v2848_v1 = vpop.eup %2847 }
0x1983   :  { %v2850_v30 = vpop.eup %2849  ;;  %v1745_v15 = vadd.f32 1.0, %v2848_v1 }
0x1984   :  { %v1769_v34 = vadd.f32 1.0, %v2850_v30 }
0x1985   :  { %2851 = vrcp.f32 %v1745_v15 }
0x1986   :  { %2853 = vrcp.f32 %v1769_v34 }
0x1992   :  { %v2852_v56 = vpop.eup %2851 }
0x1993   :  { %v2854_v43 = vpop.eup %2853  ;;  %v1749_v44 = vmul.f32 %v2852_v56, %v3701_v24 }
0x1994   :  { %v1773_v10 = vmul.f32 %v2854_v43, %v1648_v29 }
0x19f2   :  { %v1752_v26 = vpop.permute.xlu0 %1751 }
0x19f3   :  { %v1754_v36 = vmul.f32 %v2852_v56, %v1752_v26 }
0x19f4   :  { %v1776_v23 = vpop.permute.xlu1 %1775 }
0x19f5   :  { %1756 = vrot.lane.b32.xlu0 %v1754_v36, %s3005_s8  ;;  %v1778_v45 = vmul.f32 %v2854_v43, %v1776_v23 }
0x19f7   :  { %1780 = vrot.lane.b32.xlu1 %v1778_v45, %s3005_s8 }
0x1a67   :  { %v1757_v57 = vpop.permute.xlu0 %1756 }
0x1a68   :  { %v3740_v20 = vadd.f32 %v1757_v57, %v1749_v44 }
0x1a69   :  { %v1781_v25 = vpop.permute.xlu1 %1780 }
0x1a6a   :  { %2855 = vtanh.f32 %v3740_v20  ;;  %v3743_v27 = vadd.f32 %v1781_v25, %v1773_v10 }
0x1a6c   :  { %2857 = vtanh.f32 %v3743_v27 }
0x1a77   :  { %v2856_v31 = vpop.eup %2855 }
0x1a78   :  { %1762 = vrot.lane.b32.xlu0 %v2856_v31, %s3004_s3 }
0x1a79   :  { %v2858_v4 = vpop.eup %2857 }
0x1a7a   :  { %1786 = vrot.lane.b32.xlu1 %v2858_v4, %s3004_s3 }
0x1aea   :  { %v1763_v11 = vpop.permute.xlu0 %1762 }
0x1aeb   :  { %v1765_v14 = vmul.f32 %v2852_v56, %v1763_v11 }
0x1aec   :  { %v1787_v24 = vpop.permute.xlu1 %1786 }
0x1aed   :  { %1793 = vrot.lane.b32.xlu0 %v1765_v14, %s3005_s8  ;;  %v1789_v17 = vmul.f32 %v2854_v43, %v1787_v24 }
0x1aef   :  { %1797 = vrot.lane.b32.xlu1 %v1789_v17, %s3004_s3 }
0x1b5f   :  { %v3750_v29 = vpop.permute.xlu0 %1793 }
0x1b61   :  { %v3752_v21 = vpop.permute.xlu1 %1797 }
0x1b62   :  { %v1800_v59 = vsel %vm383_vm1, %v3750_v29, %v3752_v21 }
0x1b63   :  { %2674 = vmatmul.mubr.msk.f32.vlgmr.msra.gmra.mxu0 %vm248_vm2, %v1800_v59 }
0x1b64   :  { %2091 = vmatpush1.msra.mxu0 %v3494_v40  ;;  %2138 = vmatprep.mubr.f32.mxu0 %v3003_v0 }
0x1b65   :  { %2092 = vmatprep.subr.mxu0 %v3500_v6 }
0x1b66   :  { %2093 = vmatpush1.msra.mxu0 %v3506_v8 }
0x1b67   :  { %2094 = vmatprep.subr.mxu0 %v3511_v9 }
0x1b68   :  { %2095 = vmatpush1.msra.mxu0 %v3517_v12 }
0x1b69   :  { %2096 = vmatprep.subr.mxu0 %v3524_v16 }
0x1b6a   :  { %2097 = vmatpush1.msra.mxu0 %v3530_v19 }
0x1b6b   :  { %2098 = vmatprep.subr.mxu0 %v3537_v22 }
0x1b6c   :  { %2099 = vmatpush1.msra.mxu0 %v3543_v38 }
0x1b6d   :  { %2100 = vmatprep.subr.mxu0 %v3549_v63 }
0x1b6e   :  { %2101 = vmatpush1.msra.mxu0 %v3557_v42 }
0x1b6f   :  { %2102 = vmatprep.subr.mxu0 %v3563_v47 }
0x1b70   :  { %2103 = vmatpush1.msra.mxu0 %v3569_v53 }
0x1b71   :  { %2104 = vmatprep.subr.mxu0 %v3575_v55 }
0x1b72   :  { %2105 = vmatpush1.msra.mxu0 %v3581_v50 }
0x1b73   :  { %2360 = vmatprep.subr.mxu0 %v3489_v61 }
0x1c23   :  { %v1870_v46 = vpop.f32.mrf.mxu0 }
0x1c24   :  { %v1875_v62 = vadd.f32 %v1870_v46, %v3675_v33 }
0x1c25   :  { %v1872_v3 = vpop.f32.mrf.mxu0 }
0x1c26   :  { %2859 = vtanh.f32 %v1875_v62  ;;  %v1876_v49 = vadd.f32 %v1872_v3, %v3690_v39  ;;  %v2675_v54 = vmul.f32 -1.442695, %v1875_v62 }
0x1c28   :  { %2861 = vtanh.f32 %v1876_v49  ;;  %v2676_v58 = vmul.f32 -1.442695, %v1876_v49 }
0x1c29   :  { %2863 = vpow2.f32 %v2675_v54 }
0x1c2a   :  { %2865 = vpow2.f32 %v2676_v58 }
0x1c33   :  { %v2860_v48 = vpop.eup %2859 }
0x1c34   :  { %1886 = vrot.lane.b32.xlu0 %v2860_v48, %s3004_s3 }
0x1c35   :  { %v2862_v5 = vpop.eup %2861 }
0x1c36   :  { %1910 = vrot.lane.b32.xlu1 %v2862_v5, %s3004_s3  ;;  %v2864_v1 = vpop.eup %2863 }
0x1c37   :  { %v2866_v30 = vpop.eup %2865  ;;  %v1880_v15 = vadd.f32 1.0, %v2864_v1 }
0x1c38   :  { %v1904_v34 = vadd.f32 1.0, %v2866_v30 }
0x1c39   :  { %2867 = vrcp.f32 %v1880_v15 }
0x1c3a   :  { %2869 = vrcp.f32 %v1904_v34 }
0x1c46   :  { %v2868_v33 = vpop.eup %2867 }
0x1c47   :  { %v2870_v26 = vpop.eup %2869  ;;  %v1884_v23 = vmul.f32 %v2868_v33, %v3740_v20 }
0x1c48   :  { %v1908_v57 = vmul.f32 %v2870_v26, %v3743_v27 }
0x1ca6   :  { %v1887_v56 = vpop.permute.xlu0 %1886 }
0x1ca7   :  { %v1889_v39 = vmul.f32 %v2868_v33, %v1887_v56 }
0x1ca8   :  { %v1911_v36 = vpop.permute.xlu1 %1910 }
0x1ca9   :  { %1891 = vrot.lane.b32.xlu0 %v1889_v39, %s3005_s8  ;;  %v1913_v43 = vmul.f32 %v2870_v26, %v1911_v36 }
0x1cab   :  { %1915 = vrot.lane.b32.xlu1 %v1913_v43, %s3005_s8 }
0x1d1b   :  { %v1892_v45 = vpop.permute.xlu0 %1891 }
0x1d1c   :  { %v3782_v44 = vadd.f32 %v1892_v45, %v1884_v23 }
0x1d1d   :  { %v1916_v10 = vpop.permute.xlu1 %1915 }
0x1d1e   :  { %2871 = vtanh.f32 %v3782_v44  ;;  %v3786_v25 = vadd.f32 %v1916_v10, %v1908_v57 }
0x1d20   :  { %2873 = vtanh.f32 %v3786_v25 }
0x1d2b   :  { %v2872_v31 = vpop.eup %2871 }
0x1d2c   :  { %1897 = vrot.lane.b32.xlu0 %v2872_v31, %s3004_s3 }
0x1d2d   :  { %v2874_v4 = vpop.eup %2873 }
0x1d2e   :  { %1921 = vrot.lane.b32.xlu1 %v2874_v4, %s3004_s3 }
0x1d9e   :  { %v1898_v11 = vpop.permute.xlu0 %1897 }
0x1d9f   :  { %v1900_v20 = vmul.f32 %v2868_v33, %v1898_v11 }
0x1da0   :  { %v1922_v14 = vpop.permute.xlu1 %1921 }
0x1da1   :  { %1928 = vrot.lane.b32.xlu0 %v1900_v20, %s3005_s8  ;;  %v1924_v24 = vmul.f32 %v2870_v26, %v1922_v14 }
0x1da3   :  { %1932 = vrot.lane.b32.xlu1 %v1924_v24, %s3004_s3 }
0x1e13   :  { %v3793_v27 = vpop.permute.xlu0 %1928 }
0x1e15   :  { %v3795_v17 = vpop.permute.xlu1 %1932 }
0x1e16   :  { %v1935_v59 = vsel %vm383_vm1, %v3793_v27, %v3795_v17 }
0x1e17   :  { %2677 = vmatmul.mubr.msk.f32.vlgmr.msra.gmra.mxu1 %vm248_vm2, %v1935_v59 }
0x1e18   :  { %2226 = vmatpush1.msra.mxu1 %v3494_v40  ;;  %2273 = vmatprep.mubr.f32.mxu1 %v3003_v0 }
0x1e19   :  { %2227 = vmatprep.subr.mxu1 %v3500_v6 }
0x1e1a   :  { %2228 = vmatpush1.msra.mxu1 %v3506_v8 }
0x1e1b   :  { %2229 = vmatprep.subr.mxu1 %v3511_v9 }
0x1e1c   :  { %2230 = vmatpush1.msra.mxu1 %v3517_v12 }
0x1e1d   :  { %2231 = vmatprep.subr.mxu1 %v3524_v16 }
0x1e1e   :  { %2232 = vmatpush1.msra.mxu1 %v3530_v19 }
0x1e1f   :  { %2233 = vmatprep.subr.mxu1 %v3537_v22 }
0x1e20   :  { %2234 = vmatpush1.msra.mxu1 %v3543_v38 }
0x1e21   :  { %2235 = vmatprep.subr.mxu1 %v3549_v63 }
0x1e22   :  { %2236 = vmatpush1.msra.mxu1 %v3557_v42 }
0x1e23   :  { %2237 = vmatprep.subr.mxu1 %v3563_v47 }
0x1e24   :  { %2238 = vmatpush1.msra.mxu1 %v3569_v53 }
0x1e25   :  { %2239 = vmatprep.subr.mxu1 %v3575_v55 }
0x1e26   :  { %2240 = vmatpush1.msra.mxu1 %v3581_v50 }
0x1e27   :  { %2495 = vmatprep.subr.mxu1 %v3489_v61 }
0x1ed7   :  { %v2005_v46 = vpop.f32.mrf.mxu1 }
0x1ed8   :  { %v2010_v62 = vadd.f32 %v2005_v46, %v3679_v35 }
0x1ed9   :  { %v2007_v3 = vpop.f32.mrf.mxu1 }
0x1eda   :  { %2875 = vtanh.f32 %v2010_v62  ;;  %v2011_v49 = vadd.f32 %v2007_v3, %v3685_v18  ;;  %v2678_v54 = vmul.f32 -1.442695, %v2010_v62 }
0x1edc   :  { %2877 = vtanh.f32 %v2011_v49  ;;  %v2679_v58 = vmul.f32 -1.442695, %v2011_v49 }
0x1edd   :  { %2879 = vpow2.f32 %v2678_v54 }
0x1ede   :  { %2881 = vpow2.f32 %v2679_v58 }
0x1ee7   :  { %v2876_v48 = vpop.eup %2875 }
0x1ee8   :  { %2021 = vrot.lane.b32.xlu0 %v2876_v48, %s3004_s3 }
0x1ee9   :  { %v2878_v5 = vpop.eup %2877 }
0x1eea   :  { %2045 = vrot.lane.b32.xlu1 %v2878_v5, %s3004_s3  ;;  %v2880_v1 = vpop.eup %2879 }
0x1eeb   :  { %v2882_v61 = vpop.eup %2881  ;;  %v2015_v30 = vadd.f32 1.0, %v2880_v1 }
0x1eec   :  { %v2039_v15 = vadd.f32 1.0, %v2882_v61 }
0x1eed   :  { %2883 = vrcp.f32 %v2015_v30 }
0x1eee   :  { %2885 = vrcp.f32 %v2039_v15 }
0x1efa   :  { %v2884_v35 = vpop.eup %2883 }
0x1efb   :  { %v2886_v33 = vpop.eup %2885  ;;  %v2019_v26 = vmul.f32 %v2884_v35, %v3782_v44 }
0x1efc   :  { %v2043_v23 = vmul.f32 %v2886_v33, %v3786_v25 }
0x1f5a   :  { %v2022_v34 = vpop.permute.xlu0 %2021 }
0x1f5b   :  { %v2024_v18 = vmul.f32 %v2884_v35, %v2022_v34 }
0x1f5c   :  { %v2046_v56 = vpop.permute.xlu1 %2045 }
0x1f5d   :  { %2026 = vrot.lane.b32.xlu0 %v2024_v18, %s3005_s8  ;;  %v2048_v39 = vmul.f32 %v2886_v33, %v2046_v56 }
0x1f5f   :  { %2050 = vrot.lane.b32.xlu1 %v2048_v39, %s3005_s8 }
0x1fcf   :  { %v2027_v36 = vpop.permute.xlu0 %2026 }
0x1fd0   :  { %v3825_v43 = vadd.f32 %v2027_v36, %v2019_v26 }
0x1fd1   :  { %v2051_v45 = vpop.permute.xlu1 %2050 }
0x1fd2   :  { %2887 = vtanh.f32 %v3825_v43  ;;  %v3829_v57 = vadd.f32 %v2051_v45, %v2043_v23 }
0x1fd4   :  { %2889 = vtanh.f32 %v3829_v57 }
0x1fdf   :  { %v2888_v10 = vpop.eup %2887 }
0x1fe0   :  { %2032 = vrot.lane.b32.xlu0 %v2888_v10, %s3004_s3 }
0x1fe1   :  { %v2890_v31 = vpop.eup %2889 }
0x1fe2   :  { %2056 = vrot.lane.b32.xlu1 %v2890_v31, %s3004_s3 }
0x2052   :  { %v2033_v4 = vpop.permute.xlu0 %2032 }
0x2053   :  { %v2035_v44 = vmul.f32 %v2884_v35, %v2033_v4 }
0x2054   :  { %v2057_v11 = vpop.permute.xlu1 %2056 }
0x2055   :  { %2063 = vrot.lane.b32.xlu0 %v2035_v44, %s3005_s8  ;;  %v2059_v20 = vmul.f32 %v2886_v33, %v2057_v11 }
0x2057   :  { %2067 = vrot.lane.b32.xlu1 %v2059_v20, %s3004_s3 }
0x20c7   :  { %v3836_v25 = vpop.permute.xlu0 %2063 }
0x20c9   :  { %v3838_v14 = vpop.permute.xlu1 %2067 }
0x20ca   :  { %v2070_v24 = vsel %vm383_vm1, %v3836_v25, %v3838_v14 }
0x20cb   :  { %2680 = vmatmul.mubr.msk.f32.vlgmr.msra.gmra.mxu0 %vm248_vm2, %v2070_v24 }
0x20cc   :  { %2361 = vmatpush1.msra.mxu0 %v3494_v40  ;;  %2408 = vmatprep.mubr.f32.mxu0 %v3003_v0 }
0x20cd   :  { %2362 = vmatprep.subr.mxu0 %v3500_v6 }
0x20ce   :  { %2363 = vmatpush1.msra.mxu0 %v3506_v8 }
0x20cf   :  { %2364 = vmatprep.subr.mxu0 %v3511_v9 }
0x20d0   :  { %2365 = vmatpush1.msra.mxu0 %v3517_v12 }
0x20d1   :  { %2366 = vmatprep.subr.mxu0 %v3524_v16 }
0x20d2   :  { %2367 = vmatpush1.msra.mxu0 %v3530_v19 }
0x20d3   :  { %2368 = vmatprep.subr.mxu0 %v3537_v22 }
0x20d4   :  { %2369 = vmatpush1.msra.mxu0 %v3543_v38 }
0x20d5   :  { %2370 = vmatprep.subr.mxu0 %v3549_v63 }
0x20d6   :  { %2371 = vmatpush1.msra.mxu0 %v3557_v42 }
0x20d7   :  { %2372 = vmatprep.subr.mxu0 %v3563_v47 }
0x20d8   :  { %2373 = vmatpush1.msra.mxu0 %v3569_v53 }
0x20d9   :  { %2374 = vmatprep.subr.mxu0 %v3575_v55 }
0x20da   :  { %2375 = vmatpush1.msra.mxu0 %v3581_v50 }
0x218b   :  { %v2140_v59 = vpop.f32.mrf.mxu0 }
0x218c   :  { %v2145_v46 = vadd.f32 %v2140_v59, %v3683_v13 }
0x218d   :  { %v2142_v62 = vpop.f32.mrf.mxu0 }
0x218e   :  { %2891 = vtanh.f32 %v2145_v46  ;;  %v2146_v3 = vadd.f32 %v2142_v62, %v3681_v7  ;;  %v2681_v5 = vmul.f32 -1.442695, %v2145_v46 }
0x2190   :  { %2893 = vtanh.f32 %v2146_v3  ;;  %v2682_v54 = vmul.f32 -1.442695, %v2146_v3 }
0x2191   :  { %2895 = vpow2.f32 %v2681_v5 }
0x2192   :  { %2897 = vpow2.f32 %v2682_v54 }
0x219b   :  { %v2892_v49 = vpop.eup %2891 }
0x219c   :  { %2156 = vrot.lane.b32.xlu0 %v2892_v49, %s3004_s3 }
0x219d   :  { %v2894_v48 = vpop.eup %2893 }
0x219e   :  { %2180 = vrot.lane.b32.xlu1 %v2894_v48, %s3004_s3  ;;  %v2896_v58 = vpop.eup %2895 }
0x219f   :  { %v2898_v1 = vpop.eup %2897  ;;  %v2150_v61 = vadd.f32 1.0, %v2896_v58 }
0x21a0   :  { %v2174_v30 = vadd.f32 1.0, %v2898_v1 }
0x21a1   :  { %2899 = vrcp.f32 %v2150_v61 }
0x21a2   :  { %2901 = vrcp.f32 %v2174_v30 }
0x21ae   :  { %v2900_v13 = vpop.eup %2899 }
0x21af   :  { %v2902_v35 = vpop.eup %2901  ;;  %v2154_v33 = vmul.f32 %v2900_v13, %v3825_v43 }
0x21b0   :  { %v2178_v26 = vmul.f32 %v2902_v35, %v3829_v57 }
0x220e   :  { %v2157_v15 = vpop.permute.xlu0 %2156 }
0x220f   :  { %v2159_v7 = vmul.f32 %v2900_v13, %v2157_v15 }
0x2210   :  { %v2181_v34 = vpop.permute.xlu1 %2180 }
0x2211   :  { %2161 = vrot.lane.b32.xlu0 %v2159_v7, %s3005_s8  ;;  %v2183_v18 = vmul.f32 %v2902_v35, %v2181_v34 }
0x2213   :  { %2185 = vrot.lane.b32.xlu1 %v2183_v18, %s3005_s8 }
0x2283   :  { %v2162_v56 = vpop.permute.xlu0 %2161 }
0x2284   :  { %v3867_v39 = vadd.f32 %v2162_v56, %v2154_v33 }
0x2285   :  { %v2186_v36 = vpop.permute.xlu1 %2185 }
0x2286   :  { %2903 = vtanh.f32 %v3867_v39  ;;  %v3871_v23 = vadd.f32 %v2186_v36, %v2178_v26 }
0x2288   :  { %2905 = vtanh.f32 %v3871_v23 }
0x2293   :  { %v2904_v45 = vpop.eup %2903 }
0x2294   :  { %2167 = vrot.lane.b32.xlu0 %v2904_v45, %s3004_s3 }
0x2295   :  { %v2906_v10 = vpop.eup %2905 }
0x2296   :  { %2191 = vrot.lane.b32.xlu1 %v2906_v10, %s3004_s3 }
0x2306   :  { %v2168_v31 = vpop.permute.xlu0 %2167 }
0x2307   :  { %v2170_v43 = vmul.f32 %v2900_v13, %v2168_v31 }
0x2308   :  { %v2192_v4 = vpop.permute.xlu1 %2191 }
0x2309   :  { %2198 = vrot.lane.b32.xlu0 %v2170_v43, %s3005_s8  ;;  %v2194_v44 = vmul.f32 %v2902_v35, %v2192_v4 }
0x230b   :  { %2202 = vrot.lane.b32.xlu1 %v2194_v44, %s3004_s3 }
0x237b   :  { %v2199_v57 = vpop.permute.xlu0 %2198 }
0x237c   :  { %v2608_v11 = vsel %vm383_vm1, %v2199_v57, %v3838_v14 }
0x237d   :  { %2620 = vst.msk [vmem:[%s3987_s7 + $0x20] sm:$0xff] %vm248_vm2, %v2608_v11  ;;  %v2203_v20 = vpop.permute.xlu1 %2202 }
0x237e   :  { %v2205_v24 = vsel %vm383_vm1, %v2199_v57, %v2203_v20  ;;  %v2607_v59 = vsel %vm383_vm1, %v3836_v25, %v2203_v20 }
0x237f   :  { %2619 = vst.msk [vmem:[%s3987_s7 + $0x18] sm:$0xff] %vm248_vm2, %v2607_v59  ;;  %2683 = vmatmul.mubr.msk.f32.vlgmr.msra.gmra.mxu1 %vm248_vm2, %v2205_v24 }
0x2380   :  { %2496 = vmatpush1.msra.mxu1 %v3494_v40  ;;  %2543 = vmatprep.mubr.f32.mxu1 %v3003_v0 }
0x2381   :  { %2497 = vmatprep.subr.mxu1 %v3500_v6 }
0x2382   :  { %2498 = vmatpush1.msra.mxu1 %v3506_v8 }
0x2383   :  { %2499 = vmatprep.subr.mxu1 %v3511_v9 }
0x2384   :  { %2500 = vmatpush1.msra.mxu1 %v3517_v12 }
0x2385   :  { %2501 = vmatprep.subr.mxu1 %v3524_v16 }
0x2386   :  { %2502 = vmatpush1.msra.mxu1 %v3530_v19 }
0x2387   :  { %2503 = vmatprep.subr.mxu1 %v3537_v22 }
0x2388   :  { %2504 = vmatpush1.msra.mxu1 %v3543_v38 }
0x2389   :  { %2505 = vmatprep.subr.mxu1 %v3549_v63 }
0x238a   :  { %2506 = vmatpush1.msra.mxu1 %v3557_v42 }
0x238b   :  { %2507 = vmatprep.subr.mxu1 %v3563_v47 }
0x238c   :  { %2508 = vmatpush1.msra.mxu1 %v3569_v53 }
0x238d   :  { %2509 = vmatprep.subr.mxu1 %v3575_v55 }
0x238e   :  { %2510 = vmatpush1.msra.mxu1 %v3581_v50 }
0x243f   :  { %v2275_v0 = vpop.f32.mrf.mxu1 }
0x2440   :  { %v2280_v40 = vadd.f32 %v2275_v0, %v3688_v32 }
0x2441   :  { %v2277_v6 = vpop.f32.mrf.mxu1 }
0x2442   :  { %2907 = vtanh.f32 %v2280_v40  ;;  %v2281_v8 = vadd.f32 %v2277_v6, %v3677_v28  ;;  %v2684_v16 = vmul.f32 -1.442695, %v2280_v40 }
0x2444   :  { %2909 = vtanh.f32 %v2281_v8  ;;  %v2685_v19 = vmul.f32 -1.442695, %v2281_v8 }
0x2445   :  { %2911 = vpow2.f32 %v2684_v16 }
0x2446   :  { %2913 = vpow2.f32 %v2685_v19 }
0x244f   :  { %v2908_v9 = vpop.eup %2907 }
0x2450   :  { %2291 = vrot.lane.b32.xlu0 %v2908_v9, %s3004_s3 }
0x2451   :  { %v2910_v12 = vpop.eup %2909 }
0x2452   :  { %2315 = vrot.lane.b32.xlu1 %v2910_v12, %s3004_s3  ;;  %v2912_v22 = vpop.eup %2911 }
0x2453   :  { %v2914_v38 = vpop.eup %2913  ;;  %v2285_v63 = vadd.f32 1.0, %v2912_v22 }
0x2454   :  { %v2309_v42 = vadd.f32 1.0, %v2914_v38 }
0x2455   :  { %2915 = vrcp.f32 %v2285_v63 }
0x2456   :  { %2917 = vrcp.f32 %v2309_v42 }
0x2462   :  { %v2916_v47 = vpop.eup %2915 }
0x2463   :  { %v2918_v50 = vpop.eup %2917  ;;  %v2289_v25 = vmul.f32 %v2916_v47, %v3867_v39 }
0x2464   :  { %v2313_v62 = vmul.f32 %v2918_v50, %v3871_v23 }
0x24c2   :  { %v2292_v53 = vpop.permute.xlu0 %2291 }
0x24c3   :  { %v2294_v55 = vmul.f32 %v2916_v47, %v2292_v53 }
0x24c4   :  { %v2316_v28 = vpop.permute.xlu1 %2315 }
0x24c5   :  { %2296 = vrot.lane.b32.xlu0 %v2294_v55, %s3005_s8  ;;  %v2318_v32 = vmul.f32 %v2918_v50, %v2316_v28 }
0x24c7   :  { %2320 = vrot.lane.b32.xlu1 %v2318_v32, %s3005_s8 }
0x2537   :  { %v2297_v14 = vpop.permute.xlu0 %2296 }
0x2538   :  { %v2299_v46 = vadd.f32 %v2297_v14, %v2289_v25 }
0x2539   :  { %v2321_v3 = vpop.permute.xlu1 %2320 }
0x253a   :  { %2919 = vtanh.f32 %v2299_v46  ;;  %v2323_v49 = vadd.f32 %v2321_v3, %v2313_v62 }
0x253c   :  { %2921 = vtanh.f32 %v2323_v49 }
0x2547   :  { %v2920_v48 = vpop.eup %2919 }
0x2548   :  { %2302 = vrot.lane.b32.xlu0 %v2920_v48, %s3004_s3 }
0x2549   :  { %v2922_v5 = vpop.eup %2921 }
0x254a   :  { %2326 = vrot.lane.b32.xlu1 %v2922_v5, %s3004_s3 }
0x25ba   :  { %v2303_v54 = vpop.permute.xlu0 %2302 }
0x25bb   :  { %v2305_v58 = vmul.f32 %v2916_v47, %v2303_v54 }
0x25bc   :  { %v2327_v1 = vpop.permute.xlu1 %2326 }
0x25bd   :  { %2333 = vrot.lane.b32.xlu0 %v2305_v58, %s3005_s8  ;;  %v2329_v61 = vmul.f32 %v2918_v50, %v2327_v1 }
0x25bf   :  { %2337 = vrot.lane.b32.xlu1 %v2329_v61, %s3004_s3 }
0x262f   :  { %v2334_v30 = vpop.permute.xlu0 %2333 }
0x2630   :  { %v2609_v13 = vsel %vm383_vm1, %v2334_v30, %v3795_v17 }
0x2631   :  { %2621 = vst.msk [vmem:[%s3987_s7 + $0x28] sm:$0xff] %vm248_vm2, %v2609_v13  ;;  %v2338_v15 = vpop.permute.xlu1 %2337 }
0x2632   :  { %v2340_v7 = vsel %vm383_vm1, %v2334_v30, %v2338_v15  ;;  %v2606_v35 = vsel %vm383_vm1, %v3793_v27, %v2338_v15 }
0x2633   :  { %2618 = vst.msk [vmem:[%s3987_s7 + $0x10] sm:$0xff] %vm248_vm2, %v2606_v35  ;;  %2686 = vmatmul.mubr.msk.f32.vlgmr.msra.gmra.mxu0 %vm248_vm2, %v2340_v7 }
0x26f3   :  { %v2410_v34 = vpop.f32.mrf.mxu0 }
0x26f4   :  { %v2415_v17 = vadd.f32 %v2410_v34, %v3692_v41 }
0x26f5   :  { %v2412_v18 = vpop.f32.mrf.mxu0 }
0x26f6   :  { %2923 = vtanh.f32 %v2415_v17  ;;  %v2416_v33 = vadd.f32 %v2412_v18, %v3673_v60  ;;  %v2687_v27 = vmul.f32 -1.442695, %v2415_v17 }
0x26f8   :  { %2925 = vtanh.f32 %v2416_v33  ;;  %v2688_v26 = vmul.f32 -1.442695, %v2416_v33 }
0x26f9   :  { %2927 = vpow2.f32 %v2687_v27 }
0x26fa   :  { %2929 = vpow2.f32 %v2688_v26 }
0x2703   :  { %v2924_v56 = vpop.eup %2923 }
0x2704   :  { %2426 = vrot.lane.b32.xlu0 %v2924_v56, %s3004_s3 }
0x2705   :  { %v2926_v39 = vpop.eup %2925 }
0x2706   :  { %2450 = vrot.lane.b32.xlu1 %v2926_v39, %s3004_s3  ;;  %v2928_v36 = vpop.eup %2927 }
0x2707   :  { %v2930_v23 = vpop.eup %2929  ;;  %v2420_v45 = vadd.f32 1.0, %v2928_v36 }
0x2708   :  { %v2444_v10 = vadd.f32 1.0, %v2930_v23 }
0x2709   :  { %2931 = vrcp.f32 %v2420_v45 }
0x270a   :  { %2933 = vrcp.f32 %v2444_v10 }
0x2716   :  { %v2932_v41 = vpop.eup %2931 }
0x2717   :  { %v2934_v43 = vpop.eup %2933  ;;  %v2424_v57 = vmul.f32 %v2932_v41, %v2299_v46 }
0x2718   :  { %v2448_v24 = vmul.f32 %v2934_v43, %v2323_v49 }
0x2776   :  { %v2427_v31 = vpop.permute.xlu0 %2426 }
0x2777   :  { %v2429_v60 = vmul.f32 %v2932_v41, %v2427_v31 }
0x2778   :  { %v2451_v4 = vpop.permute.xlu1 %2450 }
0x2779   :  { %2431 = vrot.lane.b32.xlu0 %v2429_v60, %s3005_s8  ;;  %v2453_v44 = vmul.f32 %v2934_v43, %v2451_v4 }
0x277b   :  { %2455 = vrot.lane.b32.xlu1 %v2453_v44, %s3005_s8 }
0x27eb   :  { %v2432_v11 = vpop.permute.xlu0 %2431 }
0x27ec   :  { %v2434_v20 = vadd.f32 %v2432_v11, %v2424_v57 }
0x27ed   :  { %v2456_v59 = vpop.permute.xlu1 %2455 }
0x27ee   :  { %2935 = vtanh.f32 %v2434_v20  ;;  %v2458_v0 = vadd.f32 %v2456_v59, %v2448_v24 }
0x27f0   :  { %2937 = vtanh.f32 %v2458_v0 }
0x27fb   :  { %v2936_v40 = vpop.eup %2935 }
0x27fc   :  { %2437 = vrot.lane.b32.xlu0 %v2936_v40, %s3004_s3 }
0x27fd   :  { %v2938_v6 = vpop.eup %2937 }
0x27fe   :  { %2461 = vrot.lane.b32.xlu1 %v2938_v6, %s3004_s3 }
0x286e   :  { %v2438_v8 = vpop.permute.xlu0 %2437 }
0x286f   :  { %v2440_v9 = vmul.f32 %v2932_v41, %v2438_v8 }
0x2870   :  { %v2462_v12 = vpop.permute.xlu1 %2461 }
0x2871   :  { %2468 = vrot.lane.b32.xlu0 %v2440_v9, %s3005_s8  ;;  %v2464_v16 = vmul.f32 %v2934_v43, %v2462_v12 }
0x2873   :  { %2472 = vrot.lane.b32.xlu1 %v2464_v16, %s3004_s3 }
0x28e3   :  { %v2469_v19 = vpop.permute.xlu0 %2468 }
0x28e4   :  { %v2610_v22 = vsel %vm383_vm1, %v2469_v19, %v3752_v21 }
0x28e5   :  { %2622 = vst.msk [vmem:[%s3987_s7 + $0x30] sm:$0xff] %vm248_vm2, %v2610_v22  ;;  %v2473_v38 = vpop.permute.xlu1 %2472 }
0x28e6   :  { %v2475_v63 = vsel %vm383_vm1, %v2469_v19, %v2473_v38  ;;  %v2605_v42 = vsel %vm383_vm1, %v3750_v29, %v2473_v38 }
0x28e7   :  { %2617 = vst.msk [vmem:[%s3987_s7 + $0x8] sm:$0xff] %vm248_vm2, %v2605_v42  ;;  %2689 = vmatmul.mubr.msk.f32.vlgmr.msra.gmra.mxu1 %vm248_vm2, %v2475_v63 }
0x29a7   :  { %v2545_v47 = vpop.f32.mrf.mxu1 }
0x29a8   :  { %v2550_v21 = vadd.f32 %v2545_v47, %v3696_v52 }
0x29a9   :  { %v2547_v53 = vpop.f32.mrf.mxu1 }
0x29aa   :  { %2939 = vtanh.f32 %v2550_v21  ;;  %v2551_v55 = vadd.f32 %v2547_v53, %v3669_v51  ;;  %v2690_v29 = vmul.f32 -1.442695, %v2550_v21 }
0x29ac   :  { %2941 = vtanh.f32 %v2551_v55  ;;  %v2691_v32 = vmul.f32 -1.442695, %v2551_v55 }
0x29ad   :  { %2943 = vpow2.f32 %v2690_v29 }
0x29ae   :  { %2945 = vpow2.f32 %v2691_v32 }
0x29b7   :  { %v2940_v50 = vpop.eup %2939 }
0x29b8   :  { %2561 = vrot.lane.b32.xlu0 %v2940_v50, %s3004_s3 }
0x29b9   :  { %v2942_v28 = vpop.eup %2941 }
0x29ba   :  { %2585 = vrot.lane.b32.xlu1 %v2942_v28, %s3004_s3  ;;  %v2944_v25 = vpop.eup %2943 }
0x29bb   :  { %v2946_v14 = vpop.eup %2945  ;;  %v2555_v46 = vadd.f32 1.0, %v2944_v25 }
0x29bc   :  { %v2579_v62 = vadd.f32 1.0, %v2946_v14 }
0x29bd   :  { %2947 = vrcp.f32 %v2555_v46 }
0x29be   :  { %2949 = vrcp.f32 %v2579_v62 }
0x29ca   :  { %v2948_v52 = vpop.eup %2947 }
0x29cb   :  { %v2950_v49 = vpop.eup %2949  ;;  %v2559_v54 = vmul.f32 %v2948_v52, %v2434_v20 }
0x29cc   :  { %v2583_v61 = vmul.f32 %v2950_v49, %v2458_v0 }
0x2a2a   :  { %v2562_v3 = vpop.permute.xlu0 %2561 }
0x2a2b   :  { %v2564_v51 = vmul.f32 %v2948_v52, %v2562_v3 }
0x2a2c   :  { %v2586_v48 = vpop.permute.xlu1 %2585 }
0x2a2d   :  { %2566 = vrot.lane.b32.xlu0 %v2564_v51, %s3005_s8  ;;  %v2588_v5 = vmul.f32 %v2950_v49, %v2586_v48 }
0x2a2f   :  { %2590 = vrot.lane.b32.xlu1 %v2588_v5, %s3005_s8 }
0x2a9f   :  { %v2567_v58 = vpop.permute.xlu0 %2566 }
0x2aa0   :  { %v2569_v1 = vadd.f32 %v2567_v58, %v2559_v54 }
0x2aa1   :  { %v2591_v30 = vpop.permute.xlu1 %2590 }
0x2aa2   :  { %2951 = vtanh.f32 %v2569_v1  ;;  %v2593_v13 = vadd.f32 %v2591_v30, %v2583_v61 }
0x2aa4   :  { %2953 = vtanh.f32 %v2593_v13 }
0x2aaf   :  { %v2952_v15 = vpop.eup %2951 }
0x2ab0   :  { %2572 = vrot.lane.b32.xlu0 %v2952_v15, %s3004_s3 }
0x2ab1   :  { %v2954_v7 = vpop.eup %2953 }
0x2ab2   :  { %2596 = vrot.lane.b32.xlu1 %v2954_v7, %s3004_s3 }
0x2b22   :  { %v2573_v35 = vpop.permute.xlu0 %2572 }
0x2b23   :  { %v2575_v34 = vmul.f32 %v2948_v52, %v2573_v35 }
0x2b24   :  { %v2597_v17 = vpop.permute.xlu1 %2596 }
0x2b25   :  { %2612 = vrot.lane.b32.xlu1 %v2575_v34, %s3005_s8  ;;  %v2599_v18 = vmul.f32 %v2950_v49, %v2597_v17 }
0x2b27   :  { %2601 = vrot.lane.b32.xlu0 %v2599_v18, %s3004_s3 }
0x2b97   :  { %v2613_v33 = vpop.permute.xlu1 %2612 }
0x2b98   :  { %v2615_v56 = vsel %vm383_vm1, %v2613_v33, %v3710_v2 }
0x2b99   :  { %2623 = vst.msk [vmem:[%s3987_s7 + $0x38] sm:$0xff] %vm248_vm2, %v2615_v56  ;;  %v2602_v39 = vpop.permute.xlu0 %2601 }
0x2b9a   :  { %v2604_v27 = vsel %vm383_vm1, %v3708_v37, %v2602_v39 }
0x2b9b   :  { %2616 = vst.msk [vmem:[%s3987_s7] sm:$0xff] %vm248_vm2, %v2604_v27 }
0x2b9c   :  { %2628 = vsyncpa [#allocation4], 1 }
0x2b9d   :  { %2629 = vsyncpa [#allocation6], 1 }

</bundles_post_ra>
